<compile_context>
chip_gen: v7x
topology: tpu7x:2x2x1
jax: 0.10.0
libtpu: 0.0.40
codegen_flags: <defaults>
</compile_context>

<pallas_src>
import functools

import jax
import jax.numpy as jnp
from jax.experimental import pallas as pl
from jax.experimental.pallas import tpu as pltpu


# ----------------------------------------------------------------------------
# Pallas kernel: one full MSBlock forward for one batch element.
# ----------------------------------------------------------------------------
def _msblock_kernel(x_ref, mask_ref, w_in_ref, b_in_ref, w1_ref, b1_ref,
                    wdw_ref, bdw_ref, w2_ref, b2_ref, w_out_ref, b_out_ref,
                    o_ref, *, H, W, k, mid_channel, layers_num,
                    branch_identity):
    HW = H * W
    r = k // 2
    mc = mid_channel

    def silu(v):
        return v * (1.0 / (1.0 + jnp.exp(-v)))

    x = x_ref[0]                                              # (inc, HW)

    # ---- in_conv: 1x1 conv (+folded BN) + SiLU == one MXU matmul -----------
    a = silu(jnp.dot(w_in_ref[...], x, preferred_element_type=jnp.float32)
             + b_in_ref[...])                                 # (in_channel, HW)

    # ---- static taps for the depthwise k x k conv; masks loaded ONCE -------
    taps = []
    ti = 0
    for dy in range(-r, r + 1):
        for dx in range(-r, r + 1):
            d = dy * W + dx
            m = None if d == 0 else mask_ref[ti]              # (1, HW)
            taps.append((d, ti, m))
            ti += 1

    def depthwise(t, wdw):                                    # t (G,HW), wdw (G,k*k)
        acc = None
        for d, tidx, m in taps:
            w_col = wdw[:, tidx:tidx + 1]                     # (G, 1) per-channel tap
            if d == 0:
                contrib = t * w_col
            else:
                shifted = pltpu.roll(t, shift=(-d) % HW, axis=1)   # y[p] = t[p+d]
                contrib = (shifted * w_col) * m               # zero out-of-image taps
            acc = contrib if acc is None else acc + contrib
        return acc

    # ---- branch loop (mirrors the PyTorch forward exactly) -----------------
    chans = []
    lidx = 0
    for i, is_identity in enumerate(branch_identity):
        ch = a[i * mc:(i + 1) * mc, :]                        # (mc, HW), sublane slice
        if i >= 1:
            ch = ch + chans[i - 1]
        if not is_identity:
            for _ in range(layers_num):                       # MSBlockLayer x layers_num
                t = silu(jnp.dot(w1_ref[lidx], ch,
                                 preferred_element_type=jnp.float32)
                         + b1_ref[lidx])                      # (G, HW)  1x1 expand
                t = silu(depthwise(t, wdw_ref[lidx]) + bdw_ref[lidx])   # dw kxk
                ch = silu(jnp.dot(w2_ref[lidx], t,
                                  preferred_element_type=jnp.float32)
                          + b2_ref[lidx])                     # (mc, HW) 1x1 project
                lidx += 1
        chans.append(ch)

    # sublane-aligned concat (mc is a multiple of 8 here) then one fused matmul
    cat = chans[0] if len(chans) == 1 else jnp.concatenate(chans, axis=0)
    out = silu(jnp.dot(w_out_ref[...], cat, preferred_element_type=jnp.float32)
               + b_out_ref[...])                              # (ouc, HW)
    o_ref[0] = out                                            # lane-dense store


# ----------------------------------------------------------------------------
# Parameter packing for the kernel (channels-first matmul weights, 2-D biases)
# ----------------------------------------------------------------------------
def _pack_params(params, inc):
    w_in, b_in = params["in_conv"]
    w_out, b_out = params["out_conv"]
    in_channel = w_in.shape[0]

    w1s, b1s, wds, bds, w2s, b2s = [], [], [], [], [], []
    for branch in params["branches"]:
        if branch is None:
            continue
        for layer in branch:
            w1, b1 = layer["in_"]
            wd, bd = layer["mid"]
            w2, b2 = layer["out"]
            g, mc = w1.shape[0], w1.shape[1]
            kk = wd.shape[-1]
            w1s.append(w1.reshape(g, mc))
            b1s.append(b1.reshape(g, 1))
            wds.append(wd.reshape(g, kk * kk))
            bds.append(bd.reshape(g, 1))
            w2s.append(w2.reshape(mc, g))
            b2s.append(b2.reshape(mc, 1))
    assert w1s, "MSBlock needs at least one non-identity branch for this kernel"

    return dict(
        w_in=w_in.reshape(in_channel, inc), b_in=b_in.reshape(in_channel, 1),
        w_out=w_out.reshape(w_out.shape[0], in_channel),
        b_out=b_out.reshape(-1, 1),
        w1=jnp.stack(w1s), b1=jnp.stack(b1s),
        wdw=jnp.stack(wds), bdw=jnp.stack(bds),
        w2=jnp.stack(w2s), b2=jnp.stack(b2s))


# ----------------------------------------------------------------------------
# Wrapper: lane-dense reshapes + pallas_call setup.
# ----------------------------------------------------------------------------
def msblock_pallas(x_nchw, params, *, layers_num):
    N, inc, H, W = x_nchw.shape
    HW = H * W

    branch_identity = tuple(br is None for br in params["branches"])
    in_channel = params["in_conv"][0].shape[0]
    mid_channel = in_channel // len(branch_identity)

    ksizes = {br[0]["mid"][0].shape[-1]
              for br in params["branches"] if br is not None}
    assert len(ksizes) == 1, "all non-identity branches must share one kernel size"
    k = ksizes.pop()
    assert k % 2 == 1
    r = k // 2

    p = _pack_params(params, inc)
    ouc = p["w_out"].shape[0]

    # Static boundary masks for the depthwise taps (constant-folded by XLA,
    # DMA'd once per grid step, reused by every layer inside the kernel).
    hh, ww = jnp.meshgrid(jnp.arange(H), jnp.arange(W), indexing="ij")
    hh = hh.reshape(1, HW)
    ww = ww.reshape(1, HW)
    masks = []
    for dy in range(-r, r + 1):
        for dx in range(-r, r + 1):
            valid = ((hh + dy >= 0) & (hh + dy < H) &
                     (ww + dx >= 0) & (ww + dx < W))
            masks.append(valid.astype(jnp.float32))
    masks = jnp.stack(masks)                                  # (k*k, 1, HW)

    # Free reshape: NCHW is already channels-first, just flatten the spatial
    # dims so the last (lane) axis is HW (= 256 here, lane-dense).
    x = x_nchw.reshape(N, inc, HW).astype(jnp.float32)

    kernel = functools.partial(
        _msblock_kernel, H=H, W=W, k=k, mid_channel=mid_channel,
        layers_num=int(layers_num), branch_identity=branch_identity)

    def fullspec(arr):
        return pl.BlockSpec(arr.shape, lambda n, _r=arr.ndim: (0,) * _r)

    out = pl.pallas_call(
        kernel,
        out_shape=jax.ShapeDtypeStruct((N, ouc, HW), jnp.float32),
        grid=(N,),
        in_specs=[
            pl.BlockSpec((1, inc, HW), lambda n: (n, 0, 0)),
            fullspec(masks),
            fullspec(p["w_in"]), fullspec(p["b_in"]),
            fullspec(p["w1"]), fullspec(p["b1"]),
            fullspec(p["wdw"]), fullspec(p["bdw"]),
            fullspec(p["w2"]), fullspec(p["b2"]),
            fullspec(p["w_out"]), fullspec(p["b_out"]),
        ],
        out_specs=pl.BlockSpec((1, ouc, HW), lambda n: (n, 0, 0)),
        compiler_params=pltpu.CompilerParams(
            dimension_semantics=("parallel",)),
    )(x, masks, p["w_in"], p["b_in"], p["w1"], p["b1"],
      p["wdw"], p["bdw"], p["w2"], p["b2"], p["w_out"], p["b_out"])

    return out.reshape(N, ouc, H, W)


# ----------------------------------------------------------------------------
# Deterministic parameter construction (Conv2d(bias=False)+BN folded -> w, b)
# ----------------------------------------------------------------------------
def make_params(key, inc, ouc, kernel_sizes, in_expand_ratio, mid_expand_ratio,
                layers_num, in_down_ratio):
    in_channel = int(inc * in_expand_ratio // in_down_ratio)
    mid_channel = in_channel // len(kernel_sizes)
    groups = int(mid_channel * mid_expand_ratio)

    n_keys = 4 + 8 * len(kernel_sizes) * int(layers_num)
    keys = iter(jax.random.split(key, n_keys))

    def fold_conv_bn(cout, cin, ksz):
        kw, kg, kb, km, kv = jax.random.split(next(keys), 5)
        w = 0.2 * jax.random.normal(kw, (cout, cin, ksz, ksz), jnp.float32)
        gamma = 1.0 + 0.1 * jax.random.normal(kg, (cout,), jnp.float32)
        beta = 0.1 * jax.random.normal(kb, (cout,), jnp.float32)
        mean = 0.1 * jax.random.normal(km, (cout,), jnp.float32)
        var = jnp.abs(1.0 + 0.1 * jax.random.normal(kv, (cout,), jnp.float32))
        scale = gamma * jax.lax.rsqrt(var + 1e-5)
        return w * scale[:, None, None, None], beta - mean * scale

    params = {
        "in_conv": fold_conv_bn(in_channel, inc, 1),
        "out_conv": fold_conv_bn(ouc, in_channel, 1),
        "branches": [],
    }
    for ksz in kernel_sizes:
        if ksz == 1:
            params["branches"].append(None)
            continue
        layers = []
        for _ in range(int(layers_num)):
            layers.append(dict(
                in_=fold_conv_bn(groups, mid_channel, 1),
                mid=fold_conv_bn(groups, 1, ksz),          # depthwise (g=groups)
                out=fold_conv_bn(mid_channel, groups, 1)))
        params["branches"].append(layers)
    return params


# ----------------------------------------------------------------------------
# Pure-JAX reference (for correctness check only)
# ----------------------------------------------------------------------------
def _conv_bn_silu_ref(x, w, b, *, groups=1):
    y = jax.lax.conv_general_dilated(
        x, w, window_strides=(1, 1), padding="SAME",
        dimension_numbers=("NCHW", "OIHW", "NCHW"),
        feature_group_count=groups)
    y = y + b[None, :, None, None]
    return y * jax.nn.sigmoid(y)


def msblock_ref(x, params):
    in_channel = params["in_conv"][0].shape[0]
    mc = in_channel // len(params["branches"])
    out = _conv_bn_silu_ref(x, *params["in_conv"])
    chans = []
    for i, branch in enumerate(params["branches"]):
        ch = out[:, i * mc:(i + 1) * mc]
        if i >= 1:
            ch = ch + chans[i - 1]
        if branch is not None:
            for layer in branch:
                ch = _conv_bn_silu_ref(ch, *layer["in_"])
                ch = _conv_bn_silu_ref(ch, *layer["mid"],
                                       groups=layer["mid"][0].shape[0])
                ch = _conv_bn_silu_ref(ch, *layer["out"])
        chans.append(ch)
    out = jnp.concatenate(chans, axis=1)
    return _conv_bn_silu_ref(out, *params["out_conv"])


# ----------------------------------------------------------------------------
if __name__ == "__main__":
    key = jax.random.PRNGKey(0)

    # MSBlock(inc=16, ouc=16, kernel_sizes=[1,3,3]) with the module defaults:
    #   in_channel = int(16*3.0//2.0) = 24, mid_channel = 8, groups = 16.
    inc, ouc = 16, 16
    kernel_sizes = (1, 3, 3)
    in_expand_ratio, mid_expand_ratio = 3.0, 2.0
    layers_num, in_down_ratio = 3, 2.0
    N, H, W = 2, 16, 16                                      # H*W = 256 (lane-dense)

    params = make_params(key, inc, ouc, kernel_sizes, in_expand_ratio,
                         mid_expand_ratio, layers_num, in_down_ratio)

    x = jax.random.normal(jax.random.fold_in(key, 123), (N, inc, H, W),
                          jnp.float32)

    out = msblock_pallas(x, params, layers_num=layers_num)
    out = jax.block_until_ready(out)

    ref = msblock_ref(x, params)

    assert out.shape == (N, ouc, H, W), out.shape
    err = float(jnp.max(jnp.abs(out - ref)))
    assert jnp.allclose(out, ref, rtol=1e-3, atol=1e-3), f"max abs err = {err}"

    print("KERNEL_OK")
</pallas_src>

<mosaic_0001>
module attributes {stable_mosaic.version = 11 : i64} {
  func.func @_msblock_kernel(%arg0: i32, %arg1: memref<1x16x256xf32, #tpu.memory_space<vmem>>, %arg2: memref<9x1x256xf32, #tpu.memory_space<vmem>>, %arg3: memref<24x16xf32, #tpu.memory_space<vmem>>, %arg4: memref<24x1xf32, #tpu.memory_space<vmem>>, %arg5: memref<6x16x8xf32, #tpu.memory_space<vmem>>, %arg6: memref<6x16x1xf32, #tpu.memory_space<vmem>>, %arg7: memref<6x16x9xf32, #tpu.memory_space<vmem>>, %arg8: memref<6x16x1xf32, #tpu.memory_space<vmem>>, %arg9: memref<6x8x16xf32, #tpu.memory_space<vmem>>, %arg10: memref<6x8x1xf32, #tpu.memory_space<vmem>>, %arg11: memref<16x24xf32, #tpu.memory_space<vmem>>, %arg12: memref<16x1xf32, #tpu.memory_space<vmem>>, %arg13: memref<1x16x256xf32, #tpu.memory_space<vmem>>) attributes {dimension_semantics = [#tpu.dimension_semantics<parallel>], iteration_bounds = array<i64: 2>, scalar_prefetch = 0 : i64, scratch_operands = 0 : i64, tpu.core_type = #tpu.core_type<tc>, window_params = [{transform_indices = @transform_0, window_bounds = array<i64: 1, 16, 256>}, {pipeline_mode = #tpu.pipeline_mode<synchronous>, transform_indices = @transform_1, window_bounds = array<i64: 9, 1, 256>}, {pipeline_mode = #tpu.pipeline_mode<synchronous>, transform_indices = @transform_2, window_bounds = array<i64: 24, 16>}, {pipeline_mode = #tpu.pipeline_mode<synchronous>, transform_indices = @transform_3, window_bounds = array<i64: 24, 1>}, {pipeline_mode = #tpu.pipeline_mode<synchronous>, transform_indices = @transform_4, window_bounds = array<i64: 6, 16, 8>}, {pipeline_mode = #tpu.pipeline_mode<synchronous>, transform_indices = @transform_5, window_bounds = array<i64: 6, 16, 1>}, {pipeline_mode = #tpu.pipeline_mode<synchronous>, transform_indices = @transform_6, window_bounds = array<i64: 6, 16, 9>}, {pipeline_mode = #tpu.pipeline_mode<synchronous>, transform_indices = @transform_7, window_bounds = array<i64: 6, 16, 1>}, {pipeline_mode = #tpu.pipeline_mode<synchronous>, transform_indices = @transform_8, window_bounds = array<i64: 6, 8, 16>}, {pipeline_mode = #tpu.pipeline_mode<synchronous>, transform_indices = @transform_9, window_bounds = array<i64: 6, 8, 1>}, {pipeline_mode = #tpu.pipeline_mode<synchronous>, transform_indices = @transform_10, window_bounds = array<i64: 16, 24>}, {pipeline_mode = #tpu.pipeline_mode<synchronous>, transform_indices = @transform_11, window_bounds = array<i64: 16, 1>}, {transform_indices = @transform_12, window_bounds = array<i64: 1, 16, 256>}]} {
    %c0 = arith.constant 0 : index
    %c0_0 = arith.constant 0 : index
    %c0_1 = arith.constant 0 : index
    %0 = vector.load %arg1[%c0, %c0_0, %c0_1] : memref<1x16x256xf32, #tpu.memory_space<vmem>>, vector<1x16x256xf32>
    %1 = vector.shape_cast %0 : vector<1x16x256xf32> to vector<16x256xf32>
    %c0_2 = arith.constant 0 : index
    %c0_3 = arith.constant 0 : index
    %2 = vector.load %arg3[%c0_2, %c0_3] : memref<24x16xf32, #tpu.memory_space<vmem>>, vector<24x16xf32>
    %cst = arith.constant dense<0.000000e+00> : vector<24x256xf32>
    %3 = tpu.matmul %2, %1, %cst {dimension_numbers = #tpu.dot_dimension_numbers<[1], [0], [0], [1], [0, 0, 1, 1], [], []>} : vector<24x16xf32>, vector<16x256xf32>, vector<24x256xf32> -> vector<24x256xf32>
    %c0_4 = arith.constant 0 : index
    %c0_5 = arith.constant 0 : index
    %4 = vector.load %arg4[%c0_4, %c0_5] : memref<24x1xf32, #tpu.memory_space<vmem>>, vector<24x1xf32>
    %5 = vector.broadcast %4 : vector<24x1xf32> to vector<24x256xf32>
    %6 = arith.addf %3, %5 : vector<24x256xf32>
    %cst_6 = arith.constant 0.000000e+00 : f32
    %7 = vector.broadcast %cst_6 : f32 to vector<24x256xf32>
    %8 = arith.subf %7, %6 : vector<24x256xf32>
    %9 = math.exp %8 : vector<24x256xf32>
    %cst_7 = arith.constant 1.000000e+00 : f32
    %10 = vector.broadcast %cst_7 : f32 to vector<24x256xf32>
    %11 = arith.addf %10, %9 : vector<24x256xf32>
    %cst_8 = arith.constant 1.000000e+00 : f32
    %12 = vector.broadcast %cst_8 : f32 to vector<24x256xf32>
    %13 = arith.divf %12, %11 : vector<24x256xf32>
    %14 = arith.mulf %6, %13 : vector<24x256xf32>
    %c0_9 = arith.constant 0 : index
    %c0_10 = arith.constant 0 : index
    %c0_11 = arith.constant 0 : index
    %15 = vector.load %arg2[%c0_9, %c0_10, %c0_11] : memref<9x1x256xf32, #tpu.memory_space<vmem>>, vector<1x1x256xf32>
    %16 = vector.shape_cast %15 : vector<1x1x256xf32> to vector<1x256xf32>
    %c1 = arith.constant 1 : index
    %c0_12 = arith.constant 0 : index
    %c0_13 = arith.constant 0 : index
    %17 = vector.load %arg2[%c1, %c0_12, %c0_13] : memref<9x1x256xf32, #tpu.memory_space<vmem>>, vector<1x1x256xf32>
    %18 = vector.shape_cast %17 : vector<1x1x256xf32> to vector<1x256xf32>
    %c2 = arith.constant 2 : index
    %c0_14 = arith.constant 0 : index
    %c0_15 = arith.constant 0 : index
    %19 = vector.load %arg2[%c2, %c0_14, %c0_15] : memref<9x1x256xf32, #tpu.memory_space<vmem>>, vector<1x1x256xf32>
    %20 = vector.shape_cast %19 : vector<1x1x256xf32> to vector<1x256xf32>
    %c3 = arith.constant 3 : index
    %c0_16 = arith.constant 0 : index
    %c0_17 = arith.constant 0 : index
    %21 = vector.load %arg2[%c3, %c0_16, %c0_17] : memref<9x1x256xf32, #tpu.memory_space<vmem>>, vector<1x1x256xf32>
    %22 = vector.shape_cast %21 : vector<1x1x256xf32> to vector<1x256xf32>
    %c5 = arith.constant 5 : index
    %c0_18 = arith.constant 0 : index
    %c0_19 = arith.constant 0 : index
    %23 = vector.load %arg2[%c5, %c0_18, %c0_19] : memref<9x1x256xf32, #tpu.memory_space<vmem>>, vector<1x1x256xf32>
    %24 = vector.shape_cast %23 : vector<1x1x256xf32> to vector<1x256xf32>
    %c6 = arith.constant 6 : index
    %c0_20 = arith.constant 0 : index
    %c0_21 = arith.constant 0 : index
    %25 = vector.load %arg2[%c6, %c0_20, %c0_21] : memref<9x1x256xf32, #tpu.memory_space<vmem>>, vector<1x1x256xf32>
    %26 = vector.shape_cast %25 : vector<1x1x256xf32> to vector<1x256xf32>
    %c7 = arith.constant 7 : index
    %c0_22 = arith.constant 0 : index
    %c0_23 = arith.constant 0 : index
    %27 = vector.load %arg2[%c7, %c0_22, %c0_23] : memref<9x1x256xf32, #tpu.memory_space<vmem>>, vector<1x1x256xf32>
    %28 = vector.shape_cast %27 : vector<1x1x256xf32> to vector<1x256xf32>
    %c8 = arith.constant 8 : index
    %c0_24 = arith.constant 0 : index
    %c0_25 = arith.constant 0 : index
    %29 = vector.load %arg2[%c8, %c0_24, %c0_25] : memref<9x1x256xf32, #tpu.memory_space<vmem>>, vector<1x1x256xf32>
    %30 = vector.shape_cast %29 : vector<1x1x256xf32> to vector<1x256xf32>
    %31 = vector.extract_strided_slice %14 {offsets = [0, 0], sizes = [8, 256], strides = [1, 1]} : vector<24x256xf32> to vector<8x256xf32>
    %32 = vector.extract_strided_slice %14 {offsets = [8, 0], sizes = [8, 256], strides = [1, 1]} : vector<24x256xf32> to vector<8x256xf32>
    %33 = arith.addf %32, %31 : vector<8x256xf32>
    %c0_26 = arith.constant 0 : index
    %c0_27 = arith.constant 0 : index
    %c0_28 = arith.constant 0 : index
    %34 = vector.load %arg5[%c0_26, %c0_27, %c0_28] : memref<6x16x8xf32, #tpu.memory_space<vmem>>, vector<1x16x8xf32>
    %35 = vector.shape_cast %34 : vector<1x16x8xf32> to vector<16x8xf32>
    %cst_29 = arith.constant dense<0.000000e+00> : vector<16x256xf32>
    %36 = tpu.matmul %35, %33, %cst_29 {dimension_numbers = #tpu.dot_dimension_numbers<[1], [0], [0], [1], [0, 0, 1, 1], [], []>} : vector<16x8xf32>, vector<8x256xf32>, vector<16x256xf32> -> vector<16x256xf32>
    %c0_30 = arith.constant 0 : index
    %c0_31 = arith.constant 0 : index
    %c0_32 = arith.constant 0 : index
    %37 = vector.load %arg6[%c0_30, %c0_31, %c0_32] : memref<6x16x1xf32, #tpu.memory_space<vmem>>, vector<1x16x1xf32>
    %38 = vector.shape_cast %37 : vector<1x16x1xf32> to vector<16x1xf32>
    %39 = vector.broadcast %38 : vector<16x1xf32> to vector<16x256xf32>
    %40 = arith.addf %36, %39 : vector<16x256xf32>
    %cst_33 = arith.constant 0.000000e+00 : f32
    %41 = vector.broadcast %cst_33 : f32 to vector<16x256xf32>
    %42 = arith.subf %41, %40 : vector<16x256xf32>
    %43 = math.exp %42 : vector<16x256xf32>
    %cst_34 = arith.constant 1.000000e+00 : f32
    %44 = vector.broadcast %cst_34 : f32 to vector<16x256xf32>
    %45 = arith.addf %44, %43 : vector<16x256xf32>
    %cst_35 = arith.constant 1.000000e+00 : f32
    %46 = vector.broadcast %cst_35 : f32 to vector<16x256xf32>
    %47 = arith.divf %46, %45 : vector<16x256xf32>
    %48 = arith.mulf %40, %47 : vector<16x256xf32>
    %c0_36 = arith.constant 0 : index
    %c0_37 = arith.constant 0 : index
    %c0_38 = arith.constant 0 : index
    %49 = vector.load %arg7[%c0_36, %c0_37, %c0_38] : memref<6x16x9xf32, #tpu.memory_space<vmem>>, vector<1x16x9xf32>
    %50 = vector.shape_cast %49 : vector<1x16x9xf32> to vector<16x9xf32>
    %51 = vector.extract_strided_slice %50 {offsets = [0, 0], sizes = [16, 1], strides = [1, 1]} : vector<16x9xf32> to vector<16x1xf32>
    %c17_i32 = arith.constant 17 : i32
    %52 = tpu.dynamic_rotate %48 by %c17_i32 dim 1 : vector<16x256xf32>, i32 -> vector<16x256xf32>
    %53 = vector.broadcast %51 : vector<16x1xf32> to vector<16x256xf32>
    %54 = arith.mulf %52, %53 : vector<16x256xf32>
    %55 = vector.broadcast %16 : vector<1x256xf32> to vector<16x256xf32>
    %56 = arith.mulf %54, %55 : vector<16x256xf32>
    %57 = vector.extract_strided_slice %50 {offsets = [0, 1], sizes = [16, 1], strides = [1, 1]} : vector<16x9xf32> to vector<16x1xf32>
    %c16_i32 = arith.constant 16 : i32
    %58 = tpu.dynamic_rotate %48 by %c16_i32 dim 1 : vector<16x256xf32>, i32 -> vector<16x256xf32>
    %59 = vector.broadcast %57 : vector<16x1xf32> to vector<16x256xf32>
    %60 = arith.mulf %58, %59 : vector<16x256xf32>
    %61 = vector.broadcast %18 : vector<1x256xf32> to vector<16x256xf32>
    %62 = arith.mulf %60, %61 : vector<16x256xf32>
    %63 = arith.addf %56, %62 : vector<16x256xf32>
    %64 = vector.extract_strided_slice %50 {offsets = [0, 2], sizes = [16, 1], strides = [1, 1]} : vector<16x9xf32> to vector<16x1xf32>
    %c15_i32 = arith.constant 15 : i32
    %65 = tpu.dynamic_rotate %48 by %c15_i32 dim 1 : vector<16x256xf32>, i32 -> vector<16x256xf32>
    %66 = vector.broadcast %64 : vector<16x1xf32> to vector<16x256xf32>
    %67 = arith.mulf %65, %66 : vector<16x256xf32>
    %68 = vector.broadcast %20 : vector<1x256xf32> to vector<16x256xf32>
    %69 = arith.mulf %67, %68 : vector<16x256xf32>
    %70 = arith.addf %63, %69 : vector<16x256xf32>
    %71 = vector.extract_strided_slice %50 {offsets = [0, 3], sizes = [16, 1], strides = [1, 1]} : vector<16x9xf32> to vector<16x1xf32>
    %c1_i32 = arith.constant 1 : i32
    %72 = tpu.dynamic_rotate %48 by %c1_i32 dim 1 : vector<16x256xf32>, i32 -> vector<16x256xf32>
    %73 = vector.broadcast %71 : vector<16x1xf32> to vector<16x256xf32>
    %74 = arith.mulf %72, %73 : vector<16x256xf32>
    %75 = vector.broadcast %22 : vector<1x256xf32> to vector<16x256xf32>
    %76 = arith.mulf %74, %75 : vector<16x256xf32>
    %77 = arith.addf %70, %76 : vector<16x256xf32>
    %78 = vector.extract_strided_slice %50 {offsets = [0, 4], sizes = [16, 1], strides = [1, 1]} : vector<16x9xf32> to vector<16x1xf32>
    %79 = vector.broadcast %78 : vector<16x1xf32> to vector<16x256xf32>
    %80 = arith.mulf %48, %79 : vector<16x256xf32>
    %81 = arith.addf %77, %80 : vector<16x256xf32>
    %82 = vector.extract_strided_slice %50 {offsets = [0, 5], sizes = [16, 1], strides = [1, 1]} : vector<16x9xf32> to vector<16x1xf32>
    %c255_i32 = arith.constant 255 : i32
    %83 = tpu.dynamic_rotate %48 by %c255_i32 dim 1 : vector<16x256xf32>, i32 -> vector<16x256xf32>
    %84 = vector.broadcast %82 : vector<16x1xf32> to vector<16x256xf32>
    %85 = arith.mulf %83, %84 : vector<16x256xf32>
    %86 = vector.broadcast %24 : vector<1x256xf32> to vector<16x256xf32>
    %87 = arith.mulf %85, %86 : vector<16x256xf32>
    %88 = arith.addf %81, %87 : vector<16x256xf32>
    %89 = vector.extract_strided_slice %50 {offsets = [0, 6], sizes = [16, 1], strides = [1, 1]} : vector<16x9xf32> to vector<16x1xf32>
    %c241_i32 = arith.constant 241 : i32
    %90 = tpu.dynamic_rotate %48 by %c241_i32 dim 1 : vector<16x256xf32>, i32 -> vector<16x256xf32>
    %91 = vector.broadcast %89 : vector<16x1xf32> to vector<16x256xf32>
    %92 = arith.mulf %90, %91 : vector<16x256xf32>
    %93 = vector.broadcast %26 : vector<1x256xf32> to vector<16x256xf32>
    %94 = arith.mulf %92, %93 : vector<16x256xf32>
    %95 = arith.addf %88, %94 : vector<16x256xf32>
    %96 = vector.extract_strided_slice %50 {offsets = [0, 7], sizes = [16, 1], strides = [1, 1]} : vector<16x9xf32> to vector<16x1xf32>
    %c240_i32 = arith.constant 240 : i32
    %97 = tpu.dynamic_rotate %48 by %c240_i32 dim 1 : vector<16x256xf32>, i32 -> vector<16x256xf32>
    %98 = vector.broadcast %96 : vector<16x1xf32> to vector<16x256xf32>
    %99 = arith.mulf %97, %98 : vector<16x256xf32>
    %100 = vector.broadcast %28 : vector<1x256xf32> to vector<16x256xf32>
    %101 = arith.mulf %99, %100 : vector<16x256xf32>
    %102 = arith.addf %95, %101 : vector<16x256xf32>
    %103 = vector.extract_strided_slice %50 {offsets = [0, 8], sizes = [16, 1], strides = [1, 1]} : vector<16x9xf32> to vector<16x1xf32>
    %c239_i32 = arith.constant 239 : i32
    %104 = tpu.dynamic_rotate %48 by %c239_i32 dim 1 : vector<16x256xf32>, i32 -> vector<16x256xf32>
    %105 = vector.broadcast %103 : vector<16x1xf32> to vector<16x256xf32>
    %106 = arith.mulf %104, %105 : vector<16x256xf32>
    %107 = vector.broadcast %30 : vector<1x256xf32> to vector<16x256xf32>
    %108 = arith.mulf %106, %107 : vector<16x256xf32>
    %109 = arith.addf %102, %108 : vector<16x256xf32>
    %c0_39 = arith.constant 0 : index
    %c0_40 = arith.constant 0 : index
    %c0_41 = arith.constant 0 : index
    %110 = vector.load %arg8[%c0_39, %c0_40, %c0_41] : memref<6x16x1xf32, #tpu.memory_space<vmem>>, vector<1x16x1xf32>
    %111 = vector.shape_cast %110 : vector<1x16x1xf32> to vector<16x1xf32>
    %112 = vector.broadcast %111 : vector<16x1xf32> to vector<16x256xf32>
    %113 = arith.addf %109, %112 : vector<16x256xf32>
    %cst_42 = arith.constant 0.000000e+00 : f32
    %114 = vector.broadcast %cst_42 : f32 to vector<16x256xf32>
    %115 = arith.subf %114, %113 : vector<16x256xf32>
    %116 = math.exp %115 : vector<16x256xf32>
    %cst_43 = arith.constant 1.000000e+00 : f32
    %117 = vector.broadcast %cst_43 : f32 to vector<16x256xf32>
    %118 = arith.addf %117, %116 : vector<16x256xf32>
    %cst_44 = arith.constant 1.000000e+00 : f32
    %119 = vector.broadcast %cst_44 : f32 to vector<16x256xf32>
    %120 = arith.divf %119, %118 : vector<16x256xf32>
    %121 = arith.mulf %113, %120 : vector<16x256xf32>
    %c0_45 = arith.constant 0 : index
    %c0_46 = arith.constant 0 : index
    %c0_47 = arith.constant 0 : index
    %122 = vector.load %arg9[%c0_45, %c0_46, %c0_47] : memref<6x8x16xf32, #tpu.memory_space<vmem>>, vector<1x8x16xf32>
    %123 = vector.shape_cast %122 : vector<1x8x16xf32> to vector<8x16xf32>
    %cst_48 = arith.constant dense<0.000000e+00> : vector<8x256xf32>
    %124 = tpu.matmul %123, %121, %cst_48 {dimension_numbers = #tpu.dot_dimension_numbers<[1], [0], [0], [1], [0, 0, 1, 1], [], []>} : vector<8x16xf32>, vector<16x256xf32>, vector<8x256xf32> -> vector<8x256xf32>
    %c0_49 = arith.constant 0 : index
    %c0_50 = arith.constant 0 : index
    %c0_51 = arith.constant 0 : index
    %125 = vector.load %arg10[%c0_49, %c0_50, %c0_51] : memref<6x8x1xf32, #tpu.memory_space<vmem>>, vector<1x8x1xf32>
    %126 = vector.shape_cast %125 : vector<1x8x1xf32> to vector<8x1xf32>
    %127 = vector.broadcast %126 : vector<8x1xf32> to vector<8x256xf32>
    %128 = arith.addf %124, %127 : vector<8x256xf32>
    %cst_52 = arith.constant 0.000000e+00 : f32
    %129 = vector.broadcast %cst_52 : f32 to vector<8x256xf32>
    %130 = arith.subf %129, %128 : vector<8x256xf32>
    %131 = math.exp %130 : vector<8x256xf32>
    %cst_53 = arith.constant 1.000000e+00 : f32
    %132 = vector.broadcast %cst_53 : f32 to vector<8x256xf32>
    %133 = arith.addf %132, %131 : vector<8x256xf32>
    %cst_54 = arith.constant 1.000000e+00 : f32
    %134 = vector.broadcast %cst_54 : f32 to vector<8x256xf32>
    %135 = arith.divf %134, %133 : vector<8x256xf32>
    %136 = arith.mulf %128, %135 : vector<8x256xf32>
    %c1_55 = arith.constant 1 : index
    %c0_56 = arith.constant 0 : index
    %c0_57 = arith.constant 0 : index
    %137 = vector.load %arg5[%c1_55, %c0_56, %c0_57] : memref<6x16x8xf32, #tpu.memory_space<vmem>>, vector<1x16x8xf32>
    %138 = vector.shape_cast %137 : vector<1x16x8xf32> to vector<16x8xf32>
    %cst_58 = arith.constant dense<0.000000e+00> : vector<16x256xf32>
    %139 = tpu.matmul %138, %136, %cst_58 {dimension_numbers = #tpu.dot_dimension_numbers<[1], [0], [0], [1], [0, 0, 1, 1], [], []>} : vector<16x8xf32>, vector<8x256xf32>, vector<16x256xf32> -> vector<16x256xf32>
    %c1_59 = arith.constant 1 : index
    %c0_60 = arith.constant 0 : index
    %c0_61 = arith.constant 0 : index
    %140 = vector.load %arg6[%c1_59, %c0_60, %c0_61] : memref<6x16x1xf32, #tpu.memory_space<vmem>>, vector<1x16x1xf32>
    %141 = vector.shape_cast %140 : vector<1x16x1xf32> to vector<16x1xf32>
    %142 = vector.broadcast %141 : vector<16x1xf32> to vector<16x256xf32>
    %143 = arith.addf %139, %142 : vector<16x256xf32>
    %cst_62 = arith.constant 0.000000e+00 : f32
    %144 = vector.broadcast %cst_62 : f32 to vector<16x256xf32>
    %145 = arith.subf %144, %143 : vector<16x256xf32>
    %146 = math.exp %145 : vector<16x256xf32>
    %cst_63 = arith.constant 1.000000e+00 : f32
    %147 = vector.broadcast %cst_63 : f32 to vector<16x256xf32>
    %148 = arith.addf %147, %146 : vector<16x256xf32>
    %cst_64 = arith.constant 1.000000e+00 : f32
    %149 = vector.broadcast %cst_64 : f32 to vector<16x256xf32>
    %150 = arith.divf %149, %148 : vector<16x256xf32>
    %151 = arith.mulf %143, %150 : vector<16x256xf32>
    %c1_65 = arith.constant 1 : index
    %c0_66 = arith.constant 0 : index
    %c0_67 = arith.constant 0 : index
    %152 = vector.load %arg7[%c1_65, %c0_66, %c0_67] : memref<6x16x9xf32, #tpu.memory_space<vmem>>, vector<1x16x9xf32>
    %153 = vector.shape_cast %152 : vector<1x16x9xf32> to vector<16x9xf32>
    %154 = vector.extract_strided_slice %153 {offsets = [0, 0], sizes = [16, 1], strides = [1, 1]} : vector<16x9xf32> to vector<16x1xf32>
    %c17_i32_68 = arith.constant 17 : i32
    %155 = tpu.dynamic_rotate %151 by %c17_i32_68 dim 1 : vector<16x256xf32>, i32 -> vector<16x256xf32>
    %156 = vector.broadcast %154 : vector<16x1xf32> to vector<16x256xf32>
    %157 = arith.mulf %155, %156 : vector<16x256xf32>
    %158 = vector.broadcast %16 : vector<1x256xf32> to vector<16x256xf32>
    %159 = arith.mulf %157, %158 : vector<16x256xf32>
    %160 = vector.extract_strided_slice %153 {offsets = [0, 1], sizes = [16, 1], strides = [1, 1]} : vector<16x9xf32> to vector<16x1xf32>
    %c16_i32_69 = arith.constant 16 : i32
    %161 = tpu.dynamic_rotate %151 by %c16_i32_69 dim 1 : vector<16x256xf32>, i32 -> vector<16x256xf32>
    %162 = vector.broadcast %160 : vector<16x1xf32> to vector<16x256xf32>
    %163 = arith.mulf %161, %162 : vector<16x256xf32>
    %164 = vector.broadcast %18 : vector<1x256xf32> to vector<16x256xf32>
    %165 = arith.mulf %163, %164 : vector<16x256xf32>
    %166 = arith.addf %159, %165 : vector<16x256xf32>
    %167 = vector.extract_strided_slice %153 {offsets = [0, 2], sizes = [16, 1], strides = [1, 1]} : vector<16x9xf32> to vector<16x1xf32>
    %c15_i32_70 = arith.constant 15 : i32
    %168 = tpu.dynamic_rotate %151 by %c15_i32_70 dim 1 : vector<16x256xf32>, i32 -> vector<16x256xf32>
    %169 = vector.broadcast %167 : vector<16x1xf32> to vector<16x256xf32>
    %170 = arith.mulf %168, %169 : vector<16x256xf32>
    %171 = vector.broadcast %20 : vector<1x256xf32> to vector<16x256xf32>
    %172 = arith.mulf %170, %171 : vector<16x256xf32>
    %173 = arith.addf %166, %172 : vector<16x256xf32>
    %174 = vector.extract_strided_slice %153 {offsets = [0, 3], sizes = [16, 1], strides = [1, 1]} : vector<16x9xf32> to vector<16x1xf32>
    %c1_i32_71 = arith.constant 1 : i32
    %175 = tpu.dynamic_rotate %151 by %c1_i32_71 dim 1 : vector<16x256xf32>, i32 -> vector<16x256xf32>
    %176 = vector.broadcast %174 : vector<16x1xf32> to vector<16x256xf32>
    %177 = arith.mulf %175, %176 : vector<16x256xf32>
    %178 = vector.broadcast %22 : vector<1x256xf32> to vector<16x256xf32>
    %179 = arith.mulf %177, %178 : vector<16x256xf32>
    %180 = arith.addf %173, %179 : vector<16x256xf32>
    %181 = vector.extract_strided_slice %153 {offsets = [0, 4], sizes = [16, 1], strides = [1, 1]} : vector<16x9xf32> to vector<16x1xf32>
    %182 = vector.broadcast %181 : vector<16x1xf32> to vector<16x256xf32>
    %183 = arith.mulf %151, %182 : vector<16x256xf32>
    %184 = arith.addf %180, %183 : vector<16x256xf32>
    %185 = vector.extract_strided_slice %153 {offsets = [0, 5], sizes = [16, 1], strides = [1, 1]} : vector<16x9xf32> to vector<16x1xf32>
    %c255_i32_72 = arith.constant 255 : i32
    %186 = tpu.dynamic_rotate %151 by %c255_i32_72 dim 1 : vector<16x256xf32>, i32 -> vector<16x256xf32>
    %187 = vector.broadcast %185 : vector<16x1xf32> to vector<16x256xf32>
    %188 = arith.mulf %186, %187 : vector<16x256xf32>
    %189 = vector.broadcast %24 : vector<1x256xf32> to vector<16x256xf32>
    %190 = arith.mulf %188, %189 : vector<16x256xf32>
    %191 = arith.addf %184, %190 : vector<16x256xf32>
    %192 = vector.extract_strided_slice %153 {offsets = [0, 6], sizes = [16, 1], strides = [1, 1]} : vector<16x9xf32> to vector<16x1xf32>
    %c241_i32_73 = arith.constant 241 : i32
    %193 = tpu.dynamic_rotate %151 by %c241_i32_73 dim 1 : vector<16x256xf32>, i32 -> vector<16x256xf32>
    %194 = vector.broadcast %192 : vector<16x1xf32> to vector<16x256xf32>
    %195 = arith.mulf %193, %194 : vector<16x256xf32>
    %196 = vector.broadcast %26 : vector<1x256xf32> to vector<16x256xf32>
    %197 = arith.mulf %195, %196 : vector<16x256xf32>
    %198 = arith.addf %191, %197 : vector<16x256xf32>
    %199 = vector.extract_strided_slice %153 {offsets = [0, 7], sizes = [16, 1], strides = [1, 1]} : vector<16x9xf32> to vector<16x1xf32>
    %c240_i32_74 = arith.constant 240 : i32
    %200 = tpu.dynamic_rotate %151 by %c240_i32_74 dim 1 : vector<16x256xf32>, i32 -> vector<16x256xf32>
    %201 = vector.broadcast %199 : vector<16x1xf32> to vector<16x256xf32>
    %202 = arith.mulf %200, %201 : vector<16x256xf32>
    %203 = vector.broadcast %28 : vector<1x256xf32> to vector<16x256xf32>
    %204 = arith.mulf %202, %203 : vector<16x256xf32>
    %205 = arith.addf %198, %204 : vector<16x256xf32>
    %206 = vector.extract_strided_slice %153 {offsets = [0, 8], sizes = [16, 1], strides = [1, 1]} : vector<16x9xf32> to vector<16x1xf32>
    %c239_i32_75 = arith.constant 239 : i32
    %207 = tpu.dynamic_rotate %151 by %c239_i32_75 dim 1 : vector<16x256xf32>, i32 -> vector<16x256xf32>
    %208 = vector.broadcast %206 : vector<16x1xf32> to vector<16x256xf32>
    %209 = arith.mulf %207, %208 : vector<16x256xf32>
    %210 = vector.broadcast %30 : vector<1x256xf32> to vector<16x256xf32>
    %211 = arith.mulf %209, %210 : vector<16x256xf32>
    %212 = arith.addf %205, %211 : vector<16x256xf32>
    %c1_76 = arith.constant 1 : index
    %c0_77 = arith.constant 0 : index
    %c0_78 = arith.constant 0 : index
    %213 = vector.load %arg8[%c1_76, %c0_77, %c0_78] : memref<6x16x1xf32, #tpu.memory_space<vmem>>, vector<1x16x1xf32>
    %214 = vector.shape_cast %213 : vector<1x16x1xf32> to vector<16x1xf32>
    %215 = vector.broadcast %214 : vector<16x1xf32> to vector<16x256xf32>
    %216 = arith.addf %212, %215 : vector<16x256xf32>
    %cst_79 = arith.constant 0.000000e+00 : f32
    %217 = vector.broadcast %cst_79 : f32 to vector<16x256xf32>
    %218 = arith.subf %217, %216 : vector<16x256xf32>
    %219 = math.exp %218 : vector<16x256xf32>
    %cst_80 = arith.constant 1.000000e+00 : f32
    %220 = vector.broadcast %cst_80 : f32 to vector<16x256xf32>
    %221 = arith.addf %220, %219 : vector<16x256xf32>
    %cst_81 = arith.constant 1.000000e+00 : f32
    %222 = vector.broadcast %cst_81 : f32 to vector<16x256xf32>
    %223 = arith.divf %222, %221 : vector<16x256xf32>
    %224 = arith.mulf %216, %223 : vector<16x256xf32>
    %c1_82 = arith.constant 1 : index
    %c0_83 = arith.constant 0 : index
    %c0_84 = arith.constant 0 : index
    %225 = vector.load %arg9[%c1_82, %c0_83, %c0_84] : memref<6x8x16xf32, #tpu.memory_space<vmem>>, vector<1x8x16xf32>
    %226 = vector.shape_cast %225 : vector<1x8x16xf32> to vector<8x16xf32>
    %cst_85 = arith.constant dense<0.000000e+00> : vector<8x256xf32>
    %227 = tpu.matmul %226, %224, %cst_85 {dimension_numbers = #tpu.dot_dimension_numbers<[1], [0], [0], [1], [0, 0, 1, 1], [], []>} : vector<8x16xf32>, vector<16x256xf32>, vector<8x256xf32> -> vector<8x256xf32>
    %c1_86 = arith.constant 1 : index
    %c0_87 = arith.constant 0 : index
    %c0_88 = arith.constant 0 : index
    %228 = vector.load %arg10[%c1_86, %c0_87, %c0_88] : memref<6x8x1xf32, #tpu.memory_space<vmem>>, vector<1x8x1xf32>
    %229 = vector.shape_cast %228 : vector<1x8x1xf32> to vector<8x1xf32>
    %230 = vector.broadcast %229 : vector<8x1xf32> to vector<8x256xf32>
    %231 = arith.addf %227, %230 : vector<8x256xf32>
    %cst_89 = arith.constant 0.000000e+00 : f32
    %232 = vector.broadcast %cst_89 : f32 to vector<8x256xf32>
    %233 = arith.subf %232, %231 : vector<8x256xf32>
    %234 = math.exp %233 : vector<8x256xf32>
    %cst_90 = arith.constant 1.000000e+00 : f32
    %235 = vector.broadcast %cst_90 : f32 to vector<8x256xf32>
    %236 = arith.addf %235, %234 : vector<8x256xf32>
    %cst_91 = arith.constant 1.000000e+00 : f32
    %237 = vector.broadcast %cst_91 : f32 to vector<8x256xf32>
    %238 = arith.divf %237, %236 : vector<8x256xf32>
    %239 = arith.mulf %231, %238 : vector<8x256xf32>
    %c2_92 = arith.constant 2 : index
    %c0_93 = arith.constant 0 : index
    %c0_94 = arith.constant 0 : index
    %240 = vector.load %arg5[%c2_92, %c0_93, %c0_94] : memref<6x16x8xf32, #tpu.memory_space<vmem>>, vector<1x16x8xf32>
    %241 = vector.shape_cast %240 : vector<1x16x8xf32> to vector<16x8xf32>
    %cst_95 = arith.constant dense<0.000000e+00> : vector<16x256xf32>
    %242 = tpu.matmul %241, %239, %cst_95 {dimension_numbers = #tpu.dot_dimension_numbers<[1], [0], [0], [1], [0, 0, 1, 1], [], []>} : vector<16x8xf32>, vector<8x256xf32>, vector<16x256xf32> -> vector<16x256xf32>
    %c2_96 = arith.constant 2 : index
    %c0_97 = arith.constant 0 : index
    %c0_98 = arith.constant 0 : index
    %243 = vector.load %arg6[%c2_96, %c0_97, %c0_98] : memref<6x16x1xf32, #tpu.memory_space<vmem>>, vector<1x16x1xf32>
    %244 = vector.shape_cast %243 : vector<1x16x1xf32> to vector<16x1xf32>
    %245 = vector.broadcast %244 : vector<16x1xf32> to vector<16x256xf32>
    %246 = arith.addf %242, %245 : vector<16x256xf32>
    %cst_99 = arith.constant 0.000000e+00 : f32
    %247 = vector.broadcast %cst_99 : f32 to vector<16x256xf32>
    %248 = arith.subf %247, %246 : vector<16x256xf32>
    %249 = math.exp %248 : vector<16x256xf32>
    %cst_100 = arith.constant 1.000000e+00 : f32
    %250 = vector.broadcast %cst_100 : f32 to vector<16x256xf32>
    %251 = arith.addf %250, %249 : vector<16x256xf32>
    %cst_101 = arith.constant 1.000000e+00 : f32
    %252 = vector.broadcast %cst_101 : f32 to vector<16x256xf32>
    %253 = arith.divf %252, %251 : vector<16x256xf32>
    %254 = arith.mulf %246, %253 : vector<16x256xf32>
    %c2_102 = arith.constant 2 : index
    %c0_103 = arith.constant 0 : index
    %c0_104 = arith.constant 0 : index
    %255 = vector.load %arg7[%c2_102, %c0_103, %c0_104] : memref<6x16x9xf32, #tpu.memory_space<vmem>>, vector<1x16x9xf32>
    %256 = vector.shape_cast %255 : vector<1x16x9xf32> to vector<16x9xf32>
    %257 = vector.extract_strided_slice %256 {offsets = [0, 0], sizes = [16, 1], strides = [1, 1]} : vector<16x9xf32> to vector<16x1xf32>
    %c17_i32_105 = arith.constant 17 : i32
    %258 = tpu.dynamic_rotate %254 by %c17_i32_105 dim 1 : vector<16x256xf32>, i32 -> vector<16x256xf32>
    %259 = vector.broadcast %257 : vector<16x1xf32> to vector<16x256xf32>
    %260 = arith.mulf %258, %259 : vector<16x256xf32>
    %261 = vector.broadcast %16 : vector<1x256xf32> to vector<16x256xf32>
    %262 = arith.mulf %260, %261 : vector<16x256xf32>
    %263 = vector.extract_strided_slice %256 {offsets = [0, 1], sizes = [16, 1], strides = [1, 1]} : vector<16x9xf32> to vector<16x1xf32>
    %c16_i32_106 = arith.constant 16 : i32
    %264 = tpu.dynamic_rotate %254 by %c16_i32_106 dim 1 : vector<16x256xf32>, i32 -> vector<16x256xf32>
    %265 = vector.broadcast %263 : vector<16x1xf32> to vector<16x256xf32>
    %266 = arith.mulf %264, %265 : vector<16x256xf32>
    %267 = vector.broadcast %18 : vector<1x256xf32> to vector<16x256xf32>
    %268 = arith.mulf %266, %267 : vector<16x256xf32>
    %269 = arith.addf %262, %268 : vector<16x256xf32>
    %270 = vector.extract_strided_slice %256 {offsets = [0, 2], sizes = [16, 1], strides = [1, 1]} : vector<16x9xf32> to vector<16x1xf32>
    %c15_i32_107 = arith.constant 15 : i32
    %271 = tpu.dynamic_rotate %254 by %c15_i32_107 dim 1 : vector<16x256xf32>, i32 -> vector<16x256xf32>
    %272 = vector.broadcast %270 : vector<16x1xf32> to vector<16x256xf32>
    %273 = arith.mulf %271, %272 : vector<16x256xf32>
    %274 = vector.broadcast %20 : vector<1x256xf32> to vector<16x256xf32>
    %275 = arith.mulf %273, %274 : vector<16x256xf32>
    %276 = arith.addf %269, %275 : vector<16x256xf32>
    %277 = vector.extract_strided_slice %256 {offsets = [0, 3], sizes = [16, 1], strides = [1, 1]} : vector<16x9xf32> to vector<16x1xf32>
    %c1_i32_108 = arith.constant 1 : i32
    %278 = tpu.dynamic_rotate %254 by %c1_i32_108 dim 1 : vector<16x256xf32>, i32 -> vector<16x256xf32>
    %279 = vector.broadcast %277 : vector<16x1xf32> to vector<16x256xf32>
    %280 = arith.mulf %278, %279 : vector<16x256xf32>
    %281 = vector.broadcast %22 : vector<1x256xf32> to vector<16x256xf32>
    %282 = arith.mulf %280, %281 : vector<16x256xf32>
    %283 = arith.addf %276, %282 : vector<16x256xf32>
    %284 = vector.extract_strided_slice %256 {offsets = [0, 4], sizes = [16, 1], strides = [1, 1]} : vector<16x9xf32> to vector<16x1xf32>
    %285 = vector.broadcast %284 : vector<16x1xf32> to vector<16x256xf32>
    %286 = arith.mulf %254, %285 : vector<16x256xf32>
    %287 = arith.addf %283, %286 : vector<16x256xf32>
    %288 = vector.extract_strided_slice %256 {offsets = [0, 5], sizes = [16, 1], strides = [1, 1]} : vector<16x9xf32> to vector<16x1xf32>
    %c255_i32_109 = arith.constant 255 : i32
    %289 = tpu.dynamic_rotate %254 by %c255_i32_109 dim 1 : vector<16x256xf32>, i32 -> vector<16x256xf32>
    %290 = vector.broadcast %288 : vector<16x1xf32> to vector<16x256xf32>
    %291 = arith.mulf %289, %290 : vector<16x256xf32>
    %292 = vector.broadcast %24 : vector<1x256xf32> to vector<16x256xf32>
    %293 = arith.mulf %291, %292 : vector<16x256xf32>
    %294 = arith.addf %287, %293 : vector<16x256xf32>
    %295 = vector.extract_strided_slice %256 {offsets = [0, 6], sizes = [16, 1], strides = [1, 1]} : vector<16x9xf32> to vector<16x1xf32>
    %c241_i32_110 = arith.constant 241 : i32
    %296 = tpu.dynamic_rotate %254 by %c241_i32_110 dim 1 : vector<16x256xf32>, i32 -> vector<16x256xf32>
    %297 = vector.broadcast %295 : vector<16x1xf32> to vector<16x256xf32>
    %298 = arith.mulf %296, %297 : vector<16x256xf32>
    %299 = vector.broadcast %26 : vector<1x256xf32> to vector<16x256xf32>
    %300 = arith.mulf %298, %299 : vector<16x256xf32>
    %301 = arith.addf %294, %300 : vector<16x256xf32>
    %302 = vector.extract_strided_slice %256 {offsets = [0, 7], sizes = [16, 1], strides = [1, 1]} : vector<16x9xf32> to vector<16x1xf32>
    %c240_i32_111 = arith.constant 240 : i32
    %303 = tpu.dynamic_rotate %254 by %c240_i32_111 dim 1 : vector<16x256xf32>, i32 -> vector<16x256xf32>
    %304 = vector.broadcast %302 : vector<16x1xf32> to vector<16x256xf32>
    %305 = arith.mulf %303, %304 : vector<16x256xf32>
    %306 = vector.broadcast %28 : vector<1x256xf32> to vector<16x256xf32>
    %307 = arith.mulf %305, %306 : vector<16x256xf32>
    %308 = arith.addf %301, %307 : vector<16x256xf32>
    %309 = vector.extract_strided_slice %256 {offsets = [0, 8], sizes = [16, 1], strides = [1, 1]} : vector<16x9xf32> to vector<16x1xf32>
    %c239_i32_112 = arith.constant 239 : i32
    %310 = tpu.dynamic_rotate %254 by %c239_i32_112 dim 1 : vector<16x256xf32>, i32 -> vector<16x256xf32>
    %311 = vector.broadcast %309 : vector<16x1xf32> to vector<16x256xf32>
    %312 = arith.mulf %310, %311 : vector<16x256xf32>
    %313 = vector.broadcast %30 : vector<1x256xf32> to vector<16x256xf32>
    %314 = arith.mulf %312, %313 : vector<16x256xf32>
    %315 = arith.addf %308, %314 : vector<16x256xf32>
    %c2_113 = arith.constant 2 : index
    %c0_114 = arith.constant 0 : index
    %c0_115 = arith.constant 0 : index
    %316 = vector.load %arg8[%c2_113, %c0_114, %c0_115] : memref<6x16x1xf32, #tpu.memory_space<vmem>>, vector<1x16x1xf32>
    %317 = vector.shape_cast %316 : vector<1x16x1xf32> to vector<16x1xf32>
    %318 = vector.broadcast %317 : vector<16x1xf32> to vector<16x256xf32>
    %319 = arith.addf %315, %318 : vector<16x256xf32>
    %cst_116 = arith.constant 0.000000e+00 : f32
    %320 = vector.broadcast %cst_116 : f32 to vector<16x256xf32>
    %321 = arith.subf %320, %319 : vector<16x256xf32>
    %322 = math.exp %321 : vector<16x256xf32>
    %cst_117 = arith.constant 1.000000e+00 : f32
    %323 = vector.broadcast %cst_117 : f32 to vector<16x256xf32>
    %324 = arith.addf %323, %322 : vector<16x256xf32>
    %cst_118 = arith.constant 1.000000e+00 : f32
    %325 = vector.broadcast %cst_118 : f32 to vector<16x256xf32>
    %326 = arith.divf %325, %324 : vector<16x256xf32>
    %327 = arith.mulf %319, %326 : vector<16x256xf32>
    %c2_119 = arith.constant 2 : index
    %c0_120 = arith.constant 0 : index
    %c0_121 = arith.constant 0 : index
    %328 = vector.load %arg9[%c2_119, %c0_120, %c0_121] : memref<6x8x16xf32, #tpu.memory_space<vmem>>, vector<1x8x16xf32>
    %329 = vector.shape_cast %328 : vector<1x8x16xf32> to vector<8x16xf32>
    %cst_122 = arith.constant dense<0.000000e+00> : vector<8x256xf32>
    %330 = tpu.matmul %329, %327, %cst_122 {dimension_numbers = #tpu.dot_dimension_numbers<[1], [0], [0], [1], [0, 0, 1, 1], [], []>} : vector<8x16xf32>, vector<16x256xf32>, vector<8x256xf32> -> vector<8x256xf32>
    %c2_123 = arith.constant 2 : index
    %c0_124 = arith.constant 0 : index
    %c0_125 = arith.constant 0 : index
    %331 = vector.load %arg10[%c2_123, %c0_124, %c0_125] : memref<6x8x1xf32, #tpu.memory_space<vmem>>, vector<1x8x1xf32>
    %332 = vector.shape_cast %331 : vector<1x8x1xf32> to vector<8x1xf32>
    %333 = vector.broadcast %332 : vector<8x1xf32> to vector<8x256xf32>
    %334 = arith.addf %330, %333 : vector<8x256xf32>
    %cst_126 = arith.constant 0.000000e+00 : f32
    %335 = vector.broadcast %cst_126 : f32 to vector<8x256xf32>
    %336 = arith.subf %335, %334 : vector<8x256xf32>
    %337 = math.exp %336 : vector<8x256xf32>
    %cst_127 = arith.constant 1.000000e+00 : f32
    %338 = vector.broadcast %cst_127 : f32 to vector<8x256xf32>
    %339 = arith.addf %338, %337 : vector<8x256xf32>
    %cst_128 = arith.constant 1.000000e+00 : f32
    %340 = vector.broadcast %cst_128 : f32 to vector<8x256xf32>
    %341 = arith.divf %340, %339 : vector<8x256xf32>
    %342 = arith.mulf %334, %341 : vector<8x256xf32>
    %343 = vector.extract_strided_slice %14 {offsets = [16, 0], sizes = [8, 256], strides = [1, 1]} : vector<24x256xf32> to vector<8x256xf32>
    %344 = arith.addf %343, %342 : vector<8x256xf32>
    %c3_129 = arith.constant 3 : index
    %c0_130 = arith.constant 0 : index
    %c0_131 = arith.constant 0 : index
    %345 = vector.load %arg5[%c3_129, %c0_130, %c0_131] : memref<6x16x8xf32, #tpu.memory_space<vmem>>, vector<1x16x8xf32>
    %346 = vector.shape_cast %345 : vector<1x16x8xf32> to vector<16x8xf32>
    %cst_132 = arith.constant dense<0.000000e+00> : vector<16x256xf32>
    %347 = tpu.matmul %346, %344, %cst_132 {dimension_numbers = #tpu.dot_dimension_numbers<[1], [0], [0], [1], [0, 0, 1, 1], [], []>} : vector<16x8xf32>, vector<8x256xf32>, vector<16x256xf32> -> vector<16x256xf32>
    %c3_133 = arith.constant 3 : index
    %c0_134 = arith.constant 0 : index
    %c0_135 = arith.constant 0 : index
    %348 = vector.load %arg6[%c3_133, %c0_134, %c0_135] : memref<6x16x1xf32, #tpu.memory_space<vmem>>, vector<1x16x1xf32>
    %349 = vector.shape_cast %348 : vector<1x16x1xf32> to vector<16x1xf32>
    %350 = vector.broadcast %349 : vector<16x1xf32> to vector<16x256xf32>
    %351 = arith.addf %347, %350 : vector<16x256xf32>
    %cst_136 = arith.constant 0.000000e+00 : f32
    %352 = vector.broadcast %cst_136 : f32 to vector<16x256xf32>
    %353 = arith.subf %352, %351 : vector<16x256xf32>
    %354 = math.exp %353 : vector<16x256xf32>
    %cst_137 = arith.constant 1.000000e+00 : f32
    %355 = vector.broadcast %cst_137 : f32 to vector<16x256xf32>
    %356 = arith.addf %355, %354 : vector<16x256xf32>
    %cst_138 = arith.constant 1.000000e+00 : f32
    %357 = vector.broadcast %cst_138 : f32 to vector<16x256xf32>
    %358 = arith.divf %357, %356 : vector<16x256xf32>
    %359 = arith.mulf %351, %358 : vector<16x256xf32>
    %c3_139 = arith.constant 3 : index
    %c0_140 = arith.constant 0 : index
    %c0_141 = arith.constant 0 : index
    %360 = vector.load %arg7[%c3_139, %c0_140, %c0_141] : memref<6x16x9xf32, #tpu.memory_space<vmem>>, vector<1x16x9xf32>
    %361 = vector.shape_cast %360 : vector<1x16x9xf32> to vector<16x9xf32>
    %362 = vector.extract_strided_slice %361 {offsets = [0, 0], sizes = [16, 1], strides = [1, 1]} : vector<16x9xf32> to vector<16x1xf32>
    %c17_i32_142 = arith.constant 17 : i32
    %363 = tpu.dynamic_rotate %359 by %c17_i32_142 dim 1 : vector<16x256xf32>, i32 -> vector<16x256xf32>
    %364 = vector.broadcast %362 : vector<16x1xf32> to vector<16x256xf32>
    %365 = arith.mulf %363, %364 : vector<16x256xf32>
    %366 = vector.broadcast %16 : vector<1x256xf32> to vector<16x256xf32>
    %367 = arith.mulf %365, %366 : vector<16x256xf32>
    %368 = vector.extract_strided_slice %361 {offsets = [0, 1], sizes = [16, 1], strides = [1, 1]} : vector<16x9xf32> to vector<16x1xf32>
    %c16_i32_143 = arith.constant 16 : i32
    %369 = tpu.dynamic_rotate %359 by %c16_i32_143 dim 1 : vector<16x256xf32>, i32 -> vector<16x256xf32>
    %370 = vector.broadcast %368 : vector<16x1xf32> to vector<16x256xf32>
    %371 = arith.mulf %369, %370 : vector<16x256xf32>
    %372 = vector.broadcast %18 : vector<1x256xf32> to vector<16x256xf32>
    %373 = arith.mulf %371, %372 : vector<16x256xf32>
    %374 = arith.addf %367, %373 : vector<16x256xf32>
    %375 = vector.extract_strided_slice %361 {offsets = [0, 2], sizes = [16, 1], strides = [1, 1]} : vector<16x9xf32> to vector<16x1xf32>
    %c15_i32_144 = arith.constant 15 : i32
    %376 = tpu.dynamic_rotate %359 by %c15_i32_144 dim 1 : vector<16x256xf32>, i32 -> vector<16x256xf32>
    %377 = vector.broadcast %375 : vector<16x1xf32> to vector<16x256xf32>
    %378 = arith.mulf %376, %377 : vector<16x256xf32>
    %379 = vector.broadcast %20 : vector<1x256xf32> to vector<16x256xf32>
    %380 = arith.mulf %378, %379 : vector<16x256xf32>
    %381 = arith.addf %374, %380 : vector<16x256xf32>
    %382 = vector.extract_strided_slice %361 {offsets = [0, 3], sizes = [16, 1], strides = [1, 1]} : vector<16x9xf32> to vector<16x1xf32>
    %c1_i32_145 = arith.constant 1 : i32
    %383 = tpu.dynamic_rotate %359 by %c1_i32_145 dim 1 : vector<16x256xf32>, i32 -> vector<16x256xf32>
    %384 = vector.broadcast %382 : vector<16x1xf32> to vector<16x256xf32>
    %385 = arith.mulf %383, %384 : vector<16x256xf32>
    %386 = vector.broadcast %22 : vector<1x256xf32> to vector<16x256xf32>
    %387 = arith.mulf %385, %386 : vector<16x256xf32>
    %388 = arith.addf %381, %387 : vector<16x256xf32>
    %389 = vector.extract_strided_slice %361 {offsets = [0, 4], sizes = [16, 1], strides = [1, 1]} : vector<16x9xf32> to vector<16x1xf32>
    %390 = vector.broadcast %389 : vector<16x1xf32> to vector<16x256xf32>
    %391 = arith.mulf %359, %390 : vector<16x256xf32>
    %392 = arith.addf %388, %391 : vector<16x256xf32>
    %393 = vector.extract_strided_slice %361 {offsets = [0, 5], sizes = [16, 1], strides = [1, 1]} : vector<16x9xf32> to vector<16x1xf32>
    %c255_i32_146 = arith.constant 255 : i32
    %394 = tpu.dynamic_rotate %359 by %c255_i32_146 dim 1 : vector<16x256xf32>, i32 -> vector<16x256xf32>
    %395 = vector.broadcast %393 : vector<16x1xf32> to vector<16x256xf32>
    %396 = arith.mulf %394, %395 : vector<16x256xf32>
    %397 = vector.broadcast %24 : vector<1x256xf32> to vector<16x256xf32>
    %398 = arith.mulf %396, %397 : vector<16x256xf32>
    %399 = arith.addf %392, %398 : vector<16x256xf32>
    %400 = vector.extract_strided_slice %361 {offsets = [0, 6], sizes = [16, 1], strides = [1, 1]} : vector<16x9xf32> to vector<16x1xf32>
    %c241_i32_147 = arith.constant 241 : i32
    %401 = tpu.dynamic_rotate %359 by %c241_i32_147 dim 1 : vector<16x256xf32>, i32 -> vector<16x256xf32>
    %402 = vector.broadcast %400 : vector<16x1xf32> to vector<16x256xf32>
    %403 = arith.mulf %401, %402 : vector<16x256xf32>
    %404 = vector.broadcast %26 : vector<1x256xf32> to vector<16x256xf32>
    %405 = arith.mulf %403, %404 : vector<16x256xf32>
    %406 = arith.addf %399, %405 : vector<16x256xf32>
    %407 = vector.extract_strided_slice %361 {offsets = [0, 7], sizes = [16, 1], strides = [1, 1]} : vector<16x9xf32> to vector<16x1xf32>
    %c240_i32_148 = arith.constant 240 : i32
    %408 = tpu.dynamic_rotate %359 by %c240_i32_148 dim 1 : vector<16x256xf32>, i32 -> vector<16x256xf32>
    %409 = vector.broadcast %407 : vector<16x1xf32> to vector<16x256xf32>
    %410 = arith.mulf %408, %409 : vector<16x256xf32>
    %411 = vector.broadcast %28 : vector<1x256xf32> to vector<16x256xf32>
    %412 = arith.mulf %410, %411 : vector<16x256xf32>
    %413 = arith.addf %406, %412 : vector<16x256xf32>
    %414 = vector.extract_strided_slice %361 {offsets = [0, 8], sizes = [16, 1], strides = [1, 1]} : vector<16x9xf32> to vector<16x1xf32>
    %c239_i32_149 = arith.constant 239 : i32
    %415 = tpu.dynamic_rotate %359 by %c239_i32_149 dim 1 : vector<16x256xf32>, i32 -> vector<16x256xf32>
    %416 = vector.broadcast %414 : vector<16x1xf32> to vector<16x256xf32>
    %417 = arith.mulf %415, %416 : vector<16x256xf32>
    %418 = vector.broadcast %30 : vector<1x256xf32> to vector<16x256xf32>
    %419 = arith.mulf %417, %418 : vector<16x256xf32>
    %420 = arith.addf %413, %419 : vector<16x256xf32>
    %c3_150 = arith.constant 3 : index
    %c0_151 = arith.constant 0 : index
    %c0_152 = arith.constant 0 : index
    %421 = vector.load %arg8[%c3_150, %c0_151, %c0_152] : memref<6x16x1xf32, #tpu.memory_space<vmem>>, vector<1x16x1xf32>
    %422 = vector.shape_cast %421 : vector<1x16x1xf32> to vector<16x1xf32>
    %423 = vector.broadcast %422 : vector<16x1xf32> to vector<16x256xf32>
    %424 = arith.addf %420, %423 : vector<16x256xf32>
    %cst_153 = arith.constant 0.000000e+00 : f32
    %425 = vector.broadcast %cst_153 : f32 to vector<16x256xf32>
    %426 = arith.subf %425, %424 : vector<16x256xf32>
    %427 = math.exp %426 : vector<16x256xf32>
    %cst_154 = arith.constant 1.000000e+00 : f32
    %428 = vector.broadcast %cst_154 : f32 to vector<16x256xf32>
    %429 = arith.addf %428, %427 : vector<16x256xf32>
    %cst_155 = arith.constant 1.000000e+00 : f32
    %430 = vector.broadcast %cst_155 : f32 to vector<16x256xf32>
    %431 = arith.divf %430, %429 : vector<16x256xf32>
    %432 = arith.mulf %424, %431 : vector<16x256xf32>
    %c3_156 = arith.constant 3 : index
    %c0_157 = arith.constant 0 : index
    %c0_158 = arith.constant 0 : index
    %433 = vector.load %arg9[%c3_156, %c0_157, %c0_158] : memref<6x8x16xf32, #tpu.memory_space<vmem>>, vector<1x8x16xf32>
    %434 = vector.shape_cast %433 : vector<1x8x16xf32> to vector<8x16xf32>
    %cst_159 = arith.constant dense<0.000000e+00> : vector<8x256xf32>
    %435 = tpu.matmul %434, %432, %cst_159 {dimension_numbers = #tpu.dot_dimension_numbers<[1], [0], [0], [1], [0, 0, 1, 1], [], []>} : vector<8x16xf32>, vector<16x256xf32>, vector<8x256xf32> -> vector<8x256xf32>
    %c3_160 = arith.constant 3 : index
    %c0_161 = arith.constant 0 : index
    %c0_162 = arith.constant 0 : index
    %436 = vector.load %arg10[%c3_160, %c0_161, %c0_162] : memref<6x8x1xf32, #tpu.memory_space<vmem>>, vector<1x8x1xf32>
    %437 = vector.shape_cast %436 : vector<1x8x1xf32> to vector<8x1xf32>
    %438 = vector.broadcast %437 : vector<8x1xf32> to vector<8x256xf32>
    %439 = arith.addf %435, %438 : vector<8x256xf32>
    %cst_163 = arith.constant 0.000000e+00 : f32
    %440 = vector.broadcast %cst_163 : f32 to vector<8x256xf32>
    %441 = arith.subf %440, %439 : vector<8x256xf32>
    %442 = math.exp %441 : vector<8x256xf32>
    %cst_164 = arith.constant 1.000000e+00 : f32
    %443 = vector.broadcast %cst_164 : f32 to vector<8x256xf32>
    %444 = arith.addf %443, %442 : vector<8x256xf32>
    %cst_165 = arith.constant 1.000000e+00 : f32
    %445 = vector.broadcast %cst_165 : f32 to vector<8x256xf32>
    %446 = arith.divf %445, %444 : vector<8x256xf32>
    %447 = arith.mulf %439, %446 : vector<8x256xf32>
    %c4 = arith.constant 4 : index
    %c0_166 = arith.constant 0 : index
    %c0_167 = arith.constant 0 : index
    %448 = vector.load %arg5[%c4, %c0_166, %c0_167] : memref<6x16x8xf32, #tpu.memory_space<vmem>>, vector<1x16x8xf32>
    %449 = vector.shape_cast %448 : vector<1x16x8xf32> to vector<16x8xf32>
    %cst_168 = arith.constant dense<0.000000e+00> : vector<16x256xf32>
    %450 = tpu.matmul %449, %447, %cst_168 {dimension_numbers = #tpu.dot_dimension_numbers<[1], [0], [0], [1], [0, 0, 1, 1], [], []>} : vector<16x8xf32>, vector<8x256xf32>, vector<16x256xf32> -> vector<16x256xf32>
    %c4_169 = arith.constant 4 : index
    %c0_170 = arith.constant 0 : index
    %c0_171 = arith.constant 0 : index
    %451 = vector.load %arg6[%c4_169, %c0_170, %c0_171] : memref<6x16x1xf32, #tpu.memory_space<vmem>>, vector<1x16x1xf32>
    %452 = vector.shape_cast %451 : vector<1x16x1xf32> to vector<16x1xf32>
    %453 = vector.broadcast %452 : vector<16x1xf32> to vector<16x256xf32>
    %454 = arith.addf %450, %453 : vector<16x256xf32>
    %cst_172 = arith.constant 0.000000e+00 : f32
    %455 = vector.broadcast %cst_172 : f32 to vector<16x256xf32>
    %456 = arith.subf %455, %454 : vector<16x256xf32>
    %457 = math.exp %456 : vector<16x256xf32>
    %cst_173 = arith.constant 1.000000e+00 : f32
    %458 = vector.broadcast %cst_173 : f32 to vector<16x256xf32>
    %459 = arith.addf %458, %457 : vector<16x256xf32>
    %cst_174 = arith.constant 1.000000e+00 : f32
    %460 = vector.broadcast %cst_174 : f32 to vector<16x256xf32>
    %461 = arith.divf %460, %459 : vector<16x256xf32>
    %462 = arith.mulf %454, %461 : vector<16x256xf32>
    %c4_175 = arith.constant 4 : index
    %c0_176 = arith.constant 0 : index
    %c0_177 = arith.constant 0 : index
    %463 = vector.load %arg7[%c4_175, %c0_176, %c0_177] : memref<6x16x9xf32, #tpu.memory_space<vmem>>, vector<1x16x9xf32>
    %464 = vector.shape_cast %463 : vector<1x16x9xf32> to vector<16x9xf32>
    %465 = vector.extract_strided_slice %464 {offsets = [0, 0], sizes = [16, 1], strides = [1, 1]} : vector<16x9xf32> to vector<16x1xf32>
    %c17_i32_178 = arith.constant 17 : i32
    %466 = tpu.dynamic_rotate %462 by %c17_i32_178 dim 1 : vector<16x256xf32>, i32 -> vector<16x256xf32>
    %467 = vector.broadcast %465 : vector<16x1xf32> to vector<16x256xf32>
    %468 = arith.mulf %466, %467 : vector<16x256xf32>
    %469 = vector.broadcast %16 : vector<1x256xf32> to vector<16x256xf32>
    %470 = arith.mulf %468, %469 : vector<16x256xf32>
    %471 = vector.extract_strided_slice %464 {offsets = [0, 1], sizes = [16, 1], strides = [1, 1]} : vector<16x9xf32> to vector<16x1xf32>
    %c16_i32_179 = arith.constant 16 : i32
    %472 = tpu.dynamic_rotate %462 by %c16_i32_179 dim 1 : vector<16x256xf32>, i32 -> vector<16x256xf32>
    %473 = vector.broadcast %471 : vector<16x1xf32> to vector<16x256xf32>
    %474 = arith.mulf %472, %473 : vector<16x256xf32>
    %475 = vector.broadcast %18 : vector<1x256xf32> to vector<16x256xf32>
    %476 = arith.mulf %474, %475 : vector<16x256xf32>
    %477 = arith.addf %470, %476 : vector<16x256xf32>
    %478 = vector.extract_strided_slice %464 {offsets = [0, 2], sizes = [16, 1], strides = [1, 1]} : vector<16x9xf32> to vector<16x1xf32>
    %c15_i32_180 = arith.constant 15 : i32
    %479 = tpu.dynamic_rotate %462 by %c15_i32_180 dim 1 : vector<16x256xf32>, i32 -> vector<16x256xf32>
    %480 = vector.broadcast %478 : vector<16x1xf32> to vector<16x256xf32>
    %481 = arith.mulf %479, %480 : vector<16x256xf32>
    %482 = vector.broadcast %20 : vector<1x256xf32> to vector<16x256xf32>
    %483 = arith.mulf %481, %482 : vector<16x256xf32>
    %484 = arith.addf %477, %483 : vector<16x256xf32>
    %485 = vector.extract_strided_slice %464 {offsets = [0, 3], sizes = [16, 1], strides = [1, 1]} : vector<16x9xf32> to vector<16x1xf32>
    %c1_i32_181 = arith.constant 1 : i32
    %486 = tpu.dynamic_rotate %462 by %c1_i32_181 dim 1 : vector<16x256xf32>, i32 -> vector<16x256xf32>
    %487 = vector.broadcast %485 : vector<16x1xf32> to vector<16x256xf32>
    %488 = arith.mulf %486, %487 : vector<16x256xf32>
    %489 = vector.broadcast %22 : vector<1x256xf32> to vector<16x256xf32>
    %490 = arith.mulf %488, %489 : vector<16x256xf32>
    %491 = arith.addf %484, %490 : vector<16x256xf32>
    %492 = vector.extract_strided_slice %464 {offsets = [0, 4], sizes = [16, 1], strides = [1, 1]} : vector<16x9xf32> to vector<16x1xf32>
    %493 = vector.broadcast %492 : vector<16x1xf32> to vector<16x256xf32>
    %494 = arith.mulf %462, %493 : vector<16x256xf32>
    %495 = arith.addf %491, %494 : vector<16x256xf32>
    %496 = vector.extract_strided_slice %464 {offsets = [0, 5], sizes = [16, 1], strides = [1, 1]} : vector<16x9xf32> to vector<16x1xf32>
    %c255_i32_182 = arith.constant 255 : i32
    %497 = tpu.dynamic_rotate %462 by %c255_i32_182 dim 1 : vector<16x256xf32>, i32 -> vector<16x256xf32>
    %498 = vector.broadcast %496 : vector<16x1xf32> to vector<16x256xf32>
    %499 = arith.mulf %497, %498 : vector<16x256xf32>
    %500 = vector.broadcast %24 : vector<1x256xf32> to vector<16x256xf32>
    %501 = arith.mulf %499, %500 : vector<16x256xf32>
    %502 = arith.addf %495, %501 : vector<16x256xf32>
    %503 = vector.extract_strided_slice %464 {offsets = [0, 6], sizes = [16, 1], strides = [1, 1]} : vector<16x9xf32> to vector<16x1xf32>
    %c241_i32_183 = arith.constant 241 : i32
    %504 = tpu.dynamic_rotate %462 by %c241_i32_183 dim 1 : vector<16x256xf32>, i32 -> vector<16x256xf32>
    %505 = vector.broadcast %503 : vector<16x1xf32> to vector<16x256xf32>
    %506 = arith.mulf %504, %505 : vector<16x256xf32>
    %507 = vector.broadcast %26 : vector<1x256xf32> to vector<16x256xf32>
    %508 = arith.mulf %506, %507 : vector<16x256xf32>
    %509 = arith.addf %502, %508 : vector<16x256xf32>
    %510 = vector.extract_strided_slice %464 {offsets = [0, 7], sizes = [16, 1], strides = [1, 1]} : vector<16x9xf32> to vector<16x1xf32>
    %c240_i32_184 = arith.constant 240 : i32
    %511 = tpu.dynamic_rotate %462 by %c240_i32_184 dim 1 : vector<16x256xf32>, i32 -> vector<16x256xf32>
    %512 = vector.broadcast %510 : vector<16x1xf32> to vector<16x256xf32>
    %513 = arith.mulf %511, %512 : vector<16x256xf32>
    %514 = vector.broadcast %28 : vector<1x256xf32> to vector<16x256xf32>
    %515 = arith.mulf %513, %514 : vector<16x256xf32>
    %516 = arith.addf %509, %515 : vector<16x256xf32>
    %517 = vector.extract_strided_slice %464 {offsets = [0, 8], sizes = [16, 1], strides = [1, 1]} : vector<16x9xf32> to vector<16x1xf32>
    %c239_i32_185 = arith.constant 239 : i32
    %518 = tpu.dynamic_rotate %462 by %c239_i32_185 dim 1 : vector<16x256xf32>, i32 -> vector<16x256xf32>
    %519 = vector.broadcast %517 : vector<16x1xf32> to vector<16x256xf32>
    %520 = arith.mulf %518, %519 : vector<16x256xf32>
    %521 = vector.broadcast %30 : vector<1x256xf32> to vector<16x256xf32>
    %522 = arith.mulf %520, %521 : vector<16x256xf32>
    %523 = arith.addf %516, %522 : vector<16x256xf32>
    %c4_186 = arith.constant 4 : index
    %c0_187 = arith.constant 0 : index
    %c0_188 = arith.constant 0 : index
    %524 = vector.load %arg8[%c4_186, %c0_187, %c0_188] : memref<6x16x1xf32, #tpu.memory_space<vmem>>, vector<1x16x1xf32>
    %525 = vector.shape_cast %524 : vector<1x16x1xf32> to vector<16x1xf32>
    %526 = vector.broadcast %525 : vector<16x1xf32> to vector<16x256xf32>
    %527 = arith.addf %523, %526 : vector<16x256xf32>
    %cst_189 = arith.constant 0.000000e+00 : f32
    %528 = vector.broadcast %cst_189 : f32 to vector<16x256xf32>
    %529 = arith.subf %528, %527 : vector<16x256xf32>
    %530 = math.exp %529 : vector<16x256xf32>
    %cst_190 = arith.constant 1.000000e+00 : f32
    %531 = vector.broadcast %cst_190 : f32 to vector<16x256xf32>
    %532 = arith.addf %531, %530 : vector<16x256xf32>
    %cst_191 = arith.constant 1.000000e+00 : f32
    %533 = vector.broadcast %cst_191 : f32 to vector<16x256xf32>
    %534 = arith.divf %533, %532 : vector<16x256xf32>
    %535 = arith.mulf %527, %534 : vector<16x256xf32>
    %c4_192 = arith.constant 4 : index
    %c0_193 = arith.constant 0 : index
    %c0_194 = arith.constant 0 : index
    %536 = vector.load %arg9[%c4_192, %c0_193, %c0_194] : memref<6x8x16xf32, #tpu.memory_space<vmem>>, vector<1x8x16xf32>
    %537 = vector.shape_cast %536 : vector<1x8x16xf32> to vector<8x16xf32>
    %cst_195 = arith.constant dense<0.000000e+00> : vector<8x256xf32>
    %538 = tpu.matmul %537, %535, %cst_195 {dimension_numbers = #tpu.dot_dimension_numbers<[1], [0], [0], [1], [0, 0, 1, 1], [], []>} : vector<8x16xf32>, vector<16x256xf32>, vector<8x256xf32> -> vector<8x256xf32>
    %c4_196 = arith.constant 4 : index
    %c0_197 = arith.constant 0 : index
    %c0_198 = arith.constant 0 : index
    %539 = vector.load %arg10[%c4_196, %c0_197, %c0_198] : memref<6x8x1xf32, #tpu.memory_space<vmem>>, vector<1x8x1xf32>
    %540 = vector.shape_cast %539 : vector<1x8x1xf32> to vector<8x1xf32>
    %541 = vector.broadcast %540 : vector<8x1xf32> to vector<8x256xf32>
    %542 = arith.addf %538, %541 : vector<8x256xf32>
    %cst_199 = arith.constant 0.000000e+00 : f32
    %543 = vector.broadcast %cst_199 : f32 to vector<8x256xf32>
    %544 = arith.subf %543, %542 : vector<8x256xf32>
    %545 = math.exp %544 : vector<8x256xf32>
    %cst_200 = arith.constant 1.000000e+00 : f32
    %546 = vector.broadcast %cst_200 : f32 to vector<8x256xf32>
    %547 = arith.addf %546, %545 : vector<8x256xf32>
    %cst_201 = arith.constant 1.000000e+00 : f32
    %548 = vector.broadcast %cst_201 : f32 to vector<8x256xf32>
    %549 = arith.divf %548, %547 : vector<8x256xf32>
    %550 = arith.mulf %542, %549 : vector<8x256xf32>
    %c5_202 = arith.constant 5 : index
    %c0_203 = arith.constant 0 : index
    %c0_204 = arith.constant 0 : index
    %551 = vector.load %arg5[%c5_202, %c0_203, %c0_204] : memref<6x16x8xf32, #tpu.memory_space<vmem>>, vector<1x16x8xf32>
    %552 = vector.shape_cast %551 : vector<1x16x8xf32> to vector<16x8xf32>
    %cst_205 = arith.constant dense<0.000000e+00> : vector<16x256xf32>
    %553 = tpu.matmul %552, %550, %cst_205 {dimension_numbers = #tpu.dot_dimension_numbers<[1], [0], [0], [1], [0, 0, 1, 1], [], []>} : vector<16x8xf32>, vector<8x256xf32>, vector<16x256xf32> -> vector<16x256xf32>
    %c5_206 = arith.constant 5 : index
    %c0_207 = arith.constant 0 : index
    %c0_208 = arith.constant 0 : index
    %554 = vector.load %arg6[%c5_206, %c0_207, %c0_208] : memref<6x16x1xf32, #tpu.memory_space<vmem>>, vector<1x16x1xf32>
    %555 = vector.shape_cast %554 : vector<1x16x1xf32> to vector<16x1xf32>
    %556 = vector.broadcast %555 : vector<16x1xf32> to vector<16x256xf32>
    %557 = arith.addf %553, %556 : vector<16x256xf32>
    %cst_209 = arith.constant 0.000000e+00 : f32
    %558 = vector.broadcast %cst_209 : f32 to vector<16x256xf32>
    %559 = arith.subf %558, %557 : vector<16x256xf32>
    %560 = math.exp %559 : vector<16x256xf32>
    %cst_210 = arith.constant 1.000000e+00 : f32
    %561 = vector.broadcast %cst_210 : f32 to vector<16x256xf32>
    %562 = arith.addf %561, %560 : vector<16x256xf32>
    %cst_211 = arith.constant 1.000000e+00 : f32
    %563 = vector.broadcast %cst_211 : f32 to vector<16x256xf32>
    %564 = arith.divf %563, %562 : vector<16x256xf32>
    %565 = arith.mulf %557, %564 : vector<16x256xf32>
    %c5_212 = arith.constant 5 : index
    %c0_213 = arith.constant 0 : index
    %c0_214 = arith.constant 0 : index
    %566 = vector.load %arg7[%c5_212, %c0_213, %c0_214] : memref<6x16x9xf32, #tpu.memory_space<vmem>>, vector<1x16x9xf32>
    %567 = vector.shape_cast %566 : vector<1x16x9xf32> to vector<16x9xf32>
    %568 = vector.extract_strided_slice %567 {offsets = [0, 0], sizes = [16, 1], strides = [1, 1]} : vector<16x9xf32> to vector<16x1xf32>
    %c17_i32_215 = arith.constant 17 : i32
    %569 = tpu.dynamic_rotate %565 by %c17_i32_215 dim 1 : vector<16x256xf32>, i32 -> vector<16x256xf32>
    %570 = vector.broadcast %568 : vector<16x1xf32> to vector<16x256xf32>
    %571 = arith.mulf %569, %570 : vector<16x256xf32>
    %572 = vector.broadcast %16 : vector<1x256xf32> to vector<16x256xf32>
    %573 = arith.mulf %571, %572 : vector<16x256xf32>
    %574 = vector.extract_strided_slice %567 {offsets = [0, 1], sizes = [16, 1], strides = [1, 1]} : vector<16x9xf32> to vector<16x1xf32>
    %c16_i32_216 = arith.constant 16 : i32
    %575 = tpu.dynamic_rotate %565 by %c16_i32_216 dim 1 : vector<16x256xf32>, i32 -> vector<16x256xf32>
    %576 = vector.broadcast %574 : vector<16x1xf32> to vector<16x256xf32>
    %577 = arith.mulf %575, %576 : vector<16x256xf32>
    %578 = vector.broadcast %18 : vector<1x256xf32> to vector<16x256xf32>
    %579 = arith.mulf %577, %578 : vector<16x256xf32>
    %580 = arith.addf %573, %579 : vector<16x256xf32>
    %581 = vector.extract_strided_slice %567 {offsets = [0, 2], sizes = [16, 1], strides = [1, 1]} : vector<16x9xf32> to vector<16x1xf32>
    %c15_i32_217 = arith.constant 15 : i32
    %582 = tpu.dynamic_rotate %565 by %c15_i32_217 dim 1 : vector<16x256xf32>, i32 -> vector<16x256xf32>
    %583 = vector.broadcast %581 : vector<16x1xf32> to vector<16x256xf32>
    %584 = arith.mulf %582, %583 : vector<16x256xf32>
    %585 = vector.broadcast %20 : vector<1x256xf32> to vector<16x256xf32>
    %586 = arith.mulf %584, %585 : vector<16x256xf32>
    %587 = arith.addf %580, %586 : vector<16x256xf32>
    %588 = vector.extract_strided_slice %567 {offsets = [0, 3], sizes = [16, 1], strides = [1, 1]} : vector<16x9xf32> to vector<16x1xf32>
    %c1_i32_218 = arith.constant 1 : i32
    %589 = tpu.dynamic_rotate %565 by %c1_i32_218 dim 1 : vector<16x256xf32>, i32 -> vector<16x256xf32>
    %590 = vector.broadcast %588 : vector<16x1xf32> to vector<16x256xf32>
    %591 = arith.mulf %589, %590 : vector<16x256xf32>
    %592 = vector.broadcast %22 : vector<1x256xf32> to vector<16x256xf32>
    %593 = arith.mulf %591, %592 : vector<16x256xf32>
    %594 = arith.addf %587, %593 : vector<16x256xf32>
    %595 = vector.extract_strided_slice %567 {offsets = [0, 4], sizes = [16, 1], strides = [1, 1]} : vector<16x9xf32> to vector<16x1xf32>
    %596 = vector.broadcast %595 : vector<16x1xf32> to vector<16x256xf32>
    %597 = arith.mulf %565, %596 : vector<16x256xf32>
    %598 = arith.addf %594, %597 : vector<16x256xf32>
    %599 = vector.extract_strided_slice %567 {offsets = [0, 5], sizes = [16, 1], strides = [1, 1]} : vector<16x9xf32> to vector<16x1xf32>
    %c255_i32_219 = arith.constant 255 : i32
    %600 = tpu.dynamic_rotate %565 by %c255_i32_219 dim 1 : vector<16x256xf32>, i32 -> vector<16x256xf32>
    %601 = vector.broadcast %599 : vector<16x1xf32> to vector<16x256xf32>
    %602 = arith.mulf %600, %601 : vector<16x256xf32>
    %603 = vector.broadcast %24 : vector<1x256xf32> to vector<16x256xf32>
    %604 = arith.mulf %602, %603 : vector<16x256xf32>
    %605 = arith.addf %598, %604 : vector<16x256xf32>
    %606 = vector.extract_strided_slice %567 {offsets = [0, 6], sizes = [16, 1], strides = [1, 1]} : vector<16x9xf32> to vector<16x1xf32>
    %c241_i32_220 = arith.constant 241 : i32
    %607 = tpu.dynamic_rotate %565 by %c241_i32_220 dim 1 : vector<16x256xf32>, i32 -> vector<16x256xf32>
    %608 = vector.broadcast %606 : vector<16x1xf32> to vector<16x256xf32>
    %609 = arith.mulf %607, %608 : vector<16x256xf32>
    %610 = vector.broadcast %26 : vector<1x256xf32> to vector<16x256xf32>
    %611 = arith.mulf %609, %610 : vector<16x256xf32>
    %612 = arith.addf %605, %611 : vector<16x256xf32>
    %613 = vector.extract_strided_slice %567 {offsets = [0, 7], sizes = [16, 1], strides = [1, 1]} : vector<16x9xf32> to vector<16x1xf32>
    %c240_i32_221 = arith.constant 240 : i32
    %614 = tpu.dynamic_rotate %565 by %c240_i32_221 dim 1 : vector<16x256xf32>, i32 -> vector<16x256xf32>
    %615 = vector.broadcast %613 : vector<16x1xf32> to vector<16x256xf32>
    %616 = arith.mulf %614, %615 : vector<16x256xf32>
    %617 = vector.broadcast %28 : vector<1x256xf32> to vector<16x256xf32>
    %618 = arith.mulf %616, %617 : vector<16x256xf32>
    %619 = arith.addf %612, %618 : vector<16x256xf32>
    %620 = vector.extract_strided_slice %567 {offsets = [0, 8], sizes = [16, 1], strides = [1, 1]} : vector<16x9xf32> to vector<16x1xf32>
    %c239_i32_222 = arith.constant 239 : i32
    %621 = tpu.dynamic_rotate %565 by %c239_i32_222 dim 1 : vector<16x256xf32>, i32 -> vector<16x256xf32>
    %622 = vector.broadcast %620 : vector<16x1xf32> to vector<16x256xf32>
    %623 = arith.mulf %621, %622 : vector<16x256xf32>
    %624 = vector.broadcast %30 : vector<1x256xf32> to vector<16x256xf32>
    %625 = arith.mulf %623, %624 : vector<16x256xf32>
    %626 = arith.addf %619, %625 : vector<16x256xf32>
    %c5_223 = arith.constant 5 : index
    %c0_224 = arith.constant 0 : index
    %c0_225 = arith.constant 0 : index
    %627 = vector.load %arg8[%c5_223, %c0_224, %c0_225] : memref<6x16x1xf32, #tpu.memory_space<vmem>>, vector<1x16x1xf32>
    %628 = vector.shape_cast %627 : vector<1x16x1xf32> to vector<16x1xf32>
    %629 = vector.broadcast %628 : vector<16x1xf32> to vector<16x256xf32>
    %630 = arith.addf %626, %629 : vector<16x256xf32>
    %cst_226 = arith.constant 0.000000e+00 : f32
    %631 = vector.broadcast %cst_226 : f32 to vector<16x256xf32>
    %632 = arith.subf %631, %630 : vector<16x256xf32>
    %633 = math.exp %632 : vector<16x256xf32>
    %cst_227 = arith.constant 1.000000e+00 : f32
    %634 = vector.broadcast %cst_227 : f32 to vector<16x256xf32>
    %635 = arith.addf %634, %633 : vector<16x256xf32>
    %cst_228 = arith.constant 1.000000e+00 : f32
    %636 = vector.broadcast %cst_228 : f32 to vector<16x256xf32>
    %637 = arith.divf %636, %635 : vector<16x256xf32>
    %638 = arith.mulf %630, %637 : vector<16x256xf32>
    %c5_229 = arith.constant 5 : index
    %c0_230 = arith.constant 0 : index
    %c0_231 = arith.constant 0 : index
    %639 = vector.load %arg9[%c5_229, %c0_230, %c0_231] : memref<6x8x16xf32, #tpu.memory_space<vmem>>, vector<1x8x16xf32>
    %640 = vector.shape_cast %639 : vector<1x8x16xf32> to vector<8x16xf32>
    %cst_232 = arith.constant dense<0.000000e+00> : vector<8x256xf32>
    %641 = tpu.matmul %640, %638, %cst_232 {dimension_numbers = #tpu.dot_dimension_numbers<[1], [0], [0], [1], [0, 0, 1, 1], [], []>} : vector<8x16xf32>, vector<16x256xf32>, vector<8x256xf32> -> vector<8x256xf32>
    %c5_233 = arith.constant 5 : index
    %c0_234 = arith.constant 0 : index
    %c0_235 = arith.constant 0 : index
    %642 = vector.load %arg10[%c5_233, %c0_234, %c0_235] : memref<6x8x1xf32, #tpu.memory_space<vmem>>, vector<1x8x1xf32>
    %643 = vector.shape_cast %642 : vector<1x8x1xf32> to vector<8x1xf32>
    %644 = vector.broadcast %643 : vector<8x1xf32> to vector<8x256xf32>
    %645 = arith.addf %641, %644 : vector<8x256xf32>
    %cst_236 = arith.constant 0.000000e+00 : f32
    %646 = vector.broadcast %cst_236 : f32 to vector<8x256xf32>
    %647 = arith.subf %646, %645 : vector<8x256xf32>
    %648 = math.exp %647 : vector<8x256xf32>
    %cst_237 = arith.constant 1.000000e+00 : f32
    %649 = vector.broadcast %cst_237 : f32 to vector<8x256xf32>
    %650 = arith.addf %649, %648 : vector<8x256xf32>
    %cst_238 = arith.constant 1.000000e+00 : f32
    %651 = vector.broadcast %cst_238 : f32 to vector<8x256xf32>
    %652 = arith.divf %651, %650 : vector<8x256xf32>
    %653 = arith.mulf %645, %652 : vector<8x256xf32>
    %654 = tpu.concatenate %31, %342, %653 in 0 : vector<8x256xf32>, vector<8x256xf32>, vector<8x256xf32> -> vector<24x256xf32>
    %c0_239 = arith.constant 0 : index
    %c0_240 = arith.constant 0 : index
    %655 = vector.load %arg11[%c0_239, %c0_240] : memref<16x24xf32, #tpu.memory_space<vmem>>, vector<16x24xf32>
    %cst_241 = arith.constant dense<0.000000e+00> : vector<16x256xf32>
    %656 = tpu.matmul %655, %654, %cst_241 {dimension_numbers = #tpu.dot_dimension_numbers<[1], [0], [0], [1], [0, 0, 1, 1], [], []>} : vector<16x24xf32>, vector<24x256xf32>, vector<16x256xf32> -> vector<16x256xf32>
    %c0_242 = arith.constant 0 : index
    %c0_243 = arith.constant 0 : index
    %657 = vector.load %arg12[%c0_242, %c0_243] : memref<16x1xf32, #tpu.memory_space<vmem>>, vector<16x1xf32>
    %658 = vector.broadcast %657 : vector<16x1xf32> to vector<16x256xf32>
    %659 = arith.addf %656, %658 : vector<16x256xf32>
    %cst_244 = arith.constant 0.000000e+00 : f32
    %660 = vector.broadcast %cst_244 : f32 to vector<16x256xf32>
    %661 = arith.subf %660, %659 : vector<16x256xf32>
    %662 = math.exp %661 : vector<16x256xf32>
    %cst_245 = arith.constant 1.000000e+00 : f32
    %663 = vector.broadcast %cst_245 : f32 to vector<16x256xf32>
    %664 = arith.addf %663, %662 : vector<16x256xf32>
    %cst_246 = arith.constant 1.000000e+00 : f32
    %665 = vector.broadcast %cst_246 : f32 to vector<16x256xf32>
    %666 = arith.divf %665, %664 : vector<16x256xf32>
    %667 = arith.mulf %659, %666 : vector<16x256xf32>
    %c0_247 = arith.constant 0 : index
    %c0_248 = arith.constant 0 : index
    %c0_249 = arith.constant 0 : index
    %668 = vector.load %arg13[%c0_247, %c0_248, %c0_249] : memref<1x16x256xf32, #tpu.memory_space<vmem>>, vector<1x16x256xf32>
    %669 = vector.shape_cast %668 : vector<1x16x256xf32> to vector<16x256xf32>
    %670 = vector.shape_cast %667 : vector<16x256xf32> to vector<1x16x256xf32>
    tpu.vector_store %arg13[%c0_247, %c0_248, %c0_249], %670 {strides = array<i32>} : memref<1x16x256xf32, #tpu.memory_space<vmem>>, vector<1x16x256xf32>,
    return
  }
  func.func @transform_0(%arg0: i32) -> (i32, i32, i32) {
    %c0_i32 = arith.constant 0 : i32
    %c0_i32_0 = arith.constant 0 : i32
    %c0_i32_1 = arith.constant 0 : i32
    return %arg0, %c0_i32, %c0_i32_0 : i32, i32, i32
  }
  func.func @transform_1(%arg0: i32) -> (i32, i32, i32) {
    %c0_i32 = arith.constant 0 : i32
    %c0_i32_0 = arith.constant 0 : i32
    %c0_i32_1 = arith.constant 0 : i32
    %c0_i32_2 = arith.constant 0 : i32
    return %c0_i32, %c0_i32_0, %c0_i32_1 : i32, i32, i32
  }
  func.func @transform_2(%arg0: i32) -> (i32, i32) {
    %c0_i32 = arith.constant 0 : i32
    %c0_i32_0 = arith.constant 0 : i32
    %c0_i32_1 = arith.constant 0 : i32
    return %c0_i32, %c0_i32_0 : i32, i32
  }
  func.func @transform_3(%arg0: i32) -> (i32, i32) {
    %c0_i32 = arith.constant 0 : i32
    %c0_i32_0 = arith.constant 0 : i32
    %c0_i32_1 = arith.constant 0 : i32
    return %c0_i32, %c0_i32_0 : i32, i32
  }
  func.func @transform_4(%arg0: i32) -> (i32, i32, i32) {
    %c0_i32 = arith.constant 0 : i32
    %c0_i32_0 = arith.constant 0 : i32
    %c0_i32_1 = arith.constant 0 : i32
    %c0_i32_2 = arith.constant 0 : i32
    return %c0_i32, %c0_i32_0, %c0_i32_1 : i32, i32, i32
  }
  func.func @transform_5(%arg0: i32) -> (i32, i32, i32) {
    %c0_i32 = arith.constant 0 : i32
    %c0_i32_0 = arith.constant 0 : i32
    %c0_i32_1 = arith.constant 0 : i32
    %c0_i32_2 = arith.constant 0 : i32
    return %c0_i32, %c0_i32_0, %c0_i32_1 : i32, i32, i32
  }
  func.func @transform_6(%arg0: i32) -> (i32, i32, i32) {
    %c0_i32 = arith.constant 0 : i32
    %c0_i32_0 = arith.constant 0 : i32
    %c0_i32_1 = arith.constant 0 : i32
    %c0_i32_2 = arith.constant 0 : i32
    return %c0_i32, %c0_i32_0, %c0_i32_1 : i32, i32, i32
  }
  func.func @transform_7(%arg0: i32) -> (i32, i32, i32) {
    %c0_i32 = arith.constant 0 : i32
    %c0_i32_0 = arith.constant 0 : i32
    %c0_i32_1 = arith.constant 0 : i32
    %c0_i32_2 = arith.constant 0 : i32
    return %c0_i32, %c0_i32_0, %c0_i32_1 : i32, i32, i32
  }
  func.func @transform_8(%arg0: i32) -> (i32, i32, i32) {
    %c0_i32 = arith.constant 0 : i32
    %c0_i32_0 = arith.constant 0 : i32
    %c0_i32_1 = arith.constant 0 : i32
    %c0_i32_2 = arith.constant 0 : i32
    return %c0_i32, %c0_i32_0, %c0_i32_1 : i32, i32, i32
  }
  func.func @transform_9(%arg0: i32) -> (i32, i32, i32) {
    %c0_i32 = arith.constant 0 : i32
    %c0_i32_0 = arith.constant 0 : i32
    %c0_i32_1 = arith.constant 0 : i32
    %c0_i32_2 = arith.constant 0 : i32
    return %c0_i32, %c0_i32_0, %c0_i32_1 : i32, i32, i32
  }
  func.func @transform_10(%arg0: i32) -> (i32, i32) {
    %c0_i32 = arith.constant 0 : i32
    %c0_i32_0 = arith.constant 0 : i32
    %c0_i32_1 = arith.constant 0 : i32
    return %c0_i32, %c0_i32_0 : i32, i32
  }
  func.func @transform_11(%arg0: i32) -> (i32, i32) {
    %c0_i32 = arith.constant 0 : i32
    %c0_i32_0 = arith.constant 0 : i32
    %c0_i32_1 = arith.constant 0 : i32
    return %c0_i32, %c0_i32_0 : i32, i32
  }
  func.func @transform_12(%arg0: i32) -> (i32, i32, i32) {
    %c0_i32 = arith.constant 0 : i32
    %c0_i32_0 = arith.constant 0 : i32
    %c0_i32_1 = arith.constant 0 : i32
    return %arg0, %c0_i32, %c0_i32_0 : i32, i32, i32
  }
}

</mosaic_0001>

<bundles_post_ra>
// kernel: tpu_custom_call.1
= control target key start
LH: loop header
LB: loop body
LE: loop exit
PB: predicated region body
PF: predicated region fallthrough
CT: control target
= control target key end

     0   :  { %s7074_s0 = inlined_call_operand.vmem [shape: f32[2,16,256], index: 0, kind: input, shape index: {}]   ;;  %s7075_s1 = inlined_call_operand.vmem [shape: f32[9,1,256], index: 1, kind: input, shape index: {}]   ;;  %s7076_s2 = inlined_call_operand.vmem [shape: f32[24,16], index: 2, kind: input, shape index: {}]   ;;  %s7077_s3 = inlined_call_operand.vmem [shape: f32[24,1], index: 3, kind: input, shape index: {}]   ;;  %s7078_s4 = inlined_call_operand.vmem [shape: f32[6,16,8], index: 4, kind: input, shape index: {}]   ;;  %s7079_s5 = inlined_call_operand.vmem [shape: f32[6,16,1], index: 5, kind: input, shape index: {}]   ;;  %s7080_s6 = inlined_call_operand.vmem [shape: f32[6,16,9], index: 6, kind: input, shape index: {}]   ;;  %s7081_s7 = inlined_call_operand.vmem [shape: f32[6,16,1], index: 7, kind: input, shape index: {}]   ;;  %s7082_s8 = inlined_call_operand.vmem [shape: f32[6,8,16], index: 8, kind: input, shape index: {}]   ;;  %s7083_s9 = inlined_call_operand.vmem [shape: f32[6,8,1], index: 9, kind: input, shape index: {}]   ;;  %s7084_s10 = inlined_call_operand.vmem [shape: f32[16,24], index: 10, kind: input, shape index: {}]   ;;  %s7085_s11 = inlined_call_operand.vmem [shape: f32[16,1], index: 11, kind: input, shape index: {}]   ;;  %s7086_s12 = inlined_call_operand.hbm [shape: f32[2,16,256], index: 12, kind: output, shape index: {}]  }
   0x1   :  { %7215 = sst [smem:[#allocation23_spill]] %s7074_s0 }
   0x2   :  { %7216 = sst [smem:[#allocation24_spill]] %s7075_s1 }
   0x3   :  { %7217 = sst [smem:[#allocation25_spill]] %s7076_s2 }
   0x4   :  { %17 = vsyncpa [#allocation3], 0 }
   0x5   :  { %19 = vsyncpa [#allocation3 + $0x1], 0  ;;  %s4855_s21 = smov 0   ;;  %s4857_s22 = smov 0  }
   0x6   :  { %s4859_s23 = smov 0   ;;  %s4861_s24 = smov 0  }
   0x7 LB: > { %7218 = sst [smem:[#allocation5_spill]] %s4764_s23  ;;  %s4876_s25 = sadd.s32 4294967295, %s4768_s24   ;;  %s4768_s24 = sphi %s4861_s24, %s7372_s24   ;;  %s4764_s23 = sphi %s4859_s23, %s7374_s23   ;;  %s4760_s22 = sphi %s4857_s22, %s7376_s22   ;;  %s4756_s21 = sphi %s4855_s21, %s7375_s21  }
   0x8   : > { %s4142_s26 = sadd.s32 4294967294, %s4768_s24   ;;  %s4880_s27 = sadd.s32 1, %s4768_s24  }
   0x9   : > { %7219 = sst [smem:[#allocation6_spill]] %s4880_s27  ;;  %s289_s28 = sadd.s32 1, %s4764_s23 }
   0xa   : > { %s286_s29 = ssub.s32 %s4768_s24, %s4880_s27  ;;  %p299_p0 = scmp.ne.s32.totalorder %s4764_s23, %s4760_s22 }
   0xb   : > { %p287_p1 = scmp.eq.s32.totalorder %s286_s29, 0  ;;  %p300_p2 = scmp.eq.s32.totalorder %s4876_s25, 1 }
   0xc   : > { %p305_p3 = scmp.ne.s32.totalorder %s4760_s22, %s4756_s21  ;;  %p306_p4 = scmp.eq.s32.totalorder %s4142_s26, 1 }
   0xd   : > { %s4891_s30 = scalar_select %p287_p1, %s4764_s23, %s289_s28  }
   0xe   : > { %p4893_p5 = por %p300_p2, %p299_p0  ;;  %p4897_p6 = por %p306_p4, %p305_p3 }
   0xf   : > { %7220 = sst [smem:[#allocation7_spill]] %s4891_s30  ;;  %p4145_p7 = scmp.ge.s32.totalorder %s4768_s24, 1 }
  0x10   : > { %p365_p8 = scmp.lt.s32.totalorder %s4768_s24, 3 }
  0x12   : > { %p366_p9 = pnand %p4145_p7, %p365_p8 }
  0x14   : > { %369 = sbr.rel (%p366_p9) target bundleno = 4924 (0x133c), region = 68 }
  0x1b   : > { %p407_p10 = scmp.lt.s32.totalorder %s4876_s25, 1  ;;  %v7119_v0 = vmov 0.0   ;;  %v7105_v1 = vmov 0   ;;  %v419_v2 = vld [vmem:[%s7077_s3] sm:$0xff]  ;;  %v420_v3 = vld [vmem:[%s7077_s3 + $0x8] sm:$0xff]  ;;  %s7223_s0 = sld [smem:[#allocation23_spill]] }
  0x1c   : > { %511 = vmatprep.mubr.f32.mxu0 %v7119_v0  ;;  %4326 = vset.pattern.permute.xlu0 %v7105_v1  ;;  %s7224_s2 = sld [smem:[#allocation25_spill]]  ;;  %vm437_vm0 = vcmask 130048   ;;  %v591_v12 = vld [vmem:[%s7079_s5] sm:$0xff]  ;;  %v7103_v13 = vmov 1   ;;  %v592_v15 = vld [vmem:[%s7079_s5 + $0x8] sm:$0xff]  ;;  %v7101_v17 = vmov 2  }
  0x1d   : > { %s408_s17 = scalar_select %p407_p10, %s4876_s25, 1  ;;  %424 = vperm.xlu0 %4326, %v419_v2   ;;  %674 = vmatprep.mubr.f32.mxu1 %v7119_v0  ;;  %v4935_v14 = vld [vmem:[%s7080_s6] sm:$0xff]  ;;  %v4944_v16 = vld [vmem:[%s7080_s6 + $0x8] sm:$0xff]  ;;  %v7115_v18 = vmov 4   ;;  %v7113_v19 = vmov 5   ;;  %v7111_v20 = vmov 6  }
  0x1e   : > { %4327 = vset.pattern.permute.xlu1 %v7105_v1  ;;  %v7117_v21 = vmov 3   ;;  %v589_v58 = vld [vmem:[%s7078_s4] sm:$0xff]  ;;  %vm603_vm1 = vcmask 64512   ;;  %v590_v59 = vld [vmem:[%s7078_s4 + $0x8] sm:$0xff]  ;;  %v7109_v60 = vmov 7   ;;  %v7107_v61 = vmov 8  }
  0x1f   : > { %s4234_s20 = sshll.u32 %s408_s17, 5  ;;  %595 = vperm.xlu1 %4327, %v591_v12   ;;  %s7087_s28 = smov 1   ;;  %vm3950_vm10 = vcmask 195584  }
  0x20   : > { %s7091_s15 = smov 127   ;;  %s7095_s16 = smov 16  }
  0x21   : > { %s411_s29 = scalar_lea.vmem %s7223_s0, %s4234_s20  ;;  %429 = vperm.xlu0 %4326, %v420_v3   ;;  %s7089_s17 = smov 113  }
  0x22   : > { %v413_v4 = vld [vmem:[%s411_s29 + $0x8] sm:$0xff]  ;;  %v415_v5 = vld [vmem:[%s411_s29 + $0x18] sm:$0xff]  ;;  %v412_v6 = vld [vmem:[%s411_s29] sm:$0xff]  ;;  %s7097_s18 = smov 15   ;;  %s7093_s19 = smov 112  }
  0x23   : > { %v4236_v7 = vpack.c.bf16 %v415_v5, %v413_v4  ;;  %v414_v8 = vld [vmem:[%s411_s29 + $0x10] sm:$0xff]  ;;  %v416_v10 = vld [vmem:[%s7224_s2] sm:$0xff]  ;;  %v417_v11 = vld [vmem:[%s7224_s2 + $0x8] sm:$0xff]  ;;  %600 = vperm.xlu1 %4327, %v592_v15   ;;  %s7099_s29 = smov 17   ;;  %s7153_s20 = smov 111  }
  0x24   : > { %v4238_v9 = vpack.c.bf16 %v414_v8, %v412_v6  ;;  %s7233_s1 = sld [smem:[#allocation24_spill]]  ;;  %s7256_s26 = smov 113  }
  0x25   : > { %4237 = vmatprep.subr.bf16.mxu0 %v4236_v7  ;;  %4328 = vset.pattern.permute.xlu0 %v7103_v13  ;;  %s7313_s27 = smov 111  }
  0x26   : > { %4239 = vmatpush1.bf16.msra.mxu0 %v4238_v9  ;;  %775 = vperm.xlu0 %4328, %v4935_v14  }
  0x27   : > { %739 = vperm.xlu1 %4327, %v4944_v16  }
  0x29   : > { %4149 = vmatmul.mubr.msk.f32.vlgmr.msra.gmra.mrb[0].mxu0 %vm437_vm0, %v416_v10 }
  0x2a   : > { %517 = vmatprep.mubr.f32.mxu0 %v7119_v0  ;;  %4331 = vset.pattern.permute.xlu0 %v7101_v17 }
  0x2b   : > { %823 = vperm.xlu0 %4331, %v4944_v16   ;;  %4329 = vset.pattern.permute.xlu1 %v7103_v13 }
  0x2c   : > { %779 = vperm.xlu1 %4329, %v4944_v16  }
  0x2d   : > { %4150 = vmatmul.mubr.msk.f32.gmra.mrb[2].mxu0 %vm437_vm0, %v417_v11 }
  0x2e   : > { %523 = vmatprep.mubr.f32.mxu0 %v7119_v0 }
  0x2f   : > { %4333 = vset.pattern.permute.xlu0 %v7115_v18 }
  0x30   : > { %894 = vperm.xlu0 %4333, %v4935_v14   ;;  %4330 = vset.pattern.permute.xlu1 %v7101_v17 }
  0x31   : > { %819 = vperm.xlu1 %4330, %v4935_v14  }
  0x34   : > { %4336 = vset.pattern.permute.xlu0 %v7113_v19 }
  0x35   : > { %927 = vperm.xlu0 %4336, %v4944_v16   ;;  %4332 = vset.pattern.permute.xlu1 %v7117_v21 }
  0x36   : > { %863 = vperm.xlu1 %4332, %v4935_v14  }
  0x39   : > { %4337 = vset.pattern.permute.xlu0 %v7111_v20 }
  0x3a   : > { %967 = vperm.xlu0 %4337, %v4935_v14   ;;  %867 = vperm.xlu1 %4332, %v4944_v16  }
  0x3e   : > { %4334 = vset.pattern.permute.xlu1 %v7115_v18  ;;  %4340 = vset.pattern.permute.xlu0 %v7109_v60 }
  0x3f   : > { %898 = vperm.xlu1 %4334, %v4944_v16   ;;  %1015 = vperm.xlu0 %4340, %v4944_v16  }
  0x43   : > { %4335 = vset.pattern.permute.xlu1 %v7113_v19  ;;  %4341 = vset.pattern.permute.xlu0 %v7107_v61 }
  0x44   : > { %923 = vperm.xlu1 %4335, %v4935_v14   ;;  %1055 = vperm.xlu0 %4341, %v4935_v14  }
  0x48   : > { %4338 = vset.pattern.permute.xlu1 %v7111_v20  ;;  %4342 = vset.pattern.permute.xlu0 %v7105_v1 }
  0x49   : > { %971 = vperm.xlu1 %4338, %v4944_v16   ;;  %734 = vperm.xlu0 %4342, %v4935_v14  }
  0x4d   : > { %4339 = vset.pattern.permute.xlu1 %v7109_v60 }
  0x4e   : > { %1011 = vperm.xlu1 %4339, %v4935_v14  }
  0x52   : > { %4343 = vset.pattern.permute.xlu1 %v7107_v61 }
  0x53   : > { %1059 = vperm.xlu1 %4343, %v4944_v16  }
  0x57   : > { %4344 = vset.pattern.permute.xlu1 %v7105_v1  ;;  %v4156_v1 = vld [vmem:[%s7233_s1 + $0xc] sm:$0x3] }
  0x9c   : > { %v425_v22 = vpop.permute.xlu0 %424 }
  0x9e   : > { %v596_v62 = vpop.permute.xlu1 %595 }
  0xa0   : > { %v430_v28 = vpop.permute.xlu0 %429 }
  0xa2   : > { %v601_v11 = vpop.permute.xlu1 %600 }
  0xfc   : > { %v513_v23 = vpop.f32.mrb[0].mxu0 }
  0xfd   : > { %v514_v24 = vadd.f32 %v513_v23, %v425_v22  ;;  %v515_v25 = vpop.f32.mrb[1].mxu0 }
  0xfe   : > { %v516_v26 = vadd.f32 %v515_v25, %v425_v22 }
  0xff   : > { %v530_v27 = vsub.f32 0.0, %v514_v24 }
 0x100   : > { %v531_v29 = vsub.f32 0.0, %v516_v26  ;;  %v519_v30 = vpop.f32.mrb[2].mxu0 }
 0x101   : > { %v536_v31 = vmul.f32 1.442695, %v530_v27  ;;  %v520_v32 = vadd.f32 %v519_v30, %v430_v28  ;;  %v521_v33 = vpop.f32.mrb[3].mxu0 }
 0x102   : > { %v538_v34 = vmul.f32 1.442695, %v531_v29  ;;  %v522_v35 = vadd.f32 %v521_v33, %v430_v28 }
 0x103   : > { %4426 = vpow2.f32 %v536_v31  ;;  %v532_v36 = vsub.f32 0.0, %v520_v32 }
 0x104   : > { %4428 = vpow2.f32 %v538_v34  ;;  %v533_v37 = vsub.f32 0.0, %v522_v35 }
 0x105   : > { %v540_v38 = vmul.f32 1.442695, %v532_v36 }
 0x106   : > { %v542_v39 = vmul.f32 1.442695, %v533_v37 }
 0x107   : > { %4430 = vpow2.f32 %v540_v38 }
 0x108   : > { %4432 = vpow2.f32 %v542_v39 }
 0x10d   : > { %v4427_v40 = vpop.eup %4426 }
 0x10e   : > { %v4429_v41 = vpop.eup %4428  ;;  %v548_v42 = vadd.f32 1.0, %v4427_v40  ;;  %v1086_v40 = vld [vmem:[%s7081_s7 + $0x8] sm:$0xff] }
 0x10f   : > { %v549_v43 = vadd.f32 1.0, %v4429_v41  ;;  %v4165_v41 = vld [vmem:[%s7079_s5 + $0x18] sm:$0xff] }
 0x110   : > { %4434 = vrcp.f32 %v548_v42  ;;  %v5067_v42 = vpop.permute.xlu1 %739 }
 0x111   : > { %v4431_v44 = vpop.eup %4430  ;;  %4436 = vrcp.f32 %v549_v43 }
 0x112   : > { %v4433_v45 = vpop.eup %4432  ;;  %v550_v46 = vadd.f32 1.0, %v4431_v44 }
 0x113   : > { %v551_v47 = vadd.f32 1.0, %v4433_v45  ;;  %v5078_v45 = vpop.permute.xlu0 %775 }
 0x114   : > { %4438 = vrcp.f32 %v550_v46  ;;  %v5071_v43 = vpop.permute.xlu1 %779  ;;  %v1085_v46 = vld [vmem:[%s7081_s7] sm:$0xff] }
 0x115   : > { %4440 = vrcp.f32 %v551_v47  ;;  %v1130_v47 = vld [vmem:[%s7083_s9] sm:$0xff] }
 0x118   : > { %v5076_v44 = vpop.permute.xlu1 %819 }
 0x11a   : > { %v4435_v48 = vpop.eup %4434 }
 0x11b   : > { %v4437_v49 = vpop.eup %4436  ;;  %v4970_v55 = vmul.f32 %v4435_v48, %v514_v24 }
 0x11c   : > { %v4968_v53 = vmul.f32 %v4437_v49, %v516_v26  ;;  %v5088_v48 = vpop.permute.xlu1 %863  ;;  %v5090_v49 = vpop.permute.xlu0 %823 }
 0x11d   : > { %7226 = vst [vmem:[#allocation9_spill] sm:$0xff] %v4970_v55 }
 0x11e   : > { %v4439_v50 = vpop.eup %4438  ;;  %7225 = vst [vmem:[#allocation8_spill] sm:$0xff] %v4968_v53 }
 0x11f   : > { %v4441_v51 = vpop.eup %4440  ;;  %v568_v52 = vmul.f32 %v4439_v50, %v520_v32  ;;  %v4164_v50 = vld [vmem:[%s7079_s5 + $0x10] sm:$0xff] }
 0x120   : > { %v569_v54 = vmul.f32 %v4441_v51, %v522_v35  ;;  %v5095_v51 = vpop.permute.xlu1 %867 }
 0x121   : > { %v587_v57 = vadd.f32 %v568_v52, %v4970_v55  ;;  %v895_v52 = vpop.permute.xlu0 %894 }
 0x122   : > { %v588_v56 = vadd.f32 %v569_v54, %v4968_v53  ;;  %v5100_v54 = vld [vmem:[%s7080_s6 + $0x10] sm:$0xff] }
 0x123   : > { %7229 = vst [vmem:[#allocation10_spill] sm:$0xff] %v5100_v54 }
 0x124   : > { %610 = vmatprep.subr.mxu1 %v588_v56 }
 0x125   : > { %611 = vmatpush1.msra.mxu1 %v587_v57  ;;  %v5103_v56 = vpop.permute.xlu0 %927  ;;  %v899_v57 = vpop.permute.xlu1 %898 }
 0x126   : > { %4159 = vmatmul.mubr.msk.f32.vlgmr.msra.gmra.mrb[0].mxu1 %vm603_vm1, %v589_v58 }
 0x127   : > { %680 = vmatprep.mubr.f32.mxu1 %v7119_v0 }
 0x129   : > { %v5107_v58 = vpop.permute.xlu1 %923 }
 0x12a   : > { %4160 = vmatmul.mubr.msk.f32.gmra.mrb[2].mxu1 %vm603_vm1, %v590_v59  ;;  %v5109_v59 = vpop.permute.xlu0 %967 }
 0x12b   : > { %1203 = vmatprep.mubr.f32.mxu1 %v7119_v0 }
 0x1f9   : > { %v676_v63 = vpop.f32.mrb[0].mxu1 }
 0x1fa   : > { %v677_v2 = vadd.f32 %v676_v63, %v596_v62  ;;  %v678_v3 = vpop.f32.mrb[1].mxu1  ;;  %v5115_v63 = vpop.permute.xlu0 %1015 }
 0x1fb   : > { %v679_v4 = vadd.f32 %v678_v3, %v596_v62  ;;  %v5113_v62 = vpop.permute.xlu1 %971 }
 0x1fc   : > { %v687_v5 = vsub.f32 0.0, %v677_v2 }
 0x1fd   : > { %v682_v6 = vpop.f32.mrb[2].mxu1  ;;  %v688_v8 = vsub.f32 0.0, %v679_v4 }
 0x1fe   : > { %v691_v7 = vmul.f32 1.442695, %v687_v5  ;;  %v684_v9 = vpop.f32.mrb[3].mxu1  ;;  %v683_v15 = vadd.f32 %v682_v6, %v601_v11  ;;  %v5119_v3 = vpop.permute.xlu0 %1055 }
 0x1ff   : > { %v693_v10 = vmul.f32 1.442695, %v688_v8  ;;  %v685_v27 = vadd.f32 %v684_v9, %v601_v11  ;;  %7231 = vst [vmem:[#allocation12_spill] sm:$0xff] %v5119_v3 }
 0x200   : > { %4442 = vpow2.f32 %v691_v7  ;;  %v689_v22 = vsub.f32 0.0, %v683_v15 }
 0x201   : > { %4444 = vpow2.f32 %v693_v10  ;;  %v690_v28 = vsub.f32 0.0, %v685_v27 }
 0x202   : > { %v695_v23 = vmul.f32 1.442695, %v689_v22  ;;  %v735_v5 = vpop.permute.xlu0 %734 }
 0x203   : > { %v697_v31 = vmul.f32 1.442695, %v690_v28 }
 0x20a   : > { %v4443_v12 = vpop.eup %4442 }
 0x20b   : > { %v699_v16 = vadd.f32 1.0, %v4443_v12  ;;  %v4445_v14 = vpop.eup %4444 }
 0x20c   : > { %v700_v24 = vadd.f32 1.0, %v4445_v14 }
 0x20d   : > { %4446 = vrcp.f32 %v699_v16 }
 0x20e   : > { %4448 = vpow2.f32 %v695_v23 }
 0x20f   : > { %4450 = vrcp.f32 %v700_v24 }
 0x210   : > { %4452 = vpow2.f32 %v697_v31 }
 0x217   : > { %v4447_v25 = vpop.eup %4446 }
 0x218   : > { %v4995_v26 = vmul.f32 %v4447_v25, %v677_v2  ;;  %v4449_v29 = vpop.eup %4448  ;;  %v5117_v2 = vpop.permute.xlu1 %1011 }
 0x219   : > { %v4451_v30 = vpop.eup %4450  ;;  %v701_v32 = vadd.f32 1.0, %v4449_v29  ;;  %7230 = vst [vmem:[#allocation11_spill] sm:$0xff] %v5117_v2  ;;  %v725_v29 = vlaneseq }
 0x21a   : > { %849 = vrot.lane.b32.xlu1 %v4995_v26, %s7087_s28  ;;  %717 = vrot.lane.b32.xlu0 %v4995_v26, %s7099_s29  ;;  %v5009_v33 = vmul.f32 %v4451_v30, %v679_v4  ;;  %v4453_v34 = vpop.eup %4452 }
 0x21b   : > { %4454 = vrcp.f32 %v701_v32  ;;  %v702_v36 = vadd.f32 1.0, %v4453_v34  ;;  %v748_v31 = vshrl.u32 %v725_v29, 7 }
 0x21c   : > { %v5121_v4 = vpop.permute.xlu1 %1059 }
 0x21d   : > { %4456 = vrcp.f32 %v702_v36  ;;  %v749_v36 = vsub.s32 0, %v748_v31 }
 0x21e   : > { %909 = vrot.lane.b32.xlu1 %v4995_v26, %s7091_s15  ;;  %761 = vrot.lane.b32.xlu0 %v4995_v26, %s7095_s16 }
 0x21f   : > { %v5202_v20 = vrot.slane %v4156_v1, %v749_v36 }
 0x222   : > { %953 = vrot.lane.b32.xlu1 %v4995_v26, %s7089_s17  ;;  %805 = vrot.lane.b32.xlu0 %v4995_v26, %s7097_s18 }
 0x225   : > { %v4455_v35 = vpop.eup %4454 }
 0x226   : > { %997 = vrot.lane.b32.xlu1 %v4995_v26, %s7093_s19  ;;  %721 = vrot.lane.b32.xlu0 %v5009_v33, %s7099_s29  ;;  %v5027_v37 = vmul.f32 %v4455_v35, %v683_v15  ;;  %v5147_v35 = vand.u32 127, %v725_v29 }
 0x227   : > { %v4457_v38 = vpop.eup %4456 }
 0x228   : > { %v5045_v39 = vmul.f32 %v4457_v38, %v685_v27  ;;  %v572_v38 = vld [vmem:[%s7233_s1] sm:$0x3]  ;;  %vm727_vm2 = vcmp.lt.s32.totalorder %v5147_v35, 17  ;;  %vm769_vm3 = vcmp.lt.s32.totalorder %v5147_v35, 16  ;;  %vm813_vm4 = vcmp.lt.s32.totalorder %v5147_v35, 15 }
 0x229   : > { %v5163_v29 = vrot.slane %v572_v38, %v749_v36  ;;  %vm961_vm5 = vcmp.lt.s32.totalorder %v5147_v35, 113  ;;  %vm857_vm6 = vcmp.lt.s32.totalorder %v5147_v35, 1  ;;  %vm917_vm7 = vcmp.lt.s32.totalorder %v5147_v35, 127 }
 0x22a   : > { %1041 = vrot.lane.b32.xlu1 %v4995_v26, %s7153_s20  ;;  %765 = vrot.lane.b32.xlu0 %v5009_v33, %s7095_s16  ;;  %v5181_v61 = vmul.f32 %v899_v57, %v5045_v39  ;;  %vm1005_vm8 = vcmp.lt.s32.totalorder %v5147_v35, 112  ;;  %vm1049_vm9 = vcmp.lt.s32.totalorder %v5147_v35, 111 }
 0x22e   : > { %957 = vrot.lane.b32.xlu1 %v5009_v33, %s7089_s17  ;;  %809 = vrot.lane.b32.xlu0 %v5009_v33, %s7097_s18 }
 0x232   : > { %1001 = vrot.lane.b32.xlu1 %v5009_v33, %s7093_s19  ;;  %853 = vrot.lane.b32.xlu0 %v5009_v33, %s7087_s28 }
 0x236   : > { %719 = vrot.lane.b32.xlu1 %v5027_v37, %s7099_s29  ;;  %913 = vrot.lane.b32.xlu0 %v5009_v33, %s7091_s15 }
 0x23a   : > { %763 = vrot.lane.b32.xlu1 %v5027_v37, %s7095_s16  ;;  %955 = vrot.lane.b32.xlu0 %v5027_v37, %s7089_s17 }
 0x23e   : > { %807 = vrot.lane.b32.xlu1 %v5027_v37, %s7097_s18  ;;  %999 = vrot.lane.b32.xlu0 %v5027_v37, %s7093_s19 }
 0x242   : > { %851 = vrot.lane.b32.xlu1 %v5027_v37, %s7087_s28  ;;  %1043 = vrot.lane.b32.xlu0 %v5027_v37, %s7153_s20  ;;  %s7257_s28 = smov 112  }
 0x246   : > { %911 = vrot.lane.b32.xlu1 %v5027_v37, %s7091_s15  ;;  %959 = vrot.lane.b32.xlu0 %v5045_v39, %s7089_s17  ;;  %s7255_s17 = smov 15  }
 0x24a   : > { %723 = vrot.lane.b32.xlu1 %v5045_v39, %s7099_s29  ;;  %1003 = vrot.lane.b32.xlu0 %v5045_v39, %s7093_s19  ;;  %s7227_s19 = smov 1   ;;  %s7253_s29 = smov 17  }
 0x24e   : > { %767 = vrot.lane.b32.xlu1 %v5045_v39, %s7095_s16  ;;  %1047 = vrot.lane.b32.xlu0 %v5045_v39, %s7153_s20  ;;  %s7228_s16 = smov 127  }
 0x252   : > { %811 = vrot.lane.b32.xlu1 %v5045_v39, %s7097_s18  ;;  %1094 = vperm.xlu0 %4342, %v1086_v40   ;;  %v753_v40 = vsub.s32 1, %v748_v31  ;;  %s7254_s18 = smov 16  }
 0x254   : > { %v5169_v31 = vrot.slane %v572_v38, %v753_v40  ;;  %v5209_v21 = vrot.slane %v4156_v1, %v753_v40  ;;  %v4155_v1 = vld [vmem:[%s7233_s1 + $0xa] sm:$0x3] }
 0x256   : > { %855 = vrot.lane.b32.xlu1 %v5045_v39, %s7227_s19  ;;  %1237 = vperm.xlu0 %4342, %v4165_v41   ;;  %v4152_v41 = vld [vmem:[%s7233_s1 + $0x2] sm:$0x3] }
 0x257   : > { %v5183_v60 = vrot.slane %v4152_v41, %v753_v40 }
 0x25a   : > { %915 = vrot.lane.b32.xlu1 %v5045_v39, %s7228_s16  ;;  %4346 = vset.pattern.permute.xlu0 %v7103_v13 }
 0x25e   : > { %1045 = vrot.lane.b32.xlu1 %v5009_v33, %s7153_s20 }
 0x262   : > { %1089 = vperm.xlu1 %4344, %v1085_v46  }
 0x266   : > { %1133 = vperm.xlu1 %4344, %v1130_v47  }
 0x26a   : > { %1232 = vperm.xlu1 %4344, %v4164_v50   ;;  %v5160_v50 = vmul.f32 %v895_v52, %v4995_v26  ;;  %v5178_v26 = vmul.f32 %v899_v57, %v5027_v37 }
 0x26e   : > { %1368 = vperm.xlu1 %4344, %v5100_v54  }
 0x272   : > { %4345 = vset.pattern.permute.xlu1 %v7103_v13  ;;  %v5171_v13 = vrot.slane %v4152_v41, %v749_v36 }
 0x273   : > { %1397 = vperm.xlu1 %4345, %v5100_v54  }
 0x277   : > { %4347 = vset.pattern.permute.xlu1 %v7101_v17  ;;  %v5167_v17 = vmul.f32 %v895_v52, %v5009_v33  ;;  %v4153_v33 = vld [vmem:[%s7233_s1 + $0x4] sm:$0x3]  ;;  %v4157_v52 = vld [vmem:[%s7233_s1 + $0xe] sm:$0x3] }
 0x278   : > { %1429 = vperm.xlu1 %4347, %v5100_v54   ;;  %v5215_v0 = vrot.slane %v4157_v52, %v749_v36 }
 0x27a   : > { %7234 = vst [vmem:[#allocation14_spill] sm:$0xff] %v5215_v0 }
 0x28c   : > { %v5123_v6 = vpop.permute.xlu1 %849  ;;  %v718_v7 = vpop.permute.xlu0 %717 }
 0x290   : > { %v5125_v8 = vpop.permute.xlu1 %909  ;;  %v762_v9 = vpop.permute.xlu0 %761 }
 0x294   : > { %v5127_v10 = vpop.permute.xlu1 %953  ;;  %v806_v11 = vpop.permute.xlu0 %805 }
 0x298   : > { %v5129_v12 = vpop.permute.xlu1 %997  ;;  %v722_v15 = vpop.permute.xlu0 %721 }
 0x299   : > { %v728_v38 = vsel %vm727_vm2, %v718_v7, %v722_v15  ;;  %v730_v37 = vsel %vm727_vm2, %v722_v15, %v718_v7  ;;  %v5211_v7 = vrot.slane %v4153_v33, %v749_v36  ;;  %v5213_v15 = vrot.slane %v4153_v33, %v753_v40  ;;  %v4158_v33 = vld [vmem:[%s7233_s1 + $0x10] sm:$0x3] }
 0x29a   : > { %v742_v55 = vmul.f32 %v735_v5, %v730_v37  ;;  %v743_v53 = vmul.f32 %v735_v5, %v728_v38  ;;  %v5238_v37 = vrot.slane %v4157_v52, %v753_v40  ;;  %v5251_v2 = vrot.slane %v4158_v33, %v753_v40 }
 0x29c   : > { %v5131_v16 = vpop.permute.xlu1 %1041  ;;  %v766_v22 = vpop.permute.xlu0 %765  ;;  %7235 = vst [vmem:[#allocation15_spill] sm:$0xff] %v5238_v37  ;;  %7237 = vst [vmem:[#allocation17_spill] sm:$0xff] %v5251_v2  ;;  %v758_v37 = vmul.f32 %v5169_v31, %v743_v53 }
 0x29d   : > { %7232 = vst [vmem:[#allocation13_spill] sm:$0xff] %v5131_v16  ;;  %v770_v39 = vsel %vm769_vm3, %v762_v9, %v766_v22  ;;  %v772_v57 = vsel %vm769_vm3, %v766_v22, %v762_v9  ;;  %v4154_v9 = vld [vmem:[%s7233_s1 + $0x6] sm:$0x3] }
 0x2a0   : > { %v5133_v14 = vpop.permute.xlu1 %957  ;;  %v810_v23 = vpop.permute.xlu0 %809 }
 0x2a1   : > { %v814_v19 = vsel %vm813_vm4, %v806_v11, %v810_v23  ;;  %v816_v18 = vsel %vm813_vm4, %v810_v23, %v806_v11  ;;  %v782_v11 = vmul.f32 %v5078_v45, %v772_v57  ;;  %v783_v23 = vmul.f32 %v5078_v45, %v770_v39 }
 0x2a2   : > { %v826_v54 = vmul.f32 %v5076_v44, %v816_v18  ;;  %v827_v3 = vmul.f32 %v5076_v44, %v814_v19  ;;  %v5240_v39 = vrot.slane %v4154_v9, %v749_v36  ;;  %v5242_v57 = vrot.slane %v4154_v9, %v753_v40 }
 0x2a3   : > { %v5245_v18 = vrot.slane %v4155_v1, %v749_v36  ;;  %v5247_v19 = vrot.slane %v4155_v1, %v753_v40  ;;  %v5249_v44 = vrot.slane %v4158_v33, %v749_v36  ;;  %v797_v16 = vmul.f32 %v5171_v13, %v782_v11 }
 0x2a4   : > { %v5135_v24 = vpop.permute.xlu1 %1001  ;;  %v854_v25 = vpop.permute.xlu0 %853  ;;  %v757_v9 = vmul.f32 %v5163_v29, %v742_v55  ;;  %v841_v0 = vmul.f32 %v5211_v7, %v826_v54  ;;  %v842_v1 = vmul.f32 %v5213_v15, %v827_v3  ;;  %v5283_v54 = vsel %vm961_vm5, %v5133_v14, %v5127_v10 }
 0x2a5   : > { %v858_v5 = vsel %vm857_vm6, %v5123_v6, %v854_v25  ;;  %v860_v45 = vsel %vm857_vm6, %v854_v25, %v5123_v6  ;;  %7236 = vst [vmem:[#allocation16_spill] sm:$0xff] %v5249_v44  ;;  %v798_v6 = vmul.f32 %v5183_v60, %v783_v23 }
 0x2a6   : > { %v870_v25 = vmul.f32 %v5088_v48, %v860_v45  ;;  %v871_v52 = vmul.f32 %v5088_v48, %v858_v5  ;;  %v5277_v48 = vsel %vm961_vm5, %v5127_v10, %v5133_v14  ;;  %v801_v23 = vadd.f32 %v797_v16, %v757_v9 }
 0x2a8   : > { %v5137_v27 = vpop.permute.xlu1 %719  ;;  %v5139_v28 = vpop.permute.xlu0 %913  ;;  %v885_v33 = vmul.f32 %v5240_v39, %v870_v25  ;;  %v886_v5 = vmul.f32 %v5242_v57, %v871_v52 }
 0x2a9   : > { %v918_v45 = vsel %vm917_vm7, %v5125_v8, %v5139_v28  ;;  %v920_v10 = vsel %vm917_vm7, %v5139_v28, %v5125_v8 }
 0x2ac   : > { %v5141_v30 = vpop.permute.xlu1 %763  ;;  %v5143_v32 = vpop.permute.xlu0 %955 }
 0x2b0   : > { %v5145_v34 = vpop.permute.xlu1 %807  ;;  %v5155_v46 = vpop.permute.xlu0 %999 }
 0x2b4   : > { %v5157_v47 = vpop.permute.xlu1 %851  ;;  %v5220_v22 = vpop.permute.xlu0 %1043 }
 0x2b8   : > { %v5200_v41 = vpop.permute.xlu1 %911  ;;  %v960_v36 = vpop.permute.xlu0 %959 }
 0x2bc   : > { %v724_v38 = vpop.permute.xlu1 %723  ;;  %v1004_v25 = vpop.permute.xlu0 %1003 }
 0x2bd   : > { %v729_v40 = vsel %vm727_vm2, %v5137_v27, %v724_v38  ;;  %v731_v11 = vsel %vm727_vm2, %v724_v38, %v5137_v27  ;;  %v845_v38 = vadd.f32 %v841_v0, %v801_v23 }
 0x2be   : > { %v744_v14 = vmul.f32 %v5067_v42, %v731_v11 }
 0x2bf   : > { %v889_v9 = vadd.f32 %v885_v33, %v845_v38 }
 0x2c0   : > { %v768_v44 = vpop.permute.xlu1 %767  ;;  %v759_v11 = vmul.f32 %v5163_v29, %v744_v14 }
 0x2c1   : > { %v771_v55 = vsel %vm769_vm3, %v5141_v30, %v768_v44  ;;  %v773_v53 = vsel %vm769_vm3, %v768_v44, %v5141_v30  ;;  %v802_v30 = vadd.f32 %v798_v6, %v758_v37 }
 0x2c2   : > { %v784_v3 = vmul.f32 %v5071_v43, %v773_v53  ;;  %v785_v27 = vmul.f32 %v5071_v43, %v771_v55  ;;  %v745_v43 = vmul.f32 %v5067_v42, %v729_v40  ;;  %v931_v40 = vmul.f32 %v5107_v58, %v920_v10 }
 0x2c3   : > { %v846_v37 = vadd.f32 %v842_v1, %v802_v30  ;;  %v930_v1 = vmul.f32 %v5107_v58, %v918_v45 }
 0x2c4   : > { %v812_v16 = vpop.permute.xlu1 %811  ;;  %v799_v8 = vmul.f32 %v5171_v13, %v784_v3  ;;  %v800_v28 = vmul.f32 %v5183_v60, %v785_v27  ;;  %v760_v55 = vmul.f32 %v5169_v31, %v745_v43  ;;  %v963_v27 = vsel %vm961_vm5, %v5143_v32, %v960_v36  ;;  %v1048_v43 = vpop.permute.xlu0 %1047 }
 0x2c5   : > { %v815_v44 = vsel %vm813_vm4, %v5145_v34, %v812_v16  ;;  %v817_v6 = vsel %vm813_vm4, %v812_v16, %v5145_v34  ;;  %v890_v0 = vadd.f32 %v886_v5, %v846_v37  ;;  %v945_v10 = vmul.f32 %v5245_v18, %v930_v1 }
 0x2c6   : > { %v828_v42 = vmul.f32 %v5090_v49, %v817_v6  ;;  %v829_v52 = vmul.f32 %v5090_v49, %v815_v44  ;;  %v965_v49 = vsel %vm961_vm5, %v960_v36, %v5143_v32  ;;  %v803_v30 = vadd.f32 %v799_v8, %v759_v11 }
 0x2c7   : > { %v804_v33 = vadd.f32 %v800_v28, %v760_v55  ;;  %v946_v14 = vmul.f32 %v5247_v19, %v931_v40  ;;  %v1007_v32 = vsel %vm1005_vm8, %v5155_v46, %v1004_v25  ;;  %v1009_v36 = vsel %vm1005_vm8, %v1004_v25, %v5155_v46 }
 0x2c8   : > { %v843_v34 = vmul.f32 %v5211_v7, %v828_v42  ;;  %v844_v53 = vmul.f32 %v5213_v15, %v829_v52  ;;  %v856_v3 = vpop.permute.xlu1 %855  ;;  %v976_v44 = vmul.f32 %v5113_v62, %v963_v27  ;;  %v977_v6 = vmul.f32 %v5113_v62, %v965_v49 }
 0x2c9   : > { %v859_v58 = vsel %vm857_vm6, %v5157_v47, %v856_v3  ;;  %v861_v23 = vsel %vm857_vm6, %v856_v3, %v5157_v47  ;;  %v1020_v1 = vmul.f32 %v5115_v63, %v1007_v32  ;;  %v1021_v40 = vmul.f32 %v5115_v63, %v1009_v36  ;;  %v7240_v36 = vld [vmem:[#allocation13_spill] sm:$0xff] }
 0x2ca   : > { %v872_v5 = vmul.f32 %v5095_v51, %v861_v23  ;;  %v873_v45 = vmul.f32 %v5095_v51, %v859_v58  ;;  %v847_v47 = vadd.f32 %v843_v34, %v803_v30  ;;  %v848_v16 = vadd.f32 %v844_v53, %v804_v33 }
 0x2cb   : > { %v1051_v62 = vsel %vm1049_vm9, %v5220_v22, %v1048_v43  ;;  %v1053_v11 = vsel %vm1049_vm9, %v1048_v43, %v5220_v22  ;;  %v906_v53 = vadd.f32 %v5167_v17, %v890_v0  ;;  %v905_v63 = vadd.f32 %v5160_v50, %v889_v9  ;;  %v7239_v0 = vld [vmem:[#allocation15_spill] sm:$0xff]  ;;  %v7241_v43 = vld [vmem:[#allocation16_spill] sm:$0xff] }
 0x2cc   : > { %v887_v38 = vmul.f32 %v5240_v39, %v872_v5  ;;  %v888_v37 = vmul.f32 %v5242_v57, %v873_v45  ;;  %v916_v51 = vpop.permute.xlu1 %915  ;;  %v991_v3 = vmul.f32 %v5202_v20, %v976_v44  ;;  %v992_v27 = vmul.f32 %v5209_v21, %v977_v6  ;;  %v7243_v44 = vld [vmem:[#allocation12_spill] sm:$0xff] }
 0x2cd   : > { %v919_v8 = vsel %vm917_vm7, %v5200_v41, %v916_v51  ;;  %v921_v46 = vsel %vm917_vm7, %v916_v51, %v5200_v41  ;;  %v1064_v49 = vmul.f32 %v5121_v4, %v1051_v62  ;;  %v1065_v22 = vmul.f32 %v5121_v4, %v1053_v11  ;;  %v7238_v4 = vld [vmem:[#allocation14_spill] sm:$0xff] }
 0x2ce   : > { %v891_v25 = vadd.f32 %v887_v38, %v847_v47  ;;  %v892_v28 = vadd.f32 %v888_v37, %v848_v16  ;;  %v932_v42 = vmul.f32 %v5103_v56, %v919_v8  ;;  %v933_v52 = vmul.f32 %v5103_v56, %v921_v46 }
 0x2cf   : > { %v975_v30 = vmul.f32 %v5109_v59, %v5283_v54  ;;  %v1006_v17 = vsel %vm1005_vm8, %v5129_v12, %v5135_v24  ;;  %v1008_v50 = vsel %vm1005_vm8, %v5135_v24, %v5129_v12  ;;  %v1035_v9 = vmul.f32 %v7238_v4, %v1020_v1 }
 0x2d0   : > { %v907_v41 = vadd.f32 %v5178_v26, %v891_v25  ;;  %v908_v55 = vadd.f32 %v5181_v61, %v892_v28  ;;  %v947_v34 = vmul.f32 %v5245_v18, %v932_v42  ;;  %v948_v56 = vmul.f32 %v5247_v19, %v933_v52  ;;  %v1046_v23 = vpop.permute.xlu1 %1045 }
 0x2d1   : > { %v974_v61 = vmul.f32 %v5109_v59, %v5277_v48  ;;  %v1036_v33 = vmul.f32 %v7239_v0, %v1021_v40  ;;  %v949_v48 = vadd.f32 %v945_v10, %v905_v63  ;;  %v950_v32 = vadd.f32 %v946_v14, %v906_v53  ;;  %v7242_v10 = vld [vmem:[#allocation11_spill] sm:$0xff]  ;;  %v1095_v28 = vpop.permute.xlu0 %1094 }
 0x2d2   : > { %v951_v58 = vadd.f32 %v947_v34, %v907_v41  ;;  %v952_v26 = vadd.f32 %v948_v56, %v908_v55  ;;  %v1050_v59 = vsel %vm1049_vm9, %v7240_v36, %v1046_v23  ;;  %v1052_v54 = vsel %vm1049_vm9, %v1046_v23, %v7240_v36 }
 0x2d3   : > { %v1079_v47 = vmul.f32 %v7241_v43, %v1064_v49  ;;  %v1080_v12 = vmul.f32 %v5251_v2, %v1065_v22  ;;  %v989_v38 = vmul.f32 %v5202_v20, %v974_v61  ;;  %v990_v37 = vmul.f32 %v5209_v21, %v975_v30 }
 0x2d4   : > { %v995_v5 = vadd.f32 %v991_v3, %v951_v58  ;;  %v996_v45 = vadd.f32 %v992_v27, %v952_v26  ;;  %v1018_v14 = vmul.f32 %v7242_v10, %v1006_v17  ;;  %v1019_v51 = vmul.f32 %v7242_v10, %v1008_v50 }
 0x2d5   : > { %v1062_v6 = vmul.f32 %v7243_v44, %v1050_v59  ;;  %v1063_v8 = vmul.f32 %v7243_v44, %v1052_v54  ;;  %v993_v1 = vadd.f32 %v989_v38, %v949_v48  ;;  %v994_v40 = vadd.f32 %v990_v37, %v950_v32  ;;  %v1129_v44 = vld [vmem:[%s7082_s8] sm:$0xff] }
 0x2d6   : > { %v1039_v24 = vadd.f32 %v1035_v9, %v995_v5  ;;  %v1040_v16 = vadd.f32 %v1036_v33, %v996_v45  ;;  %v1033_v62 = vmul.f32 %v7238_v4, %v1018_v14  ;;  %v1034_v11 = vmul.f32 %v7239_v0, %v1019_v51 }
 0x2d7   : > { %v1077_v41 = vmul.f32 %v7241_v43, %v1062_v6  ;;  %v1078_v55 = vmul.f32 %v5251_v2, %v1063_v8  ;;  %v7244_v6 = vmov 0.0   ;;  %v4169_v8 = vld [vmem:[%s7080_s6 + $0x18] sm:$0xff] }
 0x2d8   : > { %v1083_v46 = vadd.f32 %v1079_v47, %v1039_v24  ;;  %v1084_v25 = vadd.f32 %v1080_v12, %v1040_v16  ;;  %v1037_v63 = vadd.f32 %v1033_v62, %v993_v1  ;;  %v1038_v3 = vadd.f32 %v1034_v11, %v994_v40  ;;  %1433 = vperm.xlu1 %4347, %v4169_v8  }
 0x2d9   : > { %1401 = vperm.xlu0 %4346, %v4169_v8   ;;  %v7250_v1 = vmov 7   ;;  %v7251_v40 = vmov 8   ;;  %v7252_v62 = vmov 0  }
 0x2da   : > { %v1099_v42 = vadd.f32 %v1095_v28, %v1083_v46  ;;  %v1100_v52 = vadd.f32 %v1095_v28, %v1084_v25  ;;  %v1081_v49 = vadd.f32 %v1077_v41, %v1037_v63  ;;  %v1082_v22 = vadd.f32 %v1078_v55, %v1038_v3  ;;  %v7246_v25 = vld [vmem:[#allocation10_spill] sm:$0xff] }
 0x2db   : > { %v7245_v46 = vmov 3   ;;  %v7247_v28 = vmov 4  }
 0x2dc   : > { %v1103_v34 = vsub.f32 0.0, %v1099_v42  ;;  %v1104_v56 = vsub.f32 0.0, %v1100_v52  ;;  %4349 = vset.pattern.permute.xlu1 %v7245_v46 }
 0x2dd   : > { %4348 = vset.pattern.permute.xlu0 %v7245_v46  ;;  %1465 = vperm.xlu1 %4349, %v4169_v8  }
 0x2de   : > { %v1109_v53 = vmul.f32 1.442695, %v1103_v34  ;;  %v1111_v27 = vmul.f32 1.442695, %v1104_v56  ;;  %1461 = vperm.xlu0 %4348, %v7246_v25  }
 0x2e0   : > { %4458 = vpow2.f32 %v1109_v53 }
 0x2e1   : > { %v1090_v58 = vpop.permute.xlu1 %1089  ;;  %4460 = vpow2.f32 %v1111_v27  ;;  %4350 = vset.pattern.permute.xlu1 %v7247_v28 }
 0x2e2   : > { %v1097_v26 = vadd.f32 %v1090_v58, %v1081_v49  ;;  %v1098_v23 = vadd.f32 %v1090_v58, %v1082_v22  ;;  %4351 = vset.pattern.permute.xlu0 %v7247_v28  ;;  %1481 = vperm.xlu1 %4350, %v7246_v25  }
 0x2e3   : > { %1485 = vperm.xlu0 %4351, %v4169_v8  }
 0x2e4   : > { %v1101_v61 = vsub.f32 0.0, %v1097_v26  ;;  %v1102_v30 = vsub.f32 0.0, %v1098_v23 }
 0x2e5   : > { %v1134_v11 = vpop.permute.xlu1 %1133 }
 0x2e6   : > { %v1105_v17 = vmul.f32 1.442695, %v1101_v61  ;;  %v1107_v50 = vmul.f32 1.442695, %v1102_v30 }
 0x2e8   : > { %4462 = vpow2.f32 %v1105_v17 }
 0x2e9   : > { %4464 = vpow2.f32 %v1107_v50  ;;  %v4162_v50 = vld [vmem:[%s7078_s4 + $0x10] sm:$0xff] }
 0x2ea   : > { %v4459_v9 = vpop.eup %4458 }
 0x2eb   : > { %v4461_v33 = vpop.eup %4460  ;;  %v1115_v5 = vadd.f32 1.0, %v4459_v9  ;;  %v4163_v9 = vld [vmem:[%s7078_s4 + $0x18] sm:$0xff] }
 0x2ec   : > { %v1116_v45 = vadd.f32 1.0, %v4461_v33  ;;  %v1233_v33 = vpop.permute.xlu1 %1232 }
 0x2ed   : > { %4466 = vrcp.f32 %v1115_v5 }
 0x2ee   : > { %4468 = vrcp.f32 %v1116_v45 }
 0x2f2   : > { %v4463_v48 = vpop.eup %4462 }
 0x2f3   : > { %v4465_v32 = vpop.eup %4464  ;;  %v1113_v36 = vadd.f32 1.0, %v4463_v48 }
 0x2f4   : > { %v1114_v59 = vadd.f32 1.0, %v4465_v32 }
 0x2f5   : > { %4470 = vrcp.f32 %v1113_v36 }
 0x2f6   : > { %4472 = vrcp.f32 %v1114_v59  ;;  %v1238_v59 = vpop.permute.xlu0 %1237 }
 0x2f7   : > { %v4467_v54 = vpop.eup %4466 }
 0x2f8   : > { %v4469_v47 = vpop.eup %4468  ;;  %v1127_v16 = vmul.f32 %v4467_v54, %v1099_v42  ;;  %v7248_v42 = vmov 5  }
 0x2f9   : > { %v1128_v37 = vmul.f32 %v4469_v47, %v1100_v52  ;;  %4352 = vset.pattern.permute.xlu1 %v7248_v42  ;;  %v7249_v52 = vmov 6  }
 0x2fa   : > { %4353 = vset.pattern.permute.xlu0 %v7249_v52  ;;  %1509 = vperm.xlu1 %4352, %v7246_v25  }
 0x2fb   : > { %1541 = vperm.xlu0 %4353, %v7246_v25  }
 0x2fe   : > { %1513 = vperm.xlu1 %4352, %v4169_v8  }
 0x2ff   : > { %v4471_v12 = vpop.eup %4470  ;;  %4356 = vset.pattern.permute.xlu0 %v7250_v1 }
 0x300   : > { %v4473_v24 = vpop.eup %4472  ;;  %v1125_v38 = vmul.f32 %v4471_v12, %v1097_v26  ;;  %1577 = vperm.xlu0 %4356, %v4169_v8  }
 0x301   : > { %v1126_v10 = vmul.f32 %v4473_v24, %v1098_v23 }
 0x302   : > { %v4242_v14 = vpack.c.bf16 %v1127_v16, %v1125_v38  ;;  %4354 = vset.pattern.permute.xlu1 %v7249_v52 }
 0x303   : > { %v4240_v51 = vpack.c.bf16 %v1128_v37, %v1126_v10  ;;  %1545 = vperm.xlu1 %4354, %v4169_v8  }
 0x304   : > { %4357 = vset.pattern.permute.xlu0 %v7251_v40 }
 0x305   : > { %4241 = vmatprep.subr.bf16.mxu1 %v4240_v51  ;;  %1605 = vperm.xlu0 %4357, %v7246_v25  }
 0x306   : > { %4243 = vmatpush1.bf16.msra.mxu1 %v4242_v14 }
 0x307   : > { %4355 = vset.pattern.permute.xlu1 %v7250_v1 }
 0x308   : > { %1573 = vperm.xlu1 %4355, %v7246_v25  }
 0x309   : > { %4161 = vmatmul.mubr.msk.f32.vlgmr.msra.gmra.mrb[4].mxu1 %vm437_vm0, %v1129_v44  ;;  %4358 = vset.pattern.permute.xlu0 %v7252_v62 }
 0x30a   : > { %1310 = vmatprep.mubr.f32.mxu1 %v7244_v6  ;;  %1373 = vperm.xlu0 %4358, %v4169_v8  }
 0x30c   : > { %4359 = vset.pattern.permute.xlu1 %v7251_v40 }
 0x30d   : > { %1609 = vperm.xlu1 %4359, %v4169_v8  }
 0x311   : > { %4360 = vset.pattern.permute.xlu1 %v7252_v62 }
 0x3dc   : > { %v1205_v41 = vpop.f32.mrb[4].mxu1 }
 0x3dd   : > { %v1206_v55 = vadd.f32 %v1205_v41, %v1134_v11  ;;  %v1207_v34 = vpop.f32.mrb[5].mxu1 }
 0x3de   : > { %v1208_v56 = vadd.f32 %v1207_v34, %v1134_v11 }
 0x3df   : > { %v1210_v53 = vsub.f32 0.0, %v1206_v55 }
 0x3e0   : > { %v1211_v63 = vsub.f32 0.0, %v1208_v56 }
 0x3e1   : > { %v1212_v3 = vmul.f32 1.442695, %v1210_v53 }
 0x3e2   : > { %v1214_v27 = vmul.f32 1.442695, %v1211_v63 }
 0x3e3   : > { %4474 = vpow2.f32 %v1212_v3 }
 0x3e4   : > { %4476 = vpow2.f32 %v1214_v27 }
 0x3ed   : > { %v4475_v49 = vpop.eup %4474 }
 0x3ee   : > { %v4477_v22 = vpop.eup %4476  ;;  %v1216_v58 = vadd.f32 1.0, %v4475_v49 }
 0x3ef   : > { %v1217_v26 = vadd.f32 1.0, %v4477_v22 }
 0x3f0   : > { %4478 = vrcp.f32 %v1216_v58 }
 0x3f1   : > { %4480 = vrcp.f32 %v1217_v26 }
 0x3fa   : > { %v4479_v23 = vpop.eup %4478 }
 0x3fb   : > { %v4481_v61 = vpop.eup %4480  ;;  %v1222_v17 = vmul.f32 %v4479_v23, %v1206_v55 }
 0x3fc   : > { %v1223_v30 = vmul.f32 %v4481_v61, %v1208_v56  ;;  %v5498_v61 = vpop.permute.xlu1 %1368 }
 0x3fe   : > { %1246 = vmatprep.subr.mxu1 %v1223_v30 }
 0x3ff   : > { %1247 = vmatpush1.msra.mxu1 %v1222_v17  ;;  %v4171_v17 = vld [vmem:[%s7081_s7 + $0x18] sm:$0xff] }
 0x400   : > { %4166 = vmatmul.mubr.msk.f32.vlgmr.msra.gmra.mrb[6].mxu1 %vm603_vm1, %v4162_v50  ;;  %v5504_v30 = vpop.permute.xlu1 %1397  ;;  %v4178_v50 = vld [vmem:[%s7079_s5 + $0x28] sm:$0xff] }
 0x401   : > { %1316 = vmatprep.mubr.f32.mxu1 %v7244_v6 }
 0x404   : > { %4167 = vmatmul.mubr.msk.f32.gmra.mrb[8].mxu1 %vm603_vm1, %v4163_v9  ;;  %v5518_v9 = vpop.permute.xlu1 %1429 }
 0x405   : > { %1745 = vmatprep.mubr.f32.mxu1 %v7244_v6 }
 0x4d3   : > { %v1312_v5 = vpop.f32.mrb[6].mxu1 }
 0x4d4   : > { %v1313_v45 = vadd.f32 %v1312_v5, %v1233_v33  ;;  %v1314_v48 = vpop.f32.mrb[7].mxu1  ;;  %v5525_v5 = vpop.permute.xlu1 %1433 }
 0x4d5   : > { %v1315_v32 = vadd.f32 %v1314_v48, %v1233_v33  ;;  %v4170_v33 = vld [vmem:[%s7081_s7 + $0x10] sm:$0xff]  ;;  %v4173_v48 = vld [vmem:[%s7083_s9 + $0x8] sm:$0xff] }
 0x4d6   : > { %v1323_v36 = vsub.f32 0.0, %v1313_v45 }
 0x4d7   : > { %v1324_v54 = vsub.f32 0.0, %v1315_v32  ;;  %v1318_v47 = vpop.f32.mrb[8].mxu1 }
 0x4d8   : > { %v1327_v12 = vmul.f32 1.442695, %v1323_v36  ;;  %v1319_v24 = vadd.f32 %v1318_v47, %v1238_v59  ;;  %v1320_v16 = vpop.f32.mrb[9].mxu1  ;;  %v5534_v36 = vpop.permute.xlu1 %1465 }
 0x4d9   : > { %v1329_v38 = vmul.f32 1.442695, %v1324_v54  ;;  %v1321_v11 = vadd.f32 %v1320_v16, %v1238_v59  ;;  %v5536_v59 = vpop.permute.xlu0 %1401  ;;  %v5541_v54 = vld [vmem:[%s7080_s6 + $0x20] sm:$0xff] }
 0x4da   : > { %4482 = vpow2.f32 %v1327_v12  ;;  %v1325_v37 = vsub.f32 0.0, %v1319_v24  ;;  %7259 = vst [vmem:[#allocation13_spill] sm:$0xff] %v5541_v54 }
 0x4db   : > { %4484 = vpow2.f32 %v1329_v38  ;;  %v1326_v55 = vsub.f32 0.0, %v1321_v11  ;;  %v7260_v38 = vmov 2  }
 0x4dc   : > { %v1331_v10 = vmul.f32 1.442695, %v1325_v37  ;;  %v1482_v47 = vpop.permute.xlu1 %1481 }
 0x4dd   : > { %v1333_v63 = vmul.f32 1.442695, %v1326_v55  ;;  %v1462_v12 = vpop.permute.xlu0 %1461 }
 0x4de   : > { %4486 = vpow2.f32 %v1331_v10 }
 0x4e1   : > { %v5548_v16 = vpop.permute.xlu0 %1485 }
 0x4e4   : > { %v4483_v14 = vpop.eup %4482 }
 0x4e5   : > { %v4485_v51 = vpop.eup %4484  ;;  %v1335_v44 = vadd.f32 1.0, %v4483_v14  ;;  %v5553_v10 = vpop.permute.xlu0 %1541 }
 0x4e6   : > { %v1336_v8 = vadd.f32 1.0, %v4485_v51 }
 0x4e7   : > { %4488 = vrcp.f32 %v1335_v44 }
 0x4e8   : > { %4490 = vrcp.f32 %v1336_v8  ;;  %v4487_v25 = vpop.eup %4486 }
 0x4e9   : > { %v1337_v41 = vadd.f32 1.0, %v4487_v25  ;;  %v5558_v51 = vpop.permute.xlu0 %1577 }
 0x4eb   : > { %4492 = vrcp.f32 %v1337_v41 }
 0x4ec   : > { %4494 = vpow2.f32 %v1333_v63 }
 0x4ed   : > { %v5562_v8 = vpop.permute.xlu0 %1605 }
 0x4ee   : > { %7262 = vst [vmem:[#allocation12_spill] sm:$0xff] %v5562_v8 }
 0x4f1   : > { %v4489_v34 = vpop.eup %4488 }
 0x4f2   : > { %v5438_v56 = vmul.f32 %v4489_v34, %v1313_v45  ;;  %v4491_v53 = vpop.eup %4490  ;;  %v7258_v45 = vmov 1  }
 0x4f3   : > { %v5444_v3 = vmul.f32 %v4491_v53, %v1315_v32  ;;  %v4177_v32 = vld [vmem:[%s7079_s5 + $0x20] sm:$0xff] }
 0x4f4   : > { %1448 = vrot.lane.b32.xlu0 %v5438_v56, %s7227_s19  ;;  %1354 = vrot.lane.b32.xlu1 %v5438_v56, %s7253_s29  ;;  %v5593_v43 = vmul.f32 %v1482_v47, %v5438_v56 }
 0x4f5   : > { %v4493_v27 = vpop.eup %4492 }
 0x4f6   : > { %v5454_v49 = vmul.f32 %v4493_v27, %v1319_v24  ;;  %v4495_v22 = vpop.eup %4494  ;;  %v5544_v24 = vpop.permute.xlu1 %1509 }
 0x4f7   : > { %v1338_v58 = vadd.f32 1.0, %v4495_v22 }
 0x4f8   : > { %1452 = vrot.lane.b32.xlu0 %v5444_v3, %s7227_s19  ;;  %1384 = vrot.lane.b32.xlu1 %v5438_v56, %s7254_s18 }
 0x4f9   : > { %4496 = vrcp.f32 %v1338_v58 }
 0x4fa   : > { %v5551_v37 = vpop.permute.xlu1 %1513 }
 0x4fc   : > { %1500 = vrot.lane.b32.xlu0 %v5444_v3, %s7228_s16  ;;  %1416 = vrot.lane.b32.xlu1 %v5438_v56, %s7255_s17 }
 0x4fe   : > { %v5556_v14 = vpop.permute.xlu1 %1545 }
 0x500   : > { %1356 = vrot.lane.b32.xlu0 %v5454_v49, %s7253_s29  ;;  %1496 = vrot.lane.b32.xlu1 %v5438_v56, %s7228_s16 }
 0x502   : > { %v5560_v44 = vpop.permute.xlu1 %1573 }
 0x503   : > { %v4497_v26 = vpop.eup %4496  ;;  %7261 = vst [vmem:[#allocation11_spill] sm:$0xff] %v5560_v44 }
 0x504   : > { %1386 = vrot.lane.b32.xlu0 %v5454_v49, %s7254_s18  ;;  %1528 = vrot.lane.b32.xlu1 %v5438_v56, %s7256_s26  ;;  %v5480_v23 = vmul.f32 %v4497_v26, %v1321_v11  ;;  %v1374_v11 = vpop.permute.xlu0 %1373 }
 0x506   : > { %v5564_v25 = vpop.permute.xlu1 %1609 }
 0x508   : > { %1418 = vrot.lane.b32.xlu0 %v5454_v49, %s7255_s17  ;;  %1560 = vrot.lane.b32.xlu1 %v5438_v56, %s7257_s28 }
 0x50c   : > { %1530 = vrot.lane.b32.xlu0 %v5454_v49, %s7256_s26  ;;  %1592 = vrot.lane.b32.xlu1 %v5438_v56, %s7153_s20 }
 0x510   : > { %1562 = vrot.lane.b32.xlu0 %v5454_v49, %s7257_s28  ;;  %1358 = vrot.lane.b32.xlu1 %v5444_v3, %s7253_s29 }
 0x514   : > { %1594 = vrot.lane.b32.xlu0 %v5454_v49, %s7153_s20  ;;  %1388 = vrot.lane.b32.xlu1 %v5444_v3, %s7254_s18 }
 0x518   : > { %1360 = vrot.lane.b32.xlu0 %v5480_v23, %s7253_s29  ;;  %1420 = vrot.lane.b32.xlu1 %v5444_v3, %s7255_s17 }
 0x51c   : > { %1390 = vrot.lane.b32.xlu0 %v5480_v23, %s7254_s18  ;;  %1532 = vrot.lane.b32.xlu1 %v5444_v3, %s7256_s26 }
 0x520   : > { %1422 = vrot.lane.b32.xlu0 %v5480_v23, %s7255_s17  ;;  %1564 = vrot.lane.b32.xlu1 %v5444_v3, %s7257_s28 }
 0x524   : > { %1534 = vrot.lane.b32.xlu0 %v5480_v23, %s7256_s26  ;;  %1450 = vrot.lane.b32.xlu1 %v5454_v49, %s7227_s19 }
 0x528   : > { %1566 = vrot.lane.b32.xlu0 %v5480_v23, %s7257_s28  ;;  %1498 = vrot.lane.b32.xlu1 %v5454_v49, %s7228_s16 }
 0x52c   : > { %1598 = vrot.lane.b32.xlu0 %v5480_v23, %s7153_s20  ;;  %1454 = vrot.lane.b32.xlu1 %v5480_v23, %s7227_s19 }
 0x530   : > { %1634 = vperm.xlu0 %4358, %v4171_v17   ;;  %1502 = vrot.lane.b32.xlu1 %v5480_v23, %s7228_s16 }
 0x534   : > { %1779 = vperm.xlu0 %4358, %v4178_v50   ;;  %1596 = vrot.lane.b32.xlu1 %v5444_v3, %s7153_s20 }
 0x538   : > { %1629 = vperm.xlu1 %4360, %v4170_v33   ;;  %4362 = vset.pattern.permute.xlu0 %v7258_v45 }
 0x53c   : > { %1675 = vperm.xlu1 %4360, %v4173_v48  }
 0x540   : > { %1774 = vperm.xlu1 %4360, %v4177_v32  }
 0x544   : > { %1910 = vperm.xlu1 %4360, %v5541_v54  }
 0x548   : > { %4361 = vset.pattern.permute.xlu1 %v7258_v45 }
 0x549   : > { %1939 = vperm.xlu1 %4361, %v5541_v54  }
 0x54d   : > { %4363 = vset.pattern.permute.xlu1 %v7260_v38 }
 0x54e   : > { %1971 = vperm.xlu1 %4363, %v5541_v54  }
 0x566   : > { %v1449_v41 = vpop.permute.xlu0 %1448  ;;  %v1355_v55 = vpop.permute.xlu1 %1354 }
 0x56a   : > { %v1453_v34 = vpop.permute.xlu0 %1452  ;;  %v1385_v53 = vpop.permute.xlu1 %1384 }
 0x56b   : > { %v1456_v54 = vsel %vm857_vm6, %v1449_v41, %v1453_v34  ;;  %v1458_v46 = vsel %vm857_vm6, %v1453_v34, %v1449_v41 }
 0x56c   : > { %v1469_v4 = vmul.f32 %v1462_v12, %v1456_v54 }
 0x56e   : > { %v1501_v63 = vpop.permute.xlu0 %1500  ;;  %v1417_v27 = vpop.permute.xlu1 %1416 }
 0x572   : > { %v1357_v22 = vpop.permute.xlu0 %1356  ;;  %v1497_v58 = vpop.permute.xlu1 %1496 }
 0x576   : > { %v1387_v26 = vpop.permute.xlu0 %1386  ;;  %v5566_v17 = vpop.permute.xlu1 %1528 }
 0x57a   : > { %v1419_v50 = vpop.permute.xlu0 %1418  ;;  %v5568_v33 = vpop.permute.xlu1 %1560 }
 0x57b   : > { %7263 = vst [vmem:[#allocation10_spill] sm:$0xff] %v5568_v33 }
 0x57e   : > { %v5570_v48 = vpop.permute.xlu0 %1530  ;;  %v5572_v32 = vpop.permute.xlu1 %1592 }
 0x57f   : > { %7264 = vst [vmem:[#allocation18_spill] sm:$0xff] %v5572_v32  ;;  %v5596_v32 = vmul.f32 %v1482_v47, %v5444_v3 }
 0x582   : > { %v5574_v38 = vpop.permute.xlu0 %1562  ;;  %v1359_v45 = vpop.permute.xlu1 %1358 }
 0x583   : > { %v1362_v44 = vsel %vm727_vm2, %v1355_v55, %v1359_v45  ;;  %v1364_v2 = vsel %vm727_vm2, %v1359_v45, %v1355_v55 }
 0x584   : > { %v1376_v56 = vmul.f32 %v5498_v61, %v1364_v2  ;;  %v1377_v3 = vmul.f32 %v5498_v61, %v1362_v44  ;;  %v1504_v2 = vsel %vm917_vm7, %v1497_v58, %v1501_v63  ;;  %v1506_v61 = vsel %vm917_vm7, %v1501_v63, %v1497_v58 }
 0x586   : > { %v5576_v62 = vpop.permute.xlu0 %1594  ;;  %v1389_v40 = vpop.permute.xlu1 %1388  ;;  %v1381_v63 = vmul.f32 %v1377_v3, %v5169_v31 }
 0x587   : > { %v1392_v6 = vsel %vm769_vm3, %v1385_v53, %v1389_v40  ;;  %v1394_v8 = vsel %vm769_vm3, %v1389_v40, %v1385_v53  ;;  %v1468_v53 = vmul.f32 %v1462_v12, %v1458_v46 }
 0x588   : > { %v1404_v33 = vmul.f32 %v5504_v30, %v1394_v8  ;;  %v1405_v45 = vmul.f32 %v5504_v30, %v1392_v6 }
 0x58a   : > { %v1361_v1 = vpop.permute.xlu0 %1360  ;;  %v1421_v52 = vpop.permute.xlu1 %1420  ;;  %v1409_v8 = vmul.f32 %v1405_v45, %v5183_v60  ;;  %v1516_v45 = vmul.f32 %v5544_v24, %v1504_v2 }
 0x58b   : > { %v1424_v41 = vsel %vm813_vm4, %v1417_v27, %v1421_v52  ;;  %v1426_v34 = vsel %vm813_vm4, %v1421_v52, %v1417_v27  ;;  %v1363_v52 = vsel %vm727_vm2, %v1357_v22, %v1361_v1  ;;  %v1365_v46 = vsel %vm727_vm2, %v1361_v1, %v1357_v22 }
 0x58c   : > { %v1436_v54 = vmul.f32 %v5518_v9, %v1426_v34  ;;  %v1437_v6 = vmul.f32 %v5518_v9, %v1424_v41  ;;  %v1408_v1 = vmul.f32 %v1404_v33, %v5171_v13  ;;  %v1380_v22 = vmul.f32 %v1376_v56, %v5163_v29 }
 0x58d   : > { %v1378_v58 = vmul.f32 %v1374_v11, %v1365_v46  ;;  %v1490_v34 = vmul.f32 %v5548_v16, %v5454_v49  ;;  %v1517_v56 = vmul.f32 %v5544_v24, %v1506_v61  ;;  %v1472_v46 = vmul.f32 %v1468_v53, %v5240_v39 }
 0x58e   : > { %v1391_v42 = vpop.permute.xlu0 %1390  ;;  %v5578_v28 = vpop.permute.xlu1 %1532  ;;  %v1440_v41 = vmul.f32 %v1436_v54, %v5211_v7  ;;  %v1520_v61 = vmul.f32 %v1516_v45, %v5245_v18 }
 0x58f   : > { %v1393_v47 = vsel %vm769_vm3, %v1387_v26, %v1391_v42  ;;  %v1395_v55 = vsel %vm769_vm3, %v1391_v42, %v1387_v26  ;;  %v1379_v26 = vmul.f32 %v1374_v11, %v1363_v52  ;;  %v1412_v11 = vadd.f32 %v1408_v1, %v1380_v22 }
 0x590   : > { %v1406_v9 = vmul.f32 %v5536_v59, %v1395_v55  ;;  %v1407_v27 = vmul.f32 %v5536_v59, %v1393_v47  ;;  %v1491_v59 = vmul.f32 %v5548_v16, %v5480_v23  ;;  %v1413_v47 = vadd.f32 %v1409_v8, %v1381_v63 }
 0x591   : > { %v1382_v49 = vmul.f32 %v1378_v58, %v5163_v29  ;;  %v1383_v54 = vmul.f32 %v1379_v26, %v5169_v31  ;;  %v1444_v16 = vadd.f32 %v1440_v41, %v1412_v11  ;;  %v1538_v53 = vsel %vm961_vm5, %v5578_v28, %v5566_v17 }
 0x592   : > { %v1423_v0 = vpop.permute.xlu0 %1422  ;;  %v5602_v40 = vpop.permute.xlu1 %1564  ;;  %v1410_v55 = vmul.f32 %v1406_v9, %v5171_v13  ;;  %v1411_v52 = vmul.f32 %v1407_v27, %v5183_v60 }
 0x593   : > { %v1425_v30 = vsel %vm813_vm4, %v1419_v50, %v1423_v0  ;;  %v1427_v42 = vsel %vm813_vm4, %v1423_v0, %v1419_v50  ;;  %v1441_v0 = vmul.f32 %v1437_v6, %v5213_v15 }
 0x594   : > { %v1438_v50 = vmul.f32 %v5525_v5, %v1427_v42  ;;  %v1439_v33 = vmul.f32 %v5525_v5, %v1425_v30  ;;  %v1473_v5 = vmul.f32 %v1469_v4, %v5242_v57  ;;  %v1521_v30 = vmul.f32 %v1517_v56, %v5247_v19 }
 0x595   : > { %v1445_v6 = vadd.f32 %v1441_v0, %v1413_v47  ;;  %v1536_v4 = vsel %vm961_vm5, %v5566_v17, %v5578_v28  ;;  %v1414_v1 = vadd.f32 %v1410_v55, %v1382_v49  ;;  %v1415_v8 = vadd.f32 %v1411_v52, %v1383_v54 }
 0x596   : > { %v1535_v12 = vpop.permute.xlu0 %1534  ;;  %v1451_v44 = vpop.permute.xlu1 %1450  ;;  %v1442_v24 = vmul.f32 %v1438_v50, %v5211_v7  ;;  %v1443_v2 = vmul.f32 %v1439_v33, %v5213_v15  ;;  %v1476_v17 = vadd.f32 %v1472_v46, %v1444_v16 }
 0x597   : > { %v1537_v22 = vsel %vm961_vm5, %v5570_v48, %v1535_v12  ;;  %v1539_v63 = vsel %vm961_vm5, %v1535_v12, %v5570_v48  ;;  %v1477_v26 = vadd.f32 %v1473_v5, %v1445_v6 }
 0x598   : > { %v1446_v41 = vadd.f32 %v1442_v24, %v1414_v1  ;;  %v1447_v0 = vadd.f32 %v1443_v2, %v1415_v8  ;;  %v1551_v56 = vmul.f32 %v5556_v14, %v1539_v63  ;;  %v1492_v24 = vadd.f32 %v5593_v43, %v1476_v17 }
 0x59a   : > { %v1499_v3 = vpop.permute.xlu1 %1498  ;;  %v1567_v23 = vpop.permute.xlu0 %1566  ;;  %v1555_v2 = vmul.f32 %v1551_v56, %v5209_v21  ;;  %v7272_v56 = vld [vmem:[#allocation12_spill] sm:$0xff] }
 0x59b   : > { %v1571_v50 = vsel %vm1005_vm8, %v1567_v23, %v5574_v38 }
 0x59c   : > { %v1583_v49 = vmul.f32 %v5558_v51, %v1571_v50  ;;  %v7270_v50 = vld [vmem:[#allocation17_spill] sm:$0xff] }
 0x59e   : > { %v1455_v42 = vpop.permute.xlu1 %1454  ;;  %v1599_v33 = vpop.permute.xlu0 %1598 }
 0x59f   : > { %v1457_v9 = vsel %vm857_vm6, %v1451_v44, %v1455_v42  ;;  %v1459_v27 = vsel %vm857_vm6, %v1455_v42, %v1451_v44  ;;  %v1569_v44 = vsel %vm1005_vm8, %v5574_v38, %v1567_v23  ;;  %v1603_v54 = vsel %vm1049_vm9, %v1599_v33, %v5576_v62 }
 0x5a0   : > { %v1470_v58 = vmul.f32 %v5534_v36, %v1459_v27  ;;  %v1471_v28 = vmul.f32 %v5534_v36, %v1457_v9  ;;  %v1550_v36 = vmul.f32 %v5556_v14, %v1537_v22  ;;  %v1582_v5 = vmul.f32 %v5558_v51, %v1569_v44  ;;  %v7265_v27 = vld [vmem:[#allocation10_spill] sm:$0xff] }
 0x5a1   : > { %v1601_v14 = vsel %vm1049_vm9, %v5576_v62, %v1599_v33  ;;  %v1615_v1 = vmul.f32 %v5564_v25, %v1603_v54  ;;  %v1549_v9 = vmul.f32 %v5553_v10, %v1538_v53  ;;  %v1568_v43 = vsel %vm1005_vm8, %v7265_v27, %v5602_v40  ;;  %v7266_v22 = vld [vmem:[#allocation14_spill] sm:$0xff] }
 0x5a2   : > { %v1474_v45 = vmul.f32 %v1470_v58, %v5240_v39  ;;  %v1475_v48 = vmul.f32 %v1471_v28, %v5242_v57  ;;  %v1503_v12 = vpop.permute.xlu1 %1502  ;;  %v1554_v51 = vmul.f32 %v1550_v36, %v5202_v20  ;;  %v1614_v42 = vmul.f32 %v5564_v25, %v1601_v14  ;;  %v7267_v25 = vld [vmem:[#allocation15_spill] sm:$0xff] }
 0x5a3   : > { %v1505_v11 = vsel %vm917_vm7, %v1499_v3, %v1503_v12  ;;  %v1507_v47 = vsel %vm917_vm7, %v1503_v12, %v1499_v3  ;;  %v1586_v63 = vmul.f32 %v1582_v5, %v7266_v22  ;;  %v1587_v58 = vmul.f32 %v1583_v49, %v7267_v25 }
 0x5a4   : > { %v1478_v55 = vadd.f32 %v1474_v45, %v1446_v41  ;;  %v1479_v52 = vadd.f32 %v1475_v48, %v1447_v0  ;;  %v1518_v38 = vmul.f32 %v5551_v37, %v1505_v11  ;;  %v1519_v46 = vmul.f32 %v5551_v37, %v1507_v47  ;;  %v7268_v41 = vld [vmem:[#allocation18_spill] sm:$0xff]  ;;  %v7269_v0 = vld [vmem:[#allocation16_spill] sm:$0xff] }
 0x5a5   : > { %v1493_v37 = vadd.f32 %v5596_v32, %v1477_v26  ;;  %v1570_v32 = vsel %vm1005_vm8, %v5602_v40, %v7265_v27  ;;  %v1618_v44 = vmul.f32 %v1614_v42, %v7269_v0  ;;  %v1619_v40 = vmul.f32 %v1615_v1, %v7270_v50 }
 0x5a6   : > { %v1494_v23 = vadd.f32 %v1490_v34, %v1478_v55  ;;  %v1495_v3 = vadd.f32 %v1491_v59, %v1479_v52  ;;  %v1522_v16 = vmul.f32 %v1518_v38, %v5245_v18  ;;  %v1523_v6 = vmul.f32 %v1519_v46, %v5247_v19  ;;  %v1597_v34 = vpop.permute.xlu1 %1596 }
 0x5a7   : > { %v1548_v59 = vmul.f32 %v5553_v10, %v1536_v4  ;;  %v1525_v26 = vadd.f32 %v1521_v30, %v1493_v37  ;;  %v1524_v4 = vadd.f32 %v1520_v61, %v1492_v24  ;;  %v1600_v10 = vsel %vm1049_vm9, %v7268_v41, %v1597_v34  ;;  %v7271_v30 = vld [vmem:[#allocation11_spill] sm:$0xff] }
 0x5a8   : > { %v1526_v8 = vadd.f32 %v1522_v16, %v1494_v23  ;;  %v1527_v62 = vadd.f32 %v1523_v6, %v1495_v3  ;;  %v1602_v53 = vsel %vm1049_vm9, %v1597_v34, %v7268_v41  ;;  %v1553_v12 = vmul.f32 %v1549_v9, %v5209_v21 }
 0x5a9   : > { %v1552_v48 = vmul.f32 %v1548_v59, %v5202_v20  ;;  %v1580_v61 = vmul.f32 %v7271_v30, %v1568_v43  ;;  %v1581_v36 = vmul.f32 %v7271_v30, %v1570_v32  ;;  %v1612_v11 = vmul.f32 %v7272_v56, %v1600_v10 }
 0x5aa   : > { %v1558_v28 = vadd.f32 %v1554_v51, %v1526_v8  ;;  %v1559_v17 = vadd.f32 %v1555_v2, %v1527_v62  ;;  %v1613_v47 = vmul.f32 %v7272_v56, %v1602_v53  ;;  %v1557_v5 = vadd.f32 %v1553_v12, %v1525_v26  ;;  %v4172_v56 = vld [vmem:[%s7082_s8 + $0x8] sm:$0xff] }
 0x5ab   : > { %v1556_v46 = vadd.f32 %v1552_v48, %v1524_v4  ;;  %v1584_v54 = vmul.f32 %v1580_v61, %v7266_v22  ;;  %v1585_v23 = vmul.f32 %v1581_v36, %v7267_v25  ;;  %v1616_v3 = vmul.f32 %v1612_v11, %v7269_v0 }
 0x5ac   : > { %v1590_v33 = vadd.f32 %v1586_v63, %v1558_v28  ;;  %v1591_v45 = vadd.f32 %v1587_v58, %v1559_v17  ;;  %v1617_v16 = vmul.f32 %v1613_v47, %v7270_v50  ;;  %v7273_v11 = vmov 0.0   ;;  %v418_v47 = vld [vmem:[%s7224_s2 + $0x10] sm:$0xff] }
 0x5ad   : > { %v1589_v51 = vadd.f32 %v1585_v23, %v1557_v5  ;;  %v1588_v2 = vadd.f32 %v1584_v54, %v1556_v46  ;;  %4151 = vmatmul.mubr.msk.f32.gmra.mrb[4].mxu0 %vm437_vm0, %v418_v47  ;;  %v7276_v46 = vmov 4   ;;  %v7277_v5 = vmov 5  }
 0x5ae   : > { %v1622_v55 = vadd.f32 %v1618_v44, %v1590_v33  ;;  %v1623_v52 = vadd.f32 %v1619_v40, %v1591_v45  ;;  %1852 = vmatprep.mubr.f32.mxu0 %v7273_v11  ;;  %v7280_v54 = vmov 8   ;;  %v7281_v23 = vmov 0  }
 0x5af   : > { %v1635_v38 = vpop.permute.xlu0 %1634  ;;  %v1621_v1 = vadd.f32 %v1617_v16, %v1589_v51  ;;  %v1620_v8 = vadd.f32 %v1616_v3, %v1588_v2 }
 0x5b0   : > { %v1639_v49 = vadd.f32 %v1635_v38, %v1622_v55  ;;  %v1640_v14 = vadd.f32 %v1635_v38, %v1623_v52  ;;  %v4182_v55 = vld [vmem:[%s7080_s6 + $0x28] sm:$0xff]  ;;  %v7274_v52 = vmov 3  }
 0x5b1   : > { %1975 = vperm.xlu1 %4363, %v4182_v55   ;;  %1943 = vperm.xlu0 %4362, %v4182_v55   ;;  %v7275_v38 = vld [vmem:[#allocation13_spill] sm:$0xff] }
 0x5b2   : > { %v1643_v6 = vsub.f32 0.0, %v1639_v49  ;;  %v1644_v37 = vsub.f32 0.0, %v1640_v14 }
 0x5b4   : > { %v1649_v24 = vmul.f32 1.442695, %v1643_v6  ;;  %v1651_v42 = vmul.f32 1.442695, %v1644_v37 }
 0x5b5   : > { %4365 = vset.pattern.permute.xlu1 %v7274_v52  ;;  %4364 = vset.pattern.permute.xlu0 %v7274_v52 }
 0x5b6   : > { %4498 = vpow2.f32 %v1649_v24  ;;  %2007 = vperm.xlu1 %4365, %v4182_v55   ;;  %2003 = vperm.xlu0 %4364, %v7275_v38  }
 0x5b7   : > { %v1630_v62 = vpop.permute.xlu1 %1629  ;;  %4500 = vpow2.f32 %v1651_v42 }
 0x5b8   : > { %v1637_v34 = vadd.f32 %v1630_v62, %v1620_v8  ;;  %v1638_v59 = vadd.f32 %v1630_v62, %v1621_v1 }
 0x5ba   : > { %v1641_v9 = vsub.f32 0.0, %v1637_v34  ;;  %v1642_v27 = vsub.f32 0.0, %v1638_v59  ;;  %4366 = vset.pattern.permute.xlu1 %v7276_v46  ;;  %4367 = vset.pattern.permute.xlu0 %v7276_v46 }
 0x5bb   : > { %2023 = vperm.xlu1 %4366, %v7275_v38   ;;  %2027 = vperm.xlu0 %4367, %v4182_v55   ;;  %v1676_v3 = vpop.permute.xlu1 %1675 }
 0x5bc   : > { %v1645_v43 = vmul.f32 1.442695, %v1641_v9  ;;  %v1647_v32 = vmul.f32 1.442695, %v1642_v27 }
 0x5be   : > { %4502 = vpow2.f32 %v1645_v43 }
 0x5bf   : > { %4504 = vpow2.f32 %v1647_v32  ;;  %4368 = vset.pattern.permute.xlu1 %v7277_v5 }
 0x5c0   : > { %v4499_v63 = vpop.eup %4498  ;;  %2051 = vperm.xlu1 %4368, %v7275_v38  }
 0x5c1   : > { %v4501_v58 = vpop.eup %4500  ;;  %v1655_v28 = vadd.f32 1.0, %v4499_v63  ;;  %v4175_v63 = vld [vmem:[%s7078_s4 + $0x20] sm:$0xff] }
 0x5c2   : > { %v1656_v17 = vadd.f32 1.0, %v4501_v58  ;;  %v4176_v58 = vld [vmem:[%s7078_s4 + $0x28] sm:$0xff] }
 0x5c3   : > { %4506 = vrcp.f32 %v1655_v28 }
 0x5c4   : > { %4508 = vrcp.f32 %v1656_v17  ;;  %2055 = vperm.xlu1 %4368, %v4182_v55  }
 0x5c8   : > { %v4503_v26 = vpop.eup %4502 }
 0x5c9   : > { %v4505_v4 = vpop.eup %4504  ;;  %v1653_v41 = vadd.f32 1.0, %v4503_v26  ;;  %v1775_v26 = vpop.permute.xlu1 %1774 }
 0x5ca   : > { %v1654_v10 = vadd.f32 1.0, %v4505_v4 }
 0x5cb   : > { %4510 = vrcp.f32 %v1653_v41 }
 0x5cc   : > { %4512 = vrcp.f32 %v1654_v10 }
 0x5cd   : > { %v4507_v53 = vpop.eup %4506 }
 0x5ce   : > { %v4509_v44 = vpop.eup %4508  ;;  %v1667_v45 = vmul.f32 %v4507_v53, %v1639_v49  ;;  %v7278_v49 = vmov 6  }
 0x5cf   : > { %v1668_v12 = vmul.f32 %v4509_v44, %v1640_v14  ;;  %4369 = vset.pattern.permute.xlu0 %v7278_v49  ;;  %v7279_v14 = vmov 7   ;;  %4370 = vset.pattern.permute.xlu1 %v7278_v49 }
 0x5d0   : > { %2083 = vperm.xlu0 %4369, %v7275_v38   ;;  %2087 = vperm.xlu1 %4370, %v4182_v55  }
 0x5d4   : > { %4372 = vset.pattern.permute.xlu0 %v7279_v14  ;;  %4371 = vset.pattern.permute.xlu1 %v7279_v14 }
 0x5d5   : > { %v4511_v40 = vpop.eup %4510  ;;  %2119 = vperm.xlu0 %4372, %v4182_v55   ;;  %2115 = vperm.xlu1 %4371, %v7275_v38  }
 0x5d6   : > { %v4513_v33 = vpop.eup %4512  ;;  %v1665_v48 = vmul.f32 %v4511_v40, %v1637_v34  ;;  %v1780_v40 = vpop.permute.xlu0 %1779 }
 0x5d7   : > { %v1666_v30 = vmul.f32 %v4513_v33, %v1638_v59 }
 0x5d8   : > { %v4246_v61 = vpack.c.bf16 %v1667_v45, %v1665_v48 }
 0x5d9   : > { %v4244_v36 = vpack.c.bf16 %v1668_v12, %v1666_v30  ;;  %4373 = vset.pattern.permute.xlu0 %v7280_v54  ;;  %4375 = vset.pattern.permute.xlu1 %v7280_v54 }
 0x5da   : > { %2147 = vperm.xlu0 %4373, %v7275_v38   ;;  %2151 = vperm.xlu1 %4375, %v4182_v55  }
 0x5db   : > { %4245 = vmatprep.subr.bf16.mxu1 %v4244_v36 }
 0x5dc   : > { %4247 = vmatpush1.bf16.msra.mxu1 %v4246_v61 }
 0x5de   : > { %4374 = vset.pattern.permute.xlu0 %v7281_v23  ;;  %4376 = vset.pattern.permute.xlu1 %v7281_v23 }
 0x5df   : > { %4174 = vmatmul.mubr.msk.f32.vlgmr.msra.gmra.mrb[10].mxu1 %vm437_vm0, %v4172_v56  ;;  %1915 = vperm.xlu0 %4374, %v4182_v55  }
 0x5e0   : > { %2287 = vmatprep.mubr.f32.mxu1 %v7273_v11 }
 0x680   : > { %v5776_v28 = vpop.f32.mrb[4].mxu0 }
 0x681   : > { %7282 = vst [vmem:[#allocation10_spill] sm:$0xff] %v5776_v28  ;;  %v5778_v17 = vpop.f32.mrb[5].mxu0 }
 0x682   : > { %7283 = vst [vmem:[#allocation18_spill] sm:$0xff] %v5778_v17 }
 0x6b2   : > { %v1747_v16 = vpop.f32.mrb[10].mxu1 }
 0x6b3   : > { %v1748_v6 = vadd.f32 %v1747_v16, %v1676_v3  ;;  %v1749_v37 = vpop.f32.mrb[11].mxu1 }
 0x6b4   : > { %v1750_v24 = vadd.f32 %v1749_v37, %v1676_v3 }
 0x6b5   : > { %v1752_v51 = vsub.f32 0.0, %v1748_v6 }
 0x6b6   : > { %v1753_v2 = vsub.f32 0.0, %v1750_v24 }
 0x6b7   : > { %v1754_v42 = vmul.f32 1.442695, %v1752_v51 }
 0x6b8   : > { %v1756_v1 = vmul.f32 1.442695, %v1753_v2 }
 0x6b9   : > { %4514 = vpow2.f32 %v1754_v42 }
 0x6ba   : > { %4516 = vpow2.f32 %v1756_v1 }
 0x6c3   : > { %v4515_v8 = vpop.eup %4514 }
 0x6c4   : > { %v4517_v62 = vpop.eup %4516  ;;  %v1758_v34 = vadd.f32 1.0, %v4515_v8 }
 0x6c5   : > { %v1759_v59 = vadd.f32 1.0, %v4517_v62 }
 0x6c6   : > { %4518 = vrcp.f32 %v1758_v34 }
 0x6c7   : > { %4520 = vrcp.f32 %v1759_v59 }
 0x6d0   : > { %v4519_v9 = vpop.eup %4518 }
 0x6d1   : > { %v4521_v27 = vpop.eup %4520  ;;  %v1764_v32 = vmul.f32 %v4519_v9, %v1748_v6 }
 0x6d2   : > { %v1765_v43 = vmul.f32 %v4521_v27, %v1750_v24 }
 0x6d4   : > { %1788 = vmatprep.subr.mxu0 %v1765_v43 }
 0x6d5   : > { %1789 = vmatpush1.msra.mxu0 %v1764_v32  ;;  %v5840_v32 = vpop.permute.xlu1 %1910 }
 0x6d6   : > { %4179 = vmatmul.mubr.msk.f32.vlgmr.msra.gmra.mrb[6].mxu0 %vm603_vm1, %v4175_v63 }
 0x6d7   : > { %1858 = vmatprep.mubr.f32.mxu0 %v7273_v11 }
 0x6d9   : > { %v5846_v63 = vpop.permute.xlu1 %1939 }
 0x6da   : > { %4180 = vmatmul.mubr.msk.f32.gmra.mrb[8].mxu0 %vm603_vm1, %v4176_v58  ;;  %v4184_v58 = vld [vmem:[%s7081_s7 + $0x28] sm:$0xff] }
 0x6db   : > { %2831 = vmatprep.mubr.f32.mxu0 %v7273_v11 }
 0x7a9   : > { %v1854_v4 = vpop.f32.mrb[6].mxu0 }
 0x7aa   : > { %v1855_v41 = vadd.f32 %v1854_v4, %v1775_v26  ;;  %v1856_v10 = vpop.f32.mrb[7].mxu0  ;;  %v5860_v4 = vpop.permute.xlu1 %1971 }
 0x7ab   : > { %v1857_v53 = vadd.f32 %v1856_v10, %v1775_v26  ;;  %v4190_v26 = vld [vmem:[%s7079_s5 + $0x30] sm:$0xff] }
 0x7ac   : > { %v1865_v44 = vsub.f32 0.0, %v1855_v41 }
 0x7ad   : > { %v1866_v33 = vsub.f32 0.0, %v1857_v53  ;;  %v1860_v45 = vpop.f32.mrb[8].mxu0 }
 0x7ae   : > { %v1869_v48 = vmul.f32 1.442695, %v1865_v44  ;;  %v1861_v12 = vadd.f32 %v1860_v45, %v1780_v40  ;;  %v1862_v30 = vpop.f32.mrb[9].mxu0  ;;  %v5867_v10 = vpop.permute.xlu1 %1975  ;;  %v421_v44 = vld [vmem:[%s7077_s3 + $0x10] sm:$0xff] }
 0x7af   : > { %v1871_v61 = vmul.f32 1.442695, %v1866_v33  ;;  %v1863_v6 = vadd.f32 %v1862_v30, %v1780_v40  ;;  %v4186_v40 = vld [vmem:[%s7083_s9 + $0x10] sm:$0xff]  ;;  %v5876_v33 = vpop.permute.xlu0 %1943 }
 0x7b0   : > { %4522 = vpow2.f32 %v1869_v48  ;;  %v1867_v36 = vsub.f32 0.0, %v1861_v12  ;;  %v4191_v48 = vld [vmem:[%s7079_s5 + $0x38] sm:$0xff] }
 0x7b1   : > { %4524 = vpow2.f32 %v1871_v61  ;;  %v1868_v24 = vsub.f32 0.0, %v1863_v6  ;;  %v5886_v61 = vld [vmem:[%s7080_s6 + $0x38] sm:$0xff] }
 0x7b2   : > { %v1873_v56 = vmul.f32 1.442695, %v1867_v36  ;;  %v5878_v45 = vpop.permute.xlu1 %2007  ;;  %7285 = vst [vmem:[#allocation11_spill] sm:$0xff] %v5886_v61 }
 0x7b3   : > { %v1875_v1 = vmul.f32 1.442695, %v1868_v24 }
 0x7b4   : > { %4526 = vpow2.f32 %v1873_v56 }
 0x7b6   : > { %v2024_v30 = vpop.permute.xlu1 %2023 }
 0x7ba   : > { %v4523_v47 = vpop.eup %4522  ;;  %v5889_v36 = vpop.permute.xlu1 %2051 }
 0x7bb   : > { %v4525_v55 = vpop.eup %4524  ;;  %v1877_v38 = vadd.f32 1.0, %v4523_v47 }
 0x7bc   : > { %v1878_v3 = vadd.f32 1.0, %v4525_v55 }
 0x7bd   : > { %4528 = vrcp.f32 %v1877_v38  ;;  %v7286_v38 = vmov 2  }
 0x7be   : > { %4530 = vrcp.f32 %v1878_v3  ;;  %v4527_v16 = vpop.eup %4526  ;;  %v5897_v55 = vpop.permute.xlu1 %2055 }
 0x7bf   : > { %v1879_v37 = vadd.f32 1.0, %v4527_v16 }
 0x7c1   : > { %4532 = vrcp.f32 %v1879_v37 }
 0x7c2   : > { %4534 = vpow2.f32 %v1875_v1  ;;  %v5902_v16 = vpop.permute.xlu1 %2087 }
 0x7c6   : > { %v5906_v37 = vpop.permute.xlu1 %2115 }
 0x7c7   : > { %v4529_v51 = vpop.eup %4528  ;;  %7288 = vst [vmem:[#allocation13_spill] sm:$0xff] %v5906_v37 }
 0x7c8   : > { %v5780_v2 = vmul.f32 %v4529_v51, %v1855_v41  ;;  %v4531_v42 = vpop.eup %4530  ;;  %v4183_v41 = vld [vmem:[%s7081_s7 + $0x20] sm:$0xff] }
 0x7c9   : > { %v5786_v8 = vmul.f32 %v4531_v42, %v1857_v53  ;;  %v7284_v53 = vmov 1  }
 0x7ca   : > { %1990 = vrot.lane.b32.xlu0 %v5780_v2, %s7227_s19  ;;  %1896 = vrot.lane.b32.xlu1 %v5780_v2, %s7253_s29  ;;  %v5908_v51 = vpop.permute.xlu1 %2151  ;;  %v5937_v0 = vmul.f32 %v2024_v30, %v5780_v2 }
 0x7cb   : > { %v4533_v62 = vpop.eup %4532 }
 0x7cc   : > { %v5796_v34 = vmul.f32 %v4533_v62, %v1861_v12  ;;  %v4535_v59 = vpop.eup %4534  ;;  %v2004_v12 = vpop.permute.xlu0 %2003 }
 0x7cd   : > { %v1880_v9 = vadd.f32 1.0, %v4535_v59 }
 0x7ce   : > { %1994 = vrot.lane.b32.xlu0 %v5786_v8, %s7227_s19  ;;  %1926 = vrot.lane.b32.xlu1 %v5780_v2, %s7254_s18 }
 0x7cf   : > { %4536 = vrcp.f32 %v1880_v9 }
 0x7d0   : > { %v5891_v56 = vpop.permute.xlu0 %2027 }
 0x7d2   : > { %2042 = vrot.lane.b32.xlu0 %v5786_v8, %s7228_s16  ;;  %1958 = vrot.lane.b32.xlu1 %v5780_v2, %s7255_s17 }
 0x7d4   : > { %v5895_v47 = vpop.permute.xlu0 %2083 }
 0x7d6   : > { %1898 = vrot.lane.b32.xlu0 %v5796_v34, %s7253_s29  ;;  %2038 = vrot.lane.b32.xlu1 %v5780_v2, %s7228_s16 }
 0x7d8   : > { %v5900_v3 = vpop.permute.xlu0 %2119 }
 0x7d9   : > { %v4537_v27 = vpop.eup %4536 }
 0x7da   : > { %1928 = vrot.lane.b32.xlu0 %v5796_v34, %s7254_s18  ;;  %2070 = vrot.lane.b32.xlu1 %v5780_v2, %s7256_s26  ;;  %v5822_v43 = vmul.f32 %v4537_v27, %v1863_v6 }
 0x7dc   : > { %v5904_v6 = vpop.permute.xlu0 %2147 }
 0x7dd   : > { %7287 = vst [vmem:[#allocation12_spill] sm:$0xff] %v5904_v6 }
 0x7de   : > { %1960 = vrot.lane.b32.xlu0 %v5796_v34, %s7255_s17  ;;  %2102 = vrot.lane.b32.xlu1 %v5780_v2, %s7257_s28 }
 0x7e0   : > { %v1916_v24 = vpop.permute.xlu0 %1915 }
 0x7e2   : > { %2072 = vrot.lane.b32.xlu0 %v5796_v34, %s7256_s26  ;;  %2134 = vrot.lane.b32.xlu1 %v5780_v2, %s7153_s20 }
 0x7e6   : > { %2104 = vrot.lane.b32.xlu0 %v5796_v34, %s7257_s28  ;;  %1900 = vrot.lane.b32.xlu1 %v5786_v8, %s7253_s29 }
 0x7ea   : > { %2136 = vrot.lane.b32.xlu0 %v5796_v34, %s7153_s20  ;;  %1930 = vrot.lane.b32.xlu1 %v5786_v8, %s7254_s18 }
 0x7ee   : > { %1902 = vrot.lane.b32.xlu0 %v5822_v43, %s7253_s29  ;;  %1962 = vrot.lane.b32.xlu1 %v5786_v8, %s7255_s17 }
 0x7f2   : > { %1932 = vrot.lane.b32.xlu0 %v5822_v43, %s7254_s18  ;;  %2074 = vrot.lane.b32.xlu1 %v5786_v8, %s7256_s26 }
 0x7f6   : > { %1964 = vrot.lane.b32.xlu0 %v5822_v43, %s7255_s17  ;;  %2106 = vrot.lane.b32.xlu1 %v5786_v8, %s7257_s28 }
 0x7fa   : > { %2076 = vrot.lane.b32.xlu0 %v5822_v43, %s7256_s26  ;;  %1992 = vrot.lane.b32.xlu1 %v5796_v34, %s7227_s19 }
 0x7fe   : > { %2108 = vrot.lane.b32.xlu0 %v5822_v43, %s7257_s28  ;;  %2040 = vrot.lane.b32.xlu1 %v5796_v34, %s7228_s16 }
 0x802   : > { %2140 = vrot.lane.b32.xlu0 %v5822_v43, %s7153_s20  ;;  %1996 = vrot.lane.b32.xlu1 %v5822_v43, %s7227_s19 }
 0x806   : > { %2176 = vperm.xlu0 %4374, %v4184_v58   ;;  %2044 = vrot.lane.b32.xlu1 %v5822_v43, %s7228_s16 }
 0x80a   : > { %2318 = vperm.xlu0 %4374, %v4190_v26   ;;  %2138 = vrot.lane.b32.xlu1 %v5786_v8, %s7153_s20 }
 0x80e   : > { %2171 = vperm.xlu1 %4376, %v4183_v41   ;;  %4377 = vset.pattern.permute.xlu0 %v7284_v53 }
 0x812   : > { %434 = vperm.xlu1 %4376, %v421_v44  }
 0x816   : > { %2217 = vperm.xlu1 %4376, %v4186_v40  }
 0x81a   : > { %2323 = vperm.xlu1 %4376, %v4191_v48  }
 0x81e   : > { %2459 = vperm.xlu1 %4376, %v5886_v61  }
 0x822   : > { %4378 = vset.pattern.permute.xlu1 %v7284_v53 }
 0x823   : > { %2487 = vperm.xlu1 %4378, %v5886_v61  }
 0x827   : > { %4379 = vset.pattern.permute.xlu1 %v7286_v38 }
 0x83c   : > { %v1991_v42 = vpop.permute.xlu0 %1990  ;;  %v1897_v1 = vpop.permute.xlu1 %1896 }
 0x840   : > { %v1995_v62 = vpop.permute.xlu0 %1994  ;;  %v1927_v59 = vpop.permute.xlu1 %1926 }
 0x841   : > { %v1998_v52 = vsel %vm857_vm6, %v1991_v42, %v1995_v62  ;;  %v2000_v38 = vsel %vm857_vm6, %v1995_v62, %v1991_v42 }
 0x842   : > { %v2011_v22 = vmul.f32 %v2004_v12, %v1998_v52 }
 0x844   : > { %v2043_v9 = vpop.permute.xlu0 %2042  ;;  %v1959_v27 = vpop.permute.xlu1 %1958 }
 0x848   : > { %v1899_v58 = vpop.permute.xlu0 %1898  ;;  %v2039_v26 = vpop.permute.xlu1 %2038 }
 0x84c   : > { %v1929_v41 = vpop.permute.xlu0 %1928  ;;  %v5910_v44 = vpop.permute.xlu1 %2070 }
 0x850   : > { %v1961_v40 = vpop.permute.xlu0 %1960  ;;  %v5912_v48 = vpop.permute.xlu1 %2102 }
 0x851   : > { %7289 = vst [vmem:[#allocation19_spill] sm:$0xff] %v5912_v48 }
 0x854   : > { %v5914_v53 = vpop.permute.xlu0 %2072  ;;  %v5916_v17 = vpop.permute.xlu1 %2134 }
 0x855   : > { %7290 = vst [vmem:[#allocation20_spill] sm:$0xff] %v5916_v17  ;;  %v5940_v17 = vmul.f32 %v2024_v30, %v5786_v8 }
 0x858   : > { %v5918_v28 = vpop.permute.xlu0 %2104  ;;  %v1901_v23 = vpop.permute.xlu1 %1900 }
 0x859   : > { %v1904_v37 = vsel %vm727_vm2, %v1897_v1, %v1901_v23  ;;  %v1906_v50 = vsel %vm727_vm2, %v1901_v23, %v1897_v1 }
 0x85a   : > { %v1918_v2 = vmul.f32 %v5840_v32, %v1906_v50  ;;  %v1919_v8 = vmul.f32 %v5840_v32, %v1904_v37  ;;  %v2046_v50 = vsel %vm917_vm7, %v2039_v26, %v2043_v9  ;;  %v2048_v32 = vsel %vm917_vm7, %v2043_v9, %v2039_v26 }
 0x85c   : > { %v5920_v54 = vpop.permute.xlu0 %2136  ;;  %v1931_v14 = vpop.permute.xlu1 %1930  ;;  %v1923_v9 = vmul.f32 %v1919_v8, %v5169_v31 }
 0x85d   : > { %v1934_v11 = vsel %vm769_vm3, %v1927_v59, %v1931_v14  ;;  %v1936_v6 = vsel %vm769_vm3, %v1931_v14, %v1927_v59  ;;  %v2010_v59 = vmul.f32 %v2004_v12, %v2000_v38 }
 0x85e   : > { %v1946_v48 = vmul.f32 %v5846_v63, %v1936_v6  ;;  %v1947_v23 = vmul.f32 %v5846_v63, %v1934_v11 }
 0x860   : > { %v1903_v49 = vpop.permute.xlu0 %1902  ;;  %v1963_v5 = vpop.permute.xlu1 %1962  ;;  %v1951_v37 = vmul.f32 %v1947_v23, %v5183_v60  ;;  %v2058_v23 = vmul.f32 %v5889_v36, %v2046_v50 }
 0x861   : > { %v1966_v42 = vsel %vm813_vm4, %v1959_v27, %v1963_v5  ;;  %v1968_v62 = vsel %vm813_vm4, %v1963_v5, %v1959_v27  ;;  %v1905_v5 = vsel %vm727_vm2, %v1899_v58, %v1903_v49  ;;  %v1907_v52 = vsel %vm727_vm2, %v1903_v49, %v1899_v58 }
 0x862   : > { %v1978_v12 = vmul.f32 %v5860_v4, %v1968_v62  ;;  %v1979_v11 = vmul.f32 %v5860_v4, %v1966_v42  ;;  %v1950_v49 = vmul.f32 %v1946_v48, %v5171_v13  ;;  %v1922_v58 = vmul.f32 %v1918_v2, %v5163_v29 }
 0x863   : > { %v1920_v26 = vmul.f32 %v1916_v24, %v1907_v52  ;;  %v2032_v62 = vmul.f32 %v5891_v56, %v5796_v34  ;;  %v2059_v2 = vmul.f32 %v5889_v36, %v2048_v32  ;;  %v2014_v52 = vmul.f32 %v2010_v59, %v5240_v39 }
 0x864   : > { %v1933_v46 = vpop.permute.xlu0 %1932  ;;  %v5922_v61 = vpop.permute.xlu1 %2074  ;;  %v1982_v42 = vmul.f32 %v1978_v12, %v5211_v7  ;;  %v2062_v32 = vmul.f32 %v2058_v23, %v5245_v18 }
 0x865   : > { %v1935_v30 = vsel %vm769_vm3, %v1929_v41, %v1933_v46  ;;  %v1937_v1 = vsel %vm769_vm3, %v1933_v46, %v1929_v41  ;;  %v1921_v41 = vmul.f32 %v1916_v24, %v1905_v5  ;;  %v1954_v24 = vadd.f32 %v1950_v49, %v1922_v58 }
 0x866   : > { %v1948_v4 = vmul.f32 %v5876_v33, %v1937_v1  ;;  %v1949_v27 = vmul.f32 %v5876_v33, %v1935_v30  ;;  %v2033_v33 = vmul.f32 %v5891_v56, %v5822_v43  ;;  %v1955_v30 = vadd.f32 %v1951_v37, %v1923_v9 }
 0x867   : > { %v1924_v34 = vmul.f32 %v1920_v26, %v5163_v29  ;;  %v1925_v12 = vmul.f32 %v1921_v41, %v5169_v31  ;;  %v1986_v56 = vadd.f32 %v1982_v42, %v1954_v24  ;;  %v2080_v59 = vsel %vm961_vm5, %v5922_v61, %v5910_v44 }
 0x868   : > { %v1965_v25 = vpop.permute.xlu0 %1964  ;;  %v5946_v14 = vpop.permute.xlu1 %2106  ;;  %v1952_v1 = vmul.f32 %v1948_v4, %v5171_v13  ;;  %v1953_v5 = vmul.f32 %v1949_v27, %v5183_v60 }
 0x869   : > { %v1967_v63 = vsel %vm813_vm4, %v1961_v40, %v1965_v25  ;;  %v1969_v46 = vsel %vm813_vm4, %v1965_v25, %v1961_v40  ;;  %v1983_v25 = vmul.f32 %v1979_v11, %v5213_v15 }
 0x86a   : > { %v1980_v40 = vmul.f32 %v5867_v10, %v1969_v46  ;;  %v1981_v48 = vmul.f32 %v5867_v10, %v1967_v63  ;;  %v2015_v10 = vmul.f32 %v2011_v22, %v5242_v57  ;;  %v2063_v63 = vmul.f32 %v2059_v2, %v5247_v19 }
 0x86b   : > { %v1987_v11 = vadd.f32 %v1983_v25, %v1955_v30  ;;  %v2078_v22 = vsel %vm961_vm5, %v5910_v44, %v5922_v61  ;;  %v1956_v49 = vadd.f32 %v1952_v1, %v1924_v34  ;;  %v1957_v37 = vadd.f32 %v1953_v5, %v1925_v12 }
 0x86c   : > { %v2077_v38 = vpop.permute.xlu0 %2076  ;;  %v1993_v6 = vpop.permute.xlu1 %1992  ;;  %v1984_v36 = vmul.f32 %v1980_v40, %v5211_v7  ;;  %v1985_v50 = vmul.f32 %v1981_v48, %v5213_v15  ;;  %v2018_v44 = vadd.f32 %v2014_v52, %v1986_v56 }
 0x86d   : > { %v2079_v58 = vsel %vm961_vm5, %v5914_v53, %v2077_v38  ;;  %v2081_v9 = vsel %vm961_vm5, %v2077_v38, %v5914_v53  ;;  %v2019_v41 = vadd.f32 %v2015_v10, %v1987_v11 }
 0x86e   : > { %v1988_v42 = vadd.f32 %v1984_v36, %v1956_v49  ;;  %v1989_v25 = vadd.f32 %v1985_v50, %v1957_v37  ;;  %v2093_v2 = vmul.f32 %v5902_v16, %v2081_v9  ;;  %v2034_v36 = vadd.f32 %v5937_v0, %v2018_v44 }
 0x870   : > { %v2041_v8 = vpop.permute.xlu1 %2040  ;;  %v2109_v43 = vpop.permute.xlu0 %2108  ;;  %v2097_v50 = vmul.f32 %v2093_v2, %v5209_v21  ;;  %v7298_v2 = vld [vmem:[#allocation12_spill] sm:$0xff] }
 0x871   : > { %v2113_v40 = vsel %vm1005_vm8, %v2109_v43, %v5918_v28 }
 0x872   : > { %v2125_v34 = vmul.f32 %v5900_v3, %v2113_v40  ;;  %v7296_v40 = vld [vmem:[#allocation17_spill] sm:$0xff] }
 0x874   : > { %v1997_v46 = vpop.permute.xlu1 %1996  ;;  %v2141_v48 = vpop.permute.xlu0 %2140 }
 0x875   : > { %v1999_v4 = vsel %vm857_vm6, %v1993_v6, %v1997_v46  ;;  %v2001_v27 = vsel %vm857_vm6, %v1997_v46, %v1993_v6  ;;  %v2111_v6 = vsel %vm1005_vm8, %v5918_v28, %v2109_v43  ;;  %v2145_v12 = vsel %vm1049_vm9, %v2141_v48, %v5920_v54 }
 0x876   : > { %v2012_v26 = vmul.f32 %v5878_v45, %v2001_v27  ;;  %v2013_v61 = vmul.f32 %v5878_v45, %v1999_v4  ;;  %v2092_v45 = vmul.f32 %v5902_v16, %v2079_v58  ;;  %v2124_v10 = vmul.f32 %v5900_v3, %v2111_v6  ;;  %v7291_v27 = vld [vmem:[#allocation19_spill] sm:$0xff]  ;;  %v7292_v58 = vld [vmem:[#allocation14_spill] sm:$0xff] }
 0x877   : > { %v2143_v16 = vsel %vm1049_vm9, %v5920_v54, %v2141_v48  ;;  %v2157_v49 = vmul.f32 %v5908_v51, %v2145_v12  ;;  %v2091_v4 = vmul.f32 %v5895_v47, %v2080_v59  ;;  %v2110_v0 = vsel %vm1005_vm8, %v7291_v27, %v5946_v14 }
 0x878   : > { %v2016_v23 = vmul.f32 %v2012_v26, %v5240_v39  ;;  %v2017_v53 = vmul.f32 %v2013_v61, %v5242_v57  ;;  %v2045_v38 = vpop.permute.xlu1 %2044  ;;  %v2096_v3 = vmul.f32 %v2092_v45, %v5202_v20  ;;  %v2156_v46 = vmul.f32 %v5908_v51, %v2143_v16  ;;  %v7293_v51 = vld [vmem:[#allocation15_spill] sm:$0xff] }
 0x879   : > { %v2047_v24 = vsel %vm917_vm7, %v2041_v8, %v2045_v38  ;;  %v2049_v30 = vsel %vm917_vm7, %v2045_v38, %v2041_v8  ;;  %v2128_v9 = vmul.f32 %v2124_v10, %v7292_v58  ;;  %v2129_v26 = vmul.f32 %v2125_v34, %v7293_v51 }
 0x87a   : > { %v2020_v1 = vadd.f32 %v2016_v23, %v1988_v42  ;;  %v2021_v5 = vadd.f32 %v2017_v53, %v1989_v25  ;;  %v2060_v28 = vmul.f32 %v5897_v55, %v2047_v24  ;;  %v2061_v52 = vmul.f32 %v5897_v55, %v2049_v30  ;;  %v7294_v42 = vld [vmem:[#allocation20_spill] sm:$0xff] }
 0x87b   : > { %v2035_v55 = vadd.f32 %v5940_v17, %v2019_v41  ;;  %v2112_v17 = vsel %vm1005_vm8, %v5946_v14, %v7291_v27  ;;  %v7295_v25 = vld [vmem:[#allocation16_spill] sm:$0xff]  ;;  %v2161_v14 = vmul.f32 %v2157_v49, %v7296_v40  ;;  %v2095_v38 = vmul.f32 %v2091_v4, %v5209_v21 }
 0x87c   : > { %v2036_v43 = vadd.f32 %v2032_v62, %v2020_v1  ;;  %v2037_v8 = vadd.f32 %v2033_v33, %v2021_v5  ;;  %v2064_v56 = vmul.f32 %v2060_v28, %v5245_v18  ;;  %v2065_v11 = vmul.f32 %v2061_v52, %v5247_v19  ;;  %v2139_v62 = vpop.permute.xlu1 %2138 }
 0x87d   : > { %v2090_v33 = vmul.f32 %v5895_v47, %v2078_v22  ;;  %v2067_v41 = vadd.f32 %v2063_v63, %v2035_v55  ;;  %v2066_v22 = vadd.f32 %v2062_v32, %v2034_v36  ;;  %v2142_v47 = vsel %vm1049_vm9, %v7294_v42, %v2139_v62  ;;  %v7297_v63 = vld [vmem:[#allocation13_spill] sm:$0xff] }
 0x87e   : > { %v2068_v37 = vadd.f32 %v2064_v56, %v2036_v43  ;;  %v2069_v54 = vadd.f32 %v2065_v11, %v2037_v8  ;;  %v2144_v59 = vsel %vm1049_vm9, %v2139_v62, %v7294_v42  ;;  %v2160_v6 = vmul.f32 %v2156_v46, %v7295_v25 }
 0x87f   : > { %v2094_v53 = vmul.f32 %v2090_v33, %v5202_v20  ;;  %v2122_v32 = vmul.f32 %v7297_v63, %v2110_v0  ;;  %v2123_v45 = vmul.f32 %v7297_v63, %v2112_v17  ;;  %v2154_v24 = vmul.f32 %v7298_v2, %v2142_v47 }
 0x880   : > { %v2100_v61 = vadd.f32 %v2096_v3, %v2068_v37  ;;  %v2101_v44 = vadd.f32 %v2097_v50, %v2069_v54  ;;  %v2155_v30 = vmul.f32 %v7298_v2, %v2144_v59  ;;  %v2099_v10 = vadd.f32 %v2095_v38, %v2067_v41  ;;  %v4185_v2 = vld [vmem:[%s7082_s8 + $0x10] sm:$0xff] }
 0x881   : > { %v2098_v52 = vadd.f32 %v2094_v53, %v2066_v22  ;;  %v2126_v12 = vmul.f32 %v2122_v32, %v7292_v58  ;;  %v2127_v43 = vmul.f32 %v2123_v45, %v7293_v51  ;;  %v2158_v8 = vmul.f32 %v2154_v24, %v7295_v25 }
 0x882   : > { %v2132_v48 = vadd.f32 %v2128_v9, %v2100_v61  ;;  %v2133_v23 = vadd.f32 %v2129_v26, %v2101_v44  ;;  %v2159_v56 = vmul.f32 %v2155_v30, %v7296_v40  ;;  %v7299_v24 = vmov 0.0   ;;  %v4194_v30 = vld [vmem:[%s7080_s6 + $0x30] sm:$0xff] }
 0x883   : > { %v2131_v3 = vadd.f32 %v2127_v43, %v2099_v10  ;;  %v2130_v50 = vadd.f32 %v2126_v12, %v2098_v52  ;;  %2483 = vperm.xlu0 %4377, %v4194_v30   ;;  %2515 = vperm.xlu1 %4379, %v4194_v30   ;;  %v7303_v52 = vmov 4   ;;  %v7304_v10 = vmov 5  }
 0x884   : > { %v2164_v1 = vadd.f32 %v2160_v6, %v2132_v48  ;;  %v2165_v5 = vadd.f32 %v2161_v14, %v2133_v23  ;;  %v7307_v12 = vmov 8   ;;  %v7308_v43 = vmov 0  }
 0x885   : > { %v2177_v28 = vpop.permute.xlu0 %2176  ;;  %v2163_v49 = vadd.f32 %v2159_v56, %v2131_v3  ;;  %v2162_v37 = vadd.f32 %v2158_v8, %v2130_v50  ;;  %v7309_v56 = vld [vmem:[#allocation10_spill] sm:$0xff] }
 0x886   : > { %v2181_v34 = vadd.f32 %v2177_v28, %v2164_v1  ;;  %v2182_v16 = vadd.f32 %v2177_v28, %v2165_v5  ;;  %v7300_v1 = vmov 2   ;;  %v7301_v5 = vmov 3   ;;  %v7302_v28 = vld [vmem:[#allocation11_spill] sm:$0xff] }
 0x887   : > { %4380 = vset.pattern.permute.xlu0 %v7300_v1  ;;  %4381 = vset.pattern.permute.xlu1 %v7301_v5 }
 0x888   : > { %v2185_v11 = vsub.f32 0.0, %v2181_v34  ;;  %v2186_v55 = vsub.f32 0.0, %v2182_v16  ;;  %2519 = vperm.xlu0 %4380, %v7302_v28   ;;  %2547 = vperm.xlu1 %4381, %v4194_v30  }
 0x88a   : > { %v2191_v36 = vmul.f32 1.442695, %v2185_v11  ;;  %v2193_v46 = vmul.f32 1.442695, %v2186_v55  ;;  %v7310_v55 = vld [vmem:[#allocation18_spill] sm:$0xff] }
 0x88c   : > { %4538 = vpow2.f32 %v2191_v36  ;;  %4382 = vset.pattern.permute.xlu0 %v7303_v52  ;;  %2551 = vperm.xlu1 %4381, %v7302_v28  }
 0x88d   : > { %v2172_v54 = vpop.permute.xlu1 %2171  ;;  %4540 = vpow2.f32 %v2193_v46  ;;  %2567 = vperm.xlu0 %4382, %v4194_v30  }
 0x88e   : > { %v2179_v62 = vadd.f32 %v2172_v54, %v2162_v37  ;;  %v2180_v33 = vadd.f32 %v2172_v54, %v2163_v49 }
 0x890   : > { %v2183_v4 = vsub.f32 0.0, %v2179_v62  ;;  %v2184_v27 = vsub.f32 0.0, %v2180_v33  ;;  %4383 = vset.pattern.permute.xlu1 %v7303_v52 }
 0x891   : > { %2571 = vperm.xlu1 %4383, %v7302_v28   ;;  %4385 = vset.pattern.permute.xlu0 %v7304_v10  ;;  %v435_v8 = vpop.permute.xlu1 %434 }
 0x892   : > { %v2187_v0 = vmul.f32 1.442695, %v2183_v4  ;;  %v2189_v17 = vmul.f32 1.442695, %v2184_v27  ;;  %2599 = vperm.xlu0 %4385, %v7302_v28   ;;  %v526_v11 = vadd.f32 %v7309_v56, %v435_v8  ;;  %v528_v36 = vadd.f32 %v7310_v55, %v435_v8  ;;  %v2319_v8 = vpop.permute.xlu0 %2318 }
 0x894   : > { %4542 = vpow2.f32 %v2187_v0  ;;  %v534_v3 = vsub.f32 0.0, %v526_v11  ;;  %v535_v50 = vsub.f32 0.0, %v528_v36 }
 0x895   : > { %4544 = vpow2.f32 %v2189_v17  ;;  %4384 = vset.pattern.permute.xlu1 %v7304_v10  ;;  %v2218_v37 = vpop.permute.xlu1 %2217 }
 0x896   : > { %v4539_v9 = vpop.eup %4538  ;;  %2595 = vperm.xlu1 %4384, %v4194_v30   ;;  %v544_v46 = vmul.f32 1.442695, %v534_v3  ;;  %v546_v49 = vmul.f32 1.442695, %v535_v50 }
 0x897   : > { %v4541_v26 = vpop.eup %4540  ;;  %v2197_v61 = vadd.f32 1.0, %v4539_v9 }
 0x898   : > { %v2198_v44 = vadd.f32 1.0, %v4541_v26 }
 0x899   : > { %4546 = vrcp.f32 %v2197_v61 }
 0x89a   : > { %4548 = vrcp.f32 %v2198_v44 }
 0x89e   : > { %v4543_v41 = vpop.eup %4542 }
 0x89f   : > { %v4545_v22 = vpop.eup %4544  ;;  %v2195_v42 = vadd.f32 1.0, %v4543_v41 }
 0x8a0   : > { %v2196_v47 = vadd.f32 1.0, %v4545_v22 }
 0x8a1   : > { %4550 = vrcp.f32 %v2195_v42 }
 0x8a2   : > { %4552 = vrcp.f32 %v2196_v47 }
 0x8a3   : > { %v4547_v59 = vpop.eup %4546  ;;  %4554 = vpow2.f32 %v544_v46 }
 0x8a4   : > { %v4549_v6 = vpop.eup %4548  ;;  %v2209_v23 = vmul.f32 %v4547_v59, %v2181_v34  ;;  %v7305_v34 = vmov 6   ;;  %4556 = vpow2.f32 %v546_v49 }
 0x8a5   : > { %v2210_v38 = vmul.f32 %v4549_v6, %v2182_v16  ;;  %4386 = vset.pattern.permute.xlu0 %v7305_v34  ;;  %4387 = vset.pattern.permute.xlu1 %v7305_v34  ;;  %v7306_v16 = vmov 7  }
 0x8a6   : > { %2627 = vperm.xlu0 %4386, %v4194_v30   ;;  %2631 = vperm.xlu1 %4387, %v7302_v28  }
 0x8aa   : > { %4389 = vset.pattern.permute.xlu0 %v7306_v16  ;;  %4388 = vset.pattern.permute.xlu1 %v7306_v16 }
 0x8ab   : > { %v4551_v14 = vpop.eup %4550  ;;  %2663 = vperm.xlu0 %4389, %v7302_v28   ;;  %2659 = vperm.xlu1 %4388, %v4194_v30  }
 0x8ac   : > { %v4553_v48 = vpop.eup %4552  ;;  %v2207_v53 = vmul.f32 %v4551_v14, %v2179_v62 }
 0x8ad   : > { %v2208_v63 = vmul.f32 %v4553_v48, %v2180_v33  ;;  %v4555_v26 = vpop.eup %4554 }
 0x8ae   : > { %v4250_v32 = vpack.c.bf16 %v2209_v23, %v2207_v53  ;;  %v4557_v61 = vpop.eup %4556  ;;  %v552_v44 = vadd.f32 1.0, %v4555_v26 }
 0x8af   : > { %v4248_v45 = vpack.c.bf16 %v2210_v38, %v2208_v63  ;;  %4390 = vset.pattern.permute.xlu0 %v7307_v12  ;;  %4392 = vset.pattern.permute.xlu1 %v7307_v12  ;;  %v553_v41 = vadd.f32 1.0, %v4557_v61 }
 0x8b0   : > { %2691 = vperm.xlu0 %4390, %v4194_v30   ;;  %2695 = vperm.xlu1 %4392, %v7302_v28   ;;  %v4189_v28 = vld [vmem:[%s7078_s4 + $0x38] sm:$0xff] }
 0x8b1   : > { %4249 = vmatprep.subr.bf16.mxu1 %v4248_v45 }
 0x8b2   : > { %4251 = vmatpush1.bf16.msra.mxu1 %v4250_v32 }
 0x8b4   : > { %4391 = vset.pattern.permute.xlu0 %v7308_v43  ;;  %4393 = vset.pattern.permute.xlu1 %v7308_v43 }
 0x8b5   : > { %4187 = vmatmul.mubr.msk.f32.vlgmr.msra.gmra.mrb[12].mxu1 %vm437_vm0, %v4185_v2  ;;  %2454 = vperm.xlu0 %4391, %v4194_v30   ;;  %v4188_v30 = vld [vmem:[%s7078_s4 + $0x30] sm:$0xff] }
 0x8b6   : > { %2396 = vmatprep.mubr.f32.mxu1 %v7299_v24 }
 0x988   : > { %v2289_v54 = vpop.f32.mrb[12].mxu1 }
 0x989   : > { %v2290_v62 = vadd.f32 %v2289_v54, %v2218_v37  ;;  %v2291_v33 = vpop.f32.mrb[13].mxu1 }
 0x98a   : > { %v2292_v4 = vadd.f32 %v2291_v33, %v2218_v37 }
 0x98b   : > { %v2294_v27 = vsub.f32 0.0, %v2290_v62 }
 0x98c   : > { %v2295_v0 = vsub.f32 0.0, %v2292_v4 }
 0x98d   : > { %v2296_v17 = vmul.f32 1.442695, %v2294_v27 }
 0x98e   : > { %v2298_v9 = vmul.f32 1.442695, %v2295_v0 }
 0x98f   : > { %4558 = vpow2.f32 %v2296_v17 }
 0x990   : > { %4560 = vpow2.f32 %v2298_v9 }
 0x991   : > { %4562 = vrcp.f32 %v552_v44 }
 0x992   : > { %4564 = vrcp.f32 %v553_v41 }
 0x999   : > { %v4559_v22 = vpop.eup %4558 }
 0x99a   : > { %v4561_v42 = vpop.eup %4560  ;;  %v2300_v47 = vadd.f32 1.0, %v4559_v22 }
 0x99b   : > { %v2301_v59 = vadd.f32 1.0, %v4561_v42  ;;  %v4563_v6 = vpop.eup %4562 }
 0x99c   : > { %4566 = vrcp.f32 %v2300_v47  ;;  %v4565_v14 = vpop.eup %4564  ;;  %v570_v53 = vmul.f32 %v4563_v6, %v526_v11 }
 0x99d   : > { %4568 = vrcp.f32 %v2301_v59  ;;  %v571_v63 = vmul.f32 %v4565_v14, %v528_v36 }
 0x9a6   : > { %v4567_v48 = vpop.eup %4566 }
 0x9a7   : > { %v4569_v23 = vpop.eup %4568  ;;  %v6109_v38 = vmul.f32 %v4567_v48, %v2290_v62  ;;  %v2324_v62 = vpop.permute.xlu1 %2323 }
 0x9a8   : > { %v6111_v32 = vmul.f32 %v4569_v23, %v2292_v4 }
 0x9a9   : > { %7311 = vst [vmem:[#allocation19_spill] sm:$0xff] %v6109_v38  ;;  %v2308_v45 = vadd.f32 %v6109_v38, %v570_v53 }
 0x9aa   : > { %7312 = vst [vmem:[#allocation20_spill] sm:$0xff] %v6111_v32  ;;  %v2309_v2 = vadd.f32 %v6111_v32, %v571_v63 }
 0x9ac   : > { %2332 = vmatprep.subr.mxu1 %v2309_v2 }
 0x9ad   : > { %2333 = vmatpush1.msra.mxu1 %v2308_v45 }
 0x9ae   : > { %4192 = vmatmul.mubr.msk.f32.vlgmr.msra.gmra.mrb[14].mxu1 %vm603_vm1, %v4188_v30  ;;  %v4197_v30 = vld [vmem:[%s7081_s7 + $0x38] sm:$0xff] }
 0x9af   : > { %2402 = vmatprep.mubr.f32.mxu1 %v7299_v24 }
 0x9b2   : > { %4193 = vmatmul.mubr.msk.f32.gmra.mrb[16].mxu1 %vm603_vm1, %v4189_v28  ;;  %v4204_v28 = vld [vmem:[%s7079_s5 + $0x48] sm:$0xff] }
 0x9b3   : > { %3373 = vmatprep.mubr.f32.mxu1 %v7299_v24 }
 0xa81   : > { %v2398_v56 = vpop.f32.mrb[14].mxu1 }
 0xa82   : > { %v2399_v11 = vadd.f32 %v2398_v56, %v2319_v8  ;;  %v2400_v55 = vpop.f32.mrb[15].mxu1 }
 0xa83   : > { %v2401_v36 = vadd.f32 %v2400_v55, %v2319_v8  ;;  %v6197_v8 = vpop.permute.xlu1 %2459  ;;  %v2484_v55 = vpop.permute.xlu0 %2483 }
 0xa84   : > { %v2409_v3 = vsub.f32 0.0, %v2399_v11 }
 0xa85   : > { %v2404_v50 = vpop.f32.mrb[16].mxu1  ;;  %v2410_v49 = vsub.f32 0.0, %v2401_v36 }
 0xa86   : > { %v2413_v46 = vmul.f32 1.442695, %v2409_v3  ;;  %v2406_v37 = vpop.f32.mrb[17].mxu1  ;;  %v2405_v4 = vadd.f32 %v2404_v50, %v2324_v62  ;;  %v4196_v3 = vld [vmem:[%s7081_s7 + $0x30] sm:$0xff]  ;;  %v4199_v50 = vld [vmem:[%s7083_s9 + $0x18] sm:$0xff] }
 0xa87   : > { %v2415_v54 = vmul.f32 1.442695, %v2410_v49  ;;  %v2407_v41 = vadd.f32 %v2406_v37, %v2324_v62  ;;  %v6201_v56 = vpop.permute.xlu1 %2487  ;;  %v4203_v37 = vld [vmem:[%s7079_s5 + $0x40] sm:$0xff] }
 0xa88   : > { %4570 = vpow2.f32 %v2413_v46  ;;  %v2411_v0 = vsub.f32 0.0, %v2405_v4  ;;  %v6214_v46 = vpop.permute.xlu0 %2519 }
 0xa89   : > { %4572 = vpow2.f32 %v2415_v54  ;;  %v2412_v22 = vsub.f32 0.0, %v2407_v41 }
 0xa8a   : > { %v2417_v9 = vmul.f32 1.442695, %v2411_v0 }
 0xa8b   : > { %v2419_v59 = vmul.f32 1.442695, %v2412_v22 }
 0xa8c   : > { %v2568_v54 = vpop.permute.xlu0 %2567 }
 0xa92   : > { %v4571_v33 = vpop.eup %4570 }
 0xa93   : > { %v2421_v27 = vadd.f32 1.0, %v4571_v33  ;;  %v4573_v17 = vpop.eup %4572  ;;  %v6226_v33 = vld [vmem:[%s7080_s6 + $0x40] sm:$0xff] }
 0xa94   : > { %v2422_v26 = vadd.f32 1.0, %v4573_v17  ;;  %7315 = vst [vmem:[#allocation13_spill] sm:$0xff] %v6226_v33 }
 0xa95   : > { %4574 = vrcp.f32 %v2421_v27 }
 0xa96   : > { %4576 = vpow2.f32 %v2417_v9 }
 0xa97   : > { %4578 = vrcp.f32 %v2422_v26 }
 0xa98   : > { %4580 = vpow2.f32 %v2419_v59 }
 0xa9f   : > { %v4575_v61 = vpop.eup %4574 }
 0xaa0   : > { %v6125_v44 = vmul.f32 %v4575_v61, %v2399_v11  ;;  %v4577_v42 = vpop.eup %4576  ;;  %v7314_v11 = vmov 1  }
 0xaa1   : > { %v4579_v47 = vpop.eup %4578  ;;  %v2423_v6 = vadd.f32 1.0, %v4577_v42 }
 0xaa2   : > { %2534 = vrot.lane.b32.xlu1 %v6125_v44, %s7227_s19  ;;  %2440 = vrot.lane.b32.xlu0 %v6125_v44, %s7253_s29  ;;  %v6139_v14 = vmul.f32 %v4579_v47, %v2401_v36  ;;  %v4581_v48 = vpop.eup %4580  ;;  %v2516_v36 = vpop.permute.xlu1 %2515 }
 0xaa3   : > { %4582 = vrcp.f32 %v2423_v6  ;;  %v2424_v53 = vadd.f32 1.0, %v4581_v48 }
 0xaa5   : > { %4584 = vrcp.f32 %v2424_v53 }
 0xaa6   : > { %2582 = vrot.lane.b32.xlu1 %v6125_v44, %s7228_s16  ;;  %2470 = vrot.lane.b32.xlu0 %v6125_v44, %s7254_s18  ;;  %v6216_v49 = vpop.permute.xlu1 %2547 }
 0xaaa   : > { %2614 = vrot.lane.b32.xlu1 %v6125_v44, %s7256_s26  ;;  %2502 = vrot.lane.b32.xlu0 %v6125_v44, %s7255_s17  ;;  %v6221_v62 = vpop.permute.xlu1 %2551 }
 0xaad   : > { %v4583_v23 = vpop.eup %4582 }
 0xaae   : > { %2646 = vrot.lane.b32.xlu1 %v6125_v44, %s7257_s28  ;;  %2444 = vrot.lane.b32.xlu0 %v6139_v14, %s7253_s29  ;;  %v6157_v63 = vmul.f32 %v4583_v23, %v2405_v4  ;;  %v6229_v4 = vpop.permute.xlu0 %2599  ;;  %v2572_v27 = vpop.permute.xlu1 %2571 }
 0xaaf   : > { %v4585_v45 = vpop.eup %4584 }
 0xab0   : > { %v6175_v2 = vmul.f32 %v4585_v45, %v2407_v41 }
 0xab2   : > { %2678 = vrot.lane.b32.xlu1 %v6125_v44, %s7313_s27  ;;  %2474 = vrot.lane.b32.xlu0 %v6139_v14, %s7254_s18  ;;  %v6233_v0 = vpop.permute.xlu0 %2627  ;;  %v6235_v17 = vpop.permute.xlu1 %2595 }
 0xab3   : > { %7316 = vst [vmem:[#allocation12_spill] sm:$0xff] %v6233_v0  ;;  %v6284_v0 = vmul.f32 %v2568_v54, %v6125_v44 }
 0xab6   : > { %2618 = vrot.lane.b32.xlu1 %v6139_v14, %s7256_s26  ;;  %2506 = vrot.lane.b32.xlu0 %v6139_v14, %s7255_s17  ;;  %v6239_v9 = vpop.permute.xlu0 %2663  ;;  %v6241_v26 = vpop.permute.xlu1 %2631 }
 0xaba   : > { %2650 = vrot.lane.b32.xlu1 %v6139_v14, %s7257_s28  ;;  %2538 = vrot.lane.b32.xlu0 %v6139_v14, %s7227_s19  ;;  %v6243_v61 = vpop.permute.xlu0 %2691  ;;  %v6245_v41 = vpop.permute.xlu1 %2659 }
 0xabb   : > { %7317 = vst [vmem:[#allocation11_spill] sm:$0xff] %v6243_v61  ;;  %7318 = vst [vmem:[#allocation10_spill] sm:$0xff] %v6245_v41 }
 0xabe   : > { %2442 = vrot.lane.b32.xlu1 %v6157_v63, %s7253_s29  ;;  %2586 = vrot.lane.b32.xlu0 %v6139_v14, %s7228_s16  ;;  %v2455_v22 = vpop.permute.xlu0 %2454  ;;  %v6247_v42 = vpop.permute.xlu1 %2695 }
 0xac2   : > { %2472 = vrot.lane.b32.xlu1 %v6157_v63, %s7254_s18  ;;  %2616 = vrot.lane.b32.xlu0 %v6157_v63, %s7256_s26 }
 0xac6   : > { %2504 = vrot.lane.b32.xlu1 %v6157_v63, %s7255_s17  ;;  %2648 = vrot.lane.b32.xlu0 %v6157_v63, %s7257_s28 }
 0xaca   : > { %2536 = vrot.lane.b32.xlu1 %v6157_v63, %s7227_s19  ;;  %2680 = vrot.lane.b32.xlu0 %v6157_v63, %s7313_s27 }
 0xace   : > { %2584 = vrot.lane.b32.xlu1 %v6157_v63, %s7228_s16  ;;  %2620 = vrot.lane.b32.xlu0 %v6175_v2, %s7256_s26 }
 0xad2   : > { %2446 = vrot.lane.b32.xlu1 %v6175_v2, %s7253_s29  ;;  %2652 = vrot.lane.b32.xlu0 %v6175_v2, %s7257_s28 }
 0xad6   : > { %2476 = vrot.lane.b32.xlu1 %v6175_v2, %s7254_s18  ;;  %2684 = vrot.lane.b32.xlu0 %v6175_v2, %s7313_s27 }
 0xada   : > { %2508 = vrot.lane.b32.xlu1 %v6175_v2, %s7255_s17  ;;  %2720 = vperm.xlu0 %4391, %v4197_v30  }
 0xade   : > { %2540 = vrot.lane.b32.xlu1 %v6175_v2, %s7227_s19  ;;  %2865 = vperm.xlu0 %4391, %v4204_v28  }
 0xae2   : > { %2588 = vrot.lane.b32.xlu1 %v6175_v2, %s7228_s16  ;;  %4395 = vset.pattern.permute.xlu0 %v7314_v11 }
 0xae6   : > { %2682 = vrot.lane.b32.xlu1 %v6139_v14, %s7313_s27 }
 0xaea   : > { %2715 = vperm.xlu1 %4393, %v4196_v3  }
 0xaee   : > { %2761 = vperm.xlu1 %4393, %v4199_v50  }
 0xaf2   : > { %2860 = vperm.xlu1 %4393, %v4203_v37  }
 0xaf6   : > { %2996 = vperm.xlu1 %4393, %v6226_v33  }
 0xafa   : > { %4394 = vset.pattern.permute.xlu1 %v7314_v11 }
 0xafb   : > { %3025 = vperm.xlu1 %4394, %v6226_v33  }
 0xaff   : > { %4396 = vset.pattern.permute.xlu1 %v7300_v1 }
 0xb00   : > { %3057 = vperm.xlu1 %4396, %v6226_v33  }
 0xb14   : > { %v2535_v47 = vpop.permute.xlu1 %2534  ;;  %v2441_v59 = vpop.permute.xlu0 %2440 }
 0xb18   : > { %v6249_v6 = vpop.permute.xlu1 %2582  ;;  %v2471_v48 = vpop.permute.xlu0 %2470 }
 0xb1c   : > { %v2615_v23 = vpop.permute.xlu1 %2614  ;;  %v2503_v53 = vpop.permute.xlu0 %2502 }
 0xb20   : > { %v6251_v45 = vpop.permute.xlu1 %2646  ;;  %v2445_v30 = vpop.permute.xlu0 %2444 }
 0xb21   : > { %7319 = vst [vmem:[#allocation18_spill] sm:$0xff] %v6251_v45  ;;  %v2448_v52 = vsel %vm727_vm2, %v2441_v59, %v2445_v30  ;;  %v2450_v33 = vsel %vm727_vm2, %v2445_v30, %v2441_v59 }
 0xb22   : > { %v2463_v51 = vmul.f32 %v2455_v22, %v2448_v52 }
 0xb24   : > { %v6253_v28 = vpop.permute.xlu1 %2678  ;;  %v2475_v3 = vpop.permute.xlu0 %2474 }
 0xb25   : > { %7320 = vst [vmem:[#allocation21_spill] sm:$0xff] %v6253_v28  ;;  %v2478_v5 = vsel %vm769_vm3, %v2471_v48, %v2475_v3  ;;  %v2480_v24 = vsel %vm769_vm3, %v2475_v3, %v2471_v48  ;;  %v2462_v28 = vmul.f32 %v2455_v22, %v2450_v33  ;;  %v6290_v33 = vmul.f32 %v2572_v27, %v6157_v63 }
 0xb26   : > { %v2490_v58 = vmul.f32 %v2484_v55, %v2480_v24  ;;  %v2491_v59 = vmul.f32 %v2484_v55, %v2478_v5  ;;  %v6293_v24 = vmul.f32 %v2572_v27, %v6175_v2  ;;  %v2467_v55 = vmul.f32 %v2463_v51, %v5169_v31 }
 0xb27   : > { %v2466_v44 = vmul.f32 %v2462_v28, %v5163_v29 }
 0xb28   : > { %v2619_v50 = vpop.permute.xlu1 %2618  ;;  %v2507_v37 = vpop.permute.xlu0 %2506  ;;  %v2495_v5 = vmul.f32 %v2491_v59, %v5183_v60 }
 0xb29   : > { %v2510_v41 = vsel %vm813_vm4, %v2503_v53, %v2507_v37  ;;  %v2512_v40 = vsel %vm813_vm4, %v2507_v37, %v2503_v53  ;;  %v6287_v53 = vmul.f32 %v2568_v54, %v6139_v14  ;;  %v6313_v51 = vsel %vm961_vm5, %v2615_v23, %v2619_v50 }
 0xb2a   : > { %v2522_v30 = vmul.f32 %v2516_v36, %v2512_v40  ;;  %v2523_v45 = vmul.f32 %v2516_v36, %v2510_v41  ;;  %v2494_v40 = vmul.f32 %v2490_v58, %v5171_v13 }
 0xb2c   : > { %v6255_v38 = vpop.permute.xlu1 %2650  ;;  %v2539_v32 = vpop.permute.xlu0 %2538  ;;  %v2526_v14 = vmul.f32 %v2522_v30, %v5211_v7  ;;  %v2527_v63 = vmul.f32 %v2523_v45, %v5213_v15 }
 0xb2d   : > { %7321 = vst [vmem:[#allocation22_spill] sm:$0xff] %v6255_v38  ;;  %v2542_v38 = vsel %vm857_vm6, %v2535_v47, %v2539_v32  ;;  %v2544_v48 = vsel %vm857_vm6, %v2539_v32, %v2535_v47  ;;  %v2498_v47 = vadd.f32 %v2494_v40, %v2466_v44 }
 0xb2e   : > { %v2554_v52 = vmul.f32 %v6216_v49, %v2544_v48  ;;  %v2555_v32 = vmul.f32 %v6216_v49, %v2542_v38  ;;  %v6317_v49 = vsel %vm961_vm5, %v2619_v50, %v2615_v23 }
 0xb30   : > { %v2443_v1 = vpop.permute.xlu1 %2442  ;;  %v2587_v11 = vpop.permute.xlu0 %2586  ;;  %v2558_v45 = vmul.f32 %v2554_v52, %v5240_v39  ;;  %v2559_v28 = vmul.f32 %v2555_v32, %v5242_v57 }
 0xb31   : > { %v2592_v37 = vsel %vm917_vm7, %v2587_v11, %v6249_v6 }
 0xb34   : > { %v2473_v43 = vpop.permute.xlu1 %2472  ;;  %v6257_v12 = vpop.permute.xlu0 %2616 }
 0xb38   : > { %v2505_v16 = vpop.permute.xlu1 %2504  ;;  %v6259_v34 = vpop.permute.xlu0 %2648 }
 0xb3c   : > { %v6261_v10 = vpop.permute.xlu1 %2536  ;;  %v6277_v25 = vpop.permute.xlu0 %2680 }
 0xb40   : > { %v6271_v61 = vpop.permute.xlu1 %2584  ;;  %v2621_v36 = vpop.permute.xlu0 %2620 }
 0xb44   : > { %v2447_v3 = vpop.permute.xlu1 %2446  ;;  %v2653_v40 = vpop.permute.xlu0 %2652 }
 0xb45   : > { %v2449_v2 = vsel %vm727_vm2, %v2443_v1, %v2447_v3  ;;  %v2451_v58 = vsel %vm727_vm2, %v2447_v3, %v2443_v1  ;;  %v2499_v1 = vadd.f32 %v2495_v5, %v2467_v55  ;;  %v2603_v55 = vmul.f32 %v6235_v17, %v2592_v37 }
 0xb46   : > { %v2464_v23 = vmul.f32 %v6197_v8, %v2451_v58  ;;  %v2465_v50 = vmul.f32 %v6197_v8, %v2449_v2  ;;  %v2623_v58 = vsel %vm961_vm5, %v6257_v12, %v2621_v36 }
 0xb47   : > { %v2531_v30 = vadd.f32 %v2527_v63, %v2499_v1 }
 0xb48   : > { %v2477_v54 = vpop.permute.xlu1 %2476  ;;  %v2469_v63 = vmul.f32 %v2465_v50, %v5169_v31  ;;  %v2636_v50 = vmul.f32 %v6241_v26, %v2623_v58 }
 0xb49   : > { %v2479_v27 = vsel %vm769_vm3, %v2473_v43, %v2477_v54  ;;  %v2481_v38 = vsel %vm769_vm3, %v2477_v54, %v2473_v43  ;;  %v2590_v43 = vsel %vm917_vm7, %v6249_v6, %v2587_v11  ;;  %v2563_v8 = vadd.f32 %v2559_v28, %v2531_v30  ;;  %v2685_v28 = vpop.permute.xlu0 %2684 }
 0xb4a   : > { %v2492_v41 = vmul.f32 %v6201_v56, %v2481_v38  ;;  %v2493_v22 = vmul.f32 %v6201_v56, %v2479_v27  ;;  %v2530_v56 = vadd.f32 %v2526_v14, %v2498_v47  ;;  %v2602_v44 = vmul.f32 %v6235_v17, %v2590_v43 }
 0xb4b   : > { %v2468_v14 = vmul.f32 %v2464_v23, %v5163_v29 }
 0xb4c   : > { %v2509_v59 = vpop.permute.xlu1 %2508  ;;  %v2496_v5 = vmul.f32 %v2492_v41, %v5171_v13  ;;  %v2497_v52 = vmul.f32 %v2493_v22, %v5183_v60  ;;  %v2562_v32 = vadd.f32 %v2558_v45, %v2530_v56  ;;  %v2606_v1 = vmul.f32 %v2602_v44, %v5245_v18 }
 0xb4d   : > { %v2511_v48 = vsel %vm813_vm4, %v2505_v16, %v2509_v59  ;;  %v2513_v3 = vsel %vm813_vm4, %v2509_v59, %v2505_v16  ;;  %v2607_v45 = vmul.f32 %v2603_v55, %v5247_v19  ;;  %v2579_v55 = vadd.f32 %v6287_v53, %v2563_v8  ;;  %v7323_v53 = vld [vmem:[#allocation22_spill] sm:$0xff] }
 0xb4e   : > { %v2524_v11 = vmul.f32 %v6214_v46, %v2513_v3  ;;  %v2525_v6 = vmul.f32 %v6214_v46, %v2511_v48  ;;  %v2625_v46 = vsel %vm961_vm5, %v2621_v36, %v6257_v12  ;;  %v2500_v38 = vadd.f32 %v2496_v5, %v2468_v14  ;;  %v7324_v8 = vld [vmem:[#allocation18_spill] sm:$0xff] }
 0xb4f   : > { %v2501_v41 = vadd.f32 %v2497_v52, %v2469_v63  ;;  %v2655_v12 = vsel %vm1005_vm8, %v6259_v34, %v2653_v40  ;;  %v2657_v36 = vsel %vm1005_vm8, %v2653_v40, %v6259_v34  ;;  %v2637_v59 = vmul.f32 %v6241_v26, %v2625_v46 }
 0xb50   : > { %v2528_v16 = vmul.f32 %v2524_v11, %v5211_v7  ;;  %v2529_v54 = vmul.f32 %v2525_v6, %v5213_v15  ;;  %v2541_v2 = vpop.permute.xlu1 %2540  ;;  %v2668_v5 = vmul.f32 %v6239_v9, %v2655_v12  ;;  %v2669_v52 = vmul.f32 %v6239_v9, %v2657_v36  ;;  %v7327_v12 = vld [vmem:[#allocation21_spill] sm:$0xff] }
 0xb51   : > { %v2543_v17 = vsel %vm857_vm6, %v6261_v10, %v2541_v2  ;;  %v2545_v27 = vsel %vm857_vm6, %v2541_v2, %v6261_v10  ;;  %v2687_v26 = vsel %vm1049_vm9, %v6277_v25, %v2685_v28  ;;  %v2689_v11 = vsel %vm1049_vm9, %v2685_v28, %v6277_v25  ;;  %v7328_v28 = vld [vmem:[#allocation16_spill] sm:$0xff] }
 0xb52   : > { %v2556_v22 = vmul.f32 %v6221_v62, %v2545_v27  ;;  %v2557_v47 = vmul.f32 %v6221_v62, %v2543_v17  ;;  %v2532_v10 = vadd.f32 %v2528_v16, %v2500_v38  ;;  %v2533_v43 = vadd.f32 %v2529_v54, %v2501_v41  ;;  %v7326_v27 = vld [vmem:[#allocation15_spill] sm:$0xff] }
 0xb53   : > { %v2578_v9 = vadd.f32 %v6284_v0, %v2562_v32  ;;  %v2640_v14 = vmul.f32 %v2636_v50, %v5202_v20  ;;  %v2641_v63 = vmul.f32 %v2637_v59, %v5209_v21  ;;  %v2700_v16 = vmul.f32 %v6247_v42, %v2687_v26 }
 0xb54   : > { %v2560_v37 = vmul.f32 %v2556_v22, %v5240_v39  ;;  %v2561_v23 = vmul.f32 %v2557_v47, %v5242_v57  ;;  %v2589_v62 = vpop.permute.xlu1 %2588  ;;  %v2701_v25 = vmul.f32 %v6247_v42, %v2689_v11  ;;  %v2654_v0 = vsel %vm1005_vm8, %v7324_v8, %v7323_v53  ;;  %v7325_v42 = vld [vmem:[#allocation14_spill] sm:$0xff] }
 0xb55   : > { %v2591_v56 = vsel %vm917_vm7, %v6271_v61, %v2589_v62  ;;  %v2593_v34 = vsel %vm917_vm7, %v2589_v62, %v6271_v61  ;;  %v2656_v32 = vsel %vm1005_vm8, %v7323_v53, %v7324_v8  ;;  %v2672_v17 = vmul.f32 %v2668_v5, %v7325_v42 }
 0xb56   : > { %v2564_v30 = vadd.f32 %v2560_v37, %v2532_v10  ;;  %v2565_v48 = vadd.f32 %v2561_v23, %v2533_v43  ;;  %v2604_v3 = vmul.f32 %v6229_v4, %v2591_v56  ;;  %v2605_v40 = vmul.f32 %v6229_v4, %v2593_v34  ;;  %v7329_v43 = vld [vmem:[#allocation17_spill] sm:$0xff]  ;;  %v7331_v34 = vld [vmem:[#allocation11_spill] sm:$0xff] }
 0xb57   : > { %v2673_v38 = vmul.f32 %v2669_v52, %v7326_v27  ;;  %v2611_v47 = vadd.f32 %v2607_v45, %v2579_v55  ;;  %v2704_v10 = vmul.f32 %v2700_v16, %v7328_v28  ;;  %v2705_v37 = vmul.f32 %v2701_v25, %v7329_v43 }
 0xb58   : > { %v2580_v61 = vadd.f32 %v6290_v33, %v2564_v30  ;;  %v2581_v6 = vadd.f32 %v6293_v24, %v2565_v48  ;;  %v2608_v44 = vmul.f32 %v2604_v3, %v5245_v18  ;;  %v2609_v4 = vmul.f32 %v2605_v40, %v5247_v19  ;;  %v2683_v2 = vpop.permute.xlu1 %2682  ;;  %v7322_v24 = vld [vmem:[#allocation12_spill] sm:$0xff] }
 0xb59   : > { %v2634_v58 = vmul.f32 %v7322_v24, %v6313_v51  ;;  %v2635_v46 = vmul.f32 %v7322_v24, %v6317_v49  ;;  %v2610_v51 = vadd.f32 %v2606_v1, %v2578_v9  ;;  %v2686_v49 = vsel %vm1049_vm9, %v7327_v12, %v2683_v2  ;;  %v7330_v1 = vld [vmem:[#allocation10_spill] sm:$0xff]  ;;  %v2721_v5 = vpop.permute.xlu0 %2720 }
 0xb5a   : > { %v2612_v54 = vadd.f32 %v2608_v44, %v2580_v61  ;;  %v2613_v33 = vadd.f32 %v2609_v4, %v2581_v6  ;;  %v2688_v36 = vsel %vm1049_vm9, %v2683_v2, %v7327_v12  ;;  %v2666_v45 = vmul.f32 %v7330_v1, %v2654_v0 }
 0xb5b   : > { %v2638_v50 = vmul.f32 %v2634_v58, %v5202_v20  ;;  %v2639_v59 = vmul.f32 %v2635_v46, %v5209_v21  ;;  %v2667_v56 = vmul.f32 %v7330_v1, %v2656_v32  ;;  %v2698_v30 = vmul.f32 %v7331_v34, %v2686_v49 }
 0xb5c   : > { %v2644_v41 = vadd.f32 %v2640_v14, %v2612_v54  ;;  %v2645_v22 = vadd.f32 %v2641_v63, %v2613_v33  ;;  %v2699_v48 = vmul.f32 %v7331_v34, %v2688_v36  ;;  %v2670_v6 = vmul.f32 %v2666_v45, %v7325_v42  ;;  %v4198_v34 = vld [vmem:[%s7082_s8 + $0x18] sm:$0xff] }
 0xb5d   : > { %v2642_v11 = vadd.f32 %v2638_v50, %v2610_v51  ;;  %v2643_v61 = vadd.f32 %v2639_v59, %v2611_v47  ;;  %v2671_v44 = vmul.f32 %v2667_v56, %v7326_v27  ;;  %v2702_v4 = vmul.f32 %v2698_v30, %v7328_v28 }
 0xb5e   : > { %v2676_v23 = vadd.f32 %v2672_v17, %v2644_v41  ;;  %v2677_v62 = vadd.f32 %v2673_v38, %v2645_v22  ;;  %v2703_v55 = vmul.f32 %v2699_v48, %v7329_v43  ;;  %v7332_v30 = vmov 0.0   ;;  %v4208_v48 = vld [vmem:[%s7080_s6 + $0x48] sm:$0xff] }
 0xb5f   : > { %v2674_v16 = vadd.f32 %v2670_v6, %v2642_v11  ;;  %v2675_v25 = vadd.f32 %v2671_v44, %v2643_v61  ;;  %3061 = vperm.xlu1 %4396, %v4208_v48   ;;  %3029 = vperm.xlu0 %4395, %v4208_v48   ;;  %v7338_v11 = vmov 7   ;;  %v7339_v61 = vmov 8  }
 0xb60   : > { %v2708_v3 = vadd.f32 %v2704_v10, %v2676_v23  ;;  %v2709_v40 = vadd.f32 %v2705_v37, %v2677_v62  ;;  %v7340_v6 = vmov 0  }
 0xb61   : > { %v2706_v33 = vadd.f32 %v2702_v4, %v2674_v16  ;;  %v2707_v2 = vadd.f32 %v2703_v55, %v2675_v25 }
 0xb62   : > { %v2725_v52 = vadd.f32 %v2721_v5, %v2708_v3  ;;  %v2726_v26 = vadd.f32 %v2721_v5, %v2709_v40  ;;  %v7333_v3 = vmov 3   ;;  %v7334_v40 = vld [vmem:[#allocation13_spill] sm:$0xff]  ;;  %v7335_v5 = vmov 4  }
 0xb63   : > { %4398 = vset.pattern.permute.xlu1 %v7333_v3  ;;  %4397 = vset.pattern.permute.xlu0 %v7333_v3 }
 0xb64   : > { %v2729_v9 = vsub.f32 0.0, %v2725_v52  ;;  %v2730_v14 = vsub.f32 0.0, %v2726_v26  ;;  %3093 = vperm.xlu1 %4398, %v4208_v48   ;;  %3089 = vperm.xlu0 %4397, %v7334_v40  }
 0xb66   : > { %v2735_v63 = vmul.f32 1.442695, %v2729_v9  ;;  %v2737_v54 = vmul.f32 1.442695, %v2730_v14 }
 0xb68   : > { %4586 = vpow2.f32 %v2735_v63  ;;  %4399 = vset.pattern.permute.xlu1 %v7335_v5  ;;  %4400 = vset.pattern.permute.xlu0 %v7335_v5 }
 0xb69   : > { %v2716_v24 = vpop.permute.xlu1 %2715  ;;  %4588 = vpow2.f32 %v2737_v54  ;;  %3109 = vperm.xlu1 %4399, %v7334_v40   ;;  %3113 = vperm.xlu0 %4400, %v4208_v48  }
 0xb6a   : > { %v2723_v58 = vadd.f32 %v2716_v24, %v2706_v33  ;;  %v2724_v46 = vadd.f32 %v2716_v24, %v2707_v2 }
 0xb6c   : > { %v2727_v53 = vsub.f32 0.0, %v2723_v58  ;;  %v2728_v8 = vsub.f32 0.0, %v2724_v46 }
 0xb6d   : > { %v2762_v44 = vpop.permute.xlu1 %2761 }
 0xb6e   : > { %v2731_v0 = vmul.f32 1.442695, %v2727_v53  ;;  %v2733_v32 = vmul.f32 1.442695, %v2728_v8 }
 0xb70   : > { %4590 = vpow2.f32 %v2731_v0 }
 0xb71   : > { %4592 = vpow2.f32 %v2733_v32  ;;  %v4201_v32 = vld [vmem:[%s7078_s4 + $0x40] sm:$0xff] }
 0xb72   : > { %v4587_v17 = vpop.eup %4586 }
 0xb73   : > { %v4589_v38 = vpop.eup %4588  ;;  %v2741_v41 = vadd.f32 1.0, %v4587_v17  ;;  %v4202_v17 = vld [vmem:[%s7078_s4 + $0x48] sm:$0xff] }
 0xb74   : > { %v2742_v22 = vadd.f32 1.0, %v4589_v38  ;;  %v2861_v38 = vpop.permute.xlu1 %2860 }
 0xb75   : > { %4594 = vrcp.f32 %v2741_v41 }
 0xb76   : > { %4596 = vrcp.f32 %v2742_v22 }
 0xb7a   : > { %v4591_v51 = vpop.eup %4590 }
 0xb7b   : > { %v4593_v47 = vpop.eup %4592  ;;  %v2739_v12 = vadd.f32 1.0, %v4591_v51 }
 0xb7c   : > { %v2740_v49 = vadd.f32 1.0, %v4593_v47 }
 0xb7d   : > { %4598 = vrcp.f32 %v2739_v12 }
 0xb7e   : > { %4600 = vrcp.f32 %v2740_v49  ;;  %v2866_v49 = vpop.permute.xlu0 %2865 }
 0xb7f   : > { %v4595_v36 = vpop.eup %4594 }
 0xb80   : > { %v4597_v10 = vpop.eup %4596  ;;  %v2753_v62 = vmul.f32 %v4595_v36, %v2725_v52  ;;  %v7336_v52 = vmov 5  }
 0xb81   : > { %v2754_v59 = vmul.f32 %v4597_v10, %v2726_v26  ;;  %4401 = vset.pattern.permute.xlu1 %v7336_v52  ;;  %v7337_v26 = vmov 6  }
 0xb82   : > { %4402 = vset.pattern.permute.xlu0 %v7337_v26  ;;  %3137 = vperm.xlu1 %4401, %v7334_v40  }
 0xb83   : > { %3169 = vperm.xlu0 %4402, %v7334_v40  }
 0xb86   : > { %3141 = vperm.xlu1 %4401, %v4208_v48  }
 0xb87   : > { %v4599_v37 = vpop.eup %4598  ;;  %4405 = vset.pattern.permute.xlu0 %v7338_v11 }
 0xb88   : > { %v4601_v23 = vpop.eup %4600  ;;  %v2751_v50 = vmul.f32 %v4599_v37, %v2723_v58  ;;  %3205 = vperm.xlu0 %4405, %v4208_v48  }
 0xb89   : > { %v2752_v1 = vmul.f32 %v4601_v23, %v2724_v46 }
 0xb8a   : > { %v4254_v45 = vpack.c.bf16 %v2753_v62, %v2751_v50  ;;  %4403 = vset.pattern.permute.xlu1 %v7337_v26 }
 0xb8b   : > { %v4252_v56 = vpack.c.bf16 %v2754_v59, %v2752_v1  ;;  %3173 = vperm.xlu1 %4403, %v4208_v48  }
 0xb8c   : > { %4406 = vset.pattern.permute.xlu0 %v7339_v61 }
 0xb8d   : > { %4253 = vmatprep.subr.bf16.mxu0 %v4252_v56  ;;  %3233 = vperm.xlu0 %4406, %v7334_v40  }
 0xb8e   : > { %4255 = vmatpush1.bf16.msra.mxu0 %v4254_v45 }
 0xb8f   : > { %4404 = vset.pattern.permute.xlu1 %v7338_v11 }
 0xb90   : > { %3201 = vperm.xlu1 %4404, %v7334_v40  }
 0xb91   : > { %4200 = vmatmul.mubr.msk.f32.vlgmr.msra.gmra.mrb[10].mxu0 %vm437_vm0, %v4198_v34  ;;  %4407 = vset.pattern.permute.xlu0 %v7340_v6 }
 0xb92   : > { %2938 = vmatprep.mubr.f32.mxu0 %v7332_v30  ;;  %3001 = vperm.xlu0 %4407, %v4208_v48  }
 0xb94   : > { %4408 = vset.pattern.permute.xlu1 %v7339_v61 }
 0xb95   : > { %3237 = vperm.xlu1 %4408, %v4208_v48  }
 0xb99   : > { %4409 = vset.pattern.permute.xlu1 %v7340_v6 }
 0xc64   : > { %v2833_v4 = vpop.f32.mrb[10].mxu0 }
 0xc65   : > { %v2834_v55 = vadd.f32 %v2833_v4, %v2762_v44  ;;  %v2835_v9 = vpop.f32.mrb[11].mxu0 }
 0xc66   : > { %v2836_v14 = vadd.f32 %v2835_v9, %v2762_v44 }
 0xc67   : > { %v2838_v63 = vsub.f32 0.0, %v2834_v55 }
 0xc68   : > { %v2839_v16 = vsub.f32 0.0, %v2836_v14 }
 0xc69   : > { %v2840_v25 = vmul.f32 1.442695, %v2838_v63  ;;  %v6466_v63 = vpop.permute.xlu0 %3029 }
 0xc6a   : > { %v2842_v54 = vmul.f32 1.442695, %v2839_v16 }
 0xc6b   : > { %4602 = vpow2.f32 %v2840_v25 }
 0xc6c   : > { %4604 = vpow2.f32 %v2842_v54 }
 0xc6d   : > { %v6468_v25 = vpop.permute.xlu0 %3089 }
 0xc75   : > { %v4603_v33 = vpop.eup %4602 }
 0xc76   : > { %v4605_v2 = vpop.eup %4604  ;;  %v2844_v24 = vadd.f32 1.0, %v4603_v33 }
 0xc77   : > { %v2845_v58 = vadd.f32 1.0, %v4605_v2 }
 0xc78   : > { %4606 = vrcp.f32 %v2844_v24 }
 0xc79   : > { %4608 = vrcp.f32 %v2845_v58  ;;  %v3114_v58 = vpop.permute.xlu0 %3113 }
 0xc82   : > { %v4607_v46 = vpop.eup %4606 }
 0xc83   : > { %v4609_v53 = vpop.eup %4608  ;;  %v2850_v0 = vmul.f32 %v4607_v46, %v2834_v55 }
 0xc84   : > { %v2851_v8 = vmul.f32 %v4609_v53, %v2836_v14 }
 0xc86   : > { %2874 = vmatprep.subr.mxu0 %v2851_v8 }
 0xc87   : > { %2875 = vmatpush1.msra.mxu0 %v2850_v0 }
 0xc88   : > { %4205 = vmatmul.mubr.msk.f32.vlgmr.msra.gmra.mrb[12].mxu0 %vm603_vm1, %v4201_v32 }
 0xc89   : > { %2944 = vmatprep.mubr.f32.mxu0 %v7332_v30 }
 0xc8c   : > { %4206 = vmatmul.mubr.msk.f32.gmra.mrb[14].mxu0 %vm603_vm1, %v4202_v17 }
 0xc8d   : > { %3915 = vmatprep.mubr.f32.mxu0 %v7332_v30 }
 0xd5b   : > { %v2940_v41 = vpop.f32.mrb[12].mxu0 }
 0xd5c   : > { %v2941_v22 = vadd.f32 %v2940_v41, %v2861_v38  ;;  %v2942_v51 = vpop.f32.mrb[13].mxu0 }
 0xd5d   : > { %v2943_v47 = vadd.f32 %v2942_v51, %v2861_v38  ;;  %v6519_v38 = vpop.permute.xlu1 %2996  ;;  %v4217_v51 = vld [vmem:[%s7079_s5 + $0x58] sm:$0xff] }
 0xd5e   : > { %v2951_v12 = vsub.f32 0.0, %v2941_v22 }
 0xd5f   : > { %v2952_v36 = vsub.f32 0.0, %v2943_v47  ;;  %v2946_v10 = vpop.f32.mrb[14].mxu0 }
 0xd60   : > { %v2955_v37 = vmul.f32 1.442695, %v2951_v12  ;;  %v2947_v23 = vadd.f32 %v2946_v10, %v2866_v49  ;;  %v2948_v62 = vpop.f32.mrb[15].mxu0  ;;  %v4209_v12 = vld [vmem:[%s7081_s7 + $0x40] sm:$0xff] }
 0xd61   : > { %v2957_v50 = vmul.f32 1.442695, %v2952_v36  ;;  %v2949_v59 = vadd.f32 %v2948_v62, %v2866_v49  ;;  %v3026_v41 = vpop.permute.xlu1 %3025  ;;  %v7341_v36 = vmov 1   ;;  %v4212_v10 = vld [vmem:[%s7083_s9 + $0x20] sm:$0xff]  ;;  %v6553_v62 = vld [vmem:[%s7080_s6 + $0x50] sm:$0xff] }
 0xd62   : > { %4610 = vpow2.f32 %v2955_v37  ;;  %v2953_v1 = vsub.f32 0.0, %v2947_v23  ;;  %v4216_v37 = vld [vmem:[%s7079_s5 + $0x50] sm:$0xff]  ;;  %7342 = vst [vmem:[#allocation12_spill] sm:$0xff] %v6553_v62 }
 0xd63   : > { %4612 = vpow2.f32 %v2957_v50  ;;  %v2954_v45 = vsub.f32 0.0, %v2949_v59 }
 0xd64   : > { %v2959_v56 = vmul.f32 1.442695, %v2953_v1  ;;  %v7343_v1 = vmov 2  }
 0xd65   : > { %v2961_v34 = vmul.f32 1.442695, %v2954_v45 }
 0xd66   : > { %4614 = vpow2.f32 %v2959_v56  ;;  %v6565_v56 = vpop.permute.xlu0 %3169 }
 0xd67   : > { %4616 = vpow2.f32 %v2961_v34 }
 0xd6c   : > { %v4611_v48 = vpop.eup %4610 }
 0xd6d   : > { %v4613_v40 = vpop.eup %4612  ;;  %v2963_v44 = vadd.f32 1.0, %v4611_v48  ;;  %v6570_v48 = vpop.permute.xlu0 %3205 }
 0xd6e   : > { %v2964_v4 = vadd.f32 1.0, %v4613_v40 }
 0xd6f   : > { %4618 = vrcp.f32 %v2963_v44 }
 0xd70   : > { %v4615_v55 = vpop.eup %4614  ;;  %4620 = vrcp.f32 %v2964_v4 }
 0xd71   : > { %v4617_v9 = vpop.eup %4616  ;;  %v2965_v14 = vadd.f32 1.0, %v4615_v55  ;;  %v6574_v44 = vpop.permute.xlu0 %3233 }
 0xd72   : > { %v2966_v16 = vadd.f32 1.0, %v4617_v9  ;;  %7344 = vst [vmem:[#allocation22_spill] sm:$0xff] %v6574_v44 }
 0xd73   : > { %4622 = vrcp.f32 %v2965_v14 }
 0xd74   : > { %4624 = vrcp.f32 %v2966_v16 }
 0xd75   : > { %v6578_v55 = vpop.permute.xlu0 %3001 }
 0xd79   : > { %v4619_v54 = vpop.eup %4618 }
 0xd7a   : > { %v6470_v33 = vmul.f32 %v4619_v54, %v2941_v22  ;;  %v4621_v2 = vpop.eup %4620  ;;  %v4210_v22 = vld [vmem:[%s7081_s7 + $0x48] sm:$0xff] }
 0xd7b   : > { %v6476_v53 = vmul.f32 %v4621_v2, %v2943_v47  ;;  %v6532_v47 = vpop.permute.xlu1 %3057 }
 0xd7c   : > { %3076 = vrot.lane.b32.xlu0 %v6470_v33, %s7227_s19  ;;  %2982 = vrot.lane.b32.xlu1 %v6470_v33, %s7253_s29 }
 0xd7d   : > { %v4623_v24 = vpop.eup %4622 }
 0xd7e   : > { %v4625_v46 = vpop.eup %4624  ;;  %v2977_v8 = vmul.f32 %v4623_v24, %v2947_v23 }
 0xd7f   : > { %v2978_v0 = vmul.f32 %v4625_v46, %v2949_v59  ;;  %v6539_v49 = vpop.permute.xlu1 %3061 }
 0xd80   : > { %v6478_v32 = vmul.f32 %v3114_v58, %v2977_v8  ;;  %3080 = vrot.lane.b32.xlu0 %v6476_v53, %s7227_s19  ;;  %3012 = vrot.lane.b32.xlu1 %v6470_v33, %s7254_s18 }
 0xd81   : > { %v6484_v17 = vmul.f32 %v3114_v58, %v2978_v0 }
 0xd83   : > { %v6548_v23 = vpop.permute.xlu1 %3093 }
 0xd84   : > { %3128 = vrot.lane.b32.xlu0 %v6476_v53, %s7228_s16  ;;  %3044 = vrot.lane.b32.xlu1 %v6470_v33, %s7255_s17 }
 0xd87   : > { %v6555_v50 = vpop.permute.xlu1 %3109 }
 0xd88   : > { %2984 = vrot.lane.b32.xlu0 %v2977_v8, %s7253_s29  ;;  %3124 = vrot.lane.b32.xlu1 %v6470_v33, %s7228_s16 }
 0xd8b   : > { %v6558_v59 = vpop.permute.xlu1 %3137 }
 0xd8c   : > { %3014 = vrot.lane.b32.xlu0 %v2977_v8, %s7254_s18  ;;  %3156 = vrot.lane.b32.xlu1 %v6470_v33, %s7256_s26 }
 0xd8f   : > { %v6563_v45 = vpop.permute.xlu1 %3141 }
 0xd90   : > { %3046 = vrot.lane.b32.xlu0 %v2977_v8, %s7255_s17  ;;  %3188 = vrot.lane.b32.xlu1 %v6470_v33, %s7257_s28 }
 0xd93   : > { %v6568_v34 = vpop.permute.xlu1 %3173 }
 0xd94   : > { %3158 = vrot.lane.b32.xlu0 %v2977_v8, %s7256_s26  ;;  %3220 = vrot.lane.b32.xlu1 %v6470_v33, %s7313_s27 }
 0xd97   : > { %v6572_v40 = vpop.permute.xlu1 %3201 }
 0xd98   : > { %3190 = vrot.lane.b32.xlu0 %v2977_v8, %s7257_s28  ;;  %2986 = vrot.lane.b32.xlu1 %v6476_v53, %s7253_s29 }
 0xd9b   : > { %v6576_v4 = vpop.permute.xlu1 %3237 }
 0xd9c   : > { %3222 = vrot.lane.b32.xlu0 %v2977_v8, %s7313_s27  ;;  %3016 = vrot.lane.b32.xlu1 %v6476_v53, %s7254_s18  ;;  %7345 = vst [vmem:[#allocation18_spill] sm:$0xff] %v6576_v4 }
 0xda0   : > { %2988 = vrot.lane.b32.xlu0 %v2978_v0, %s7253_s29  ;;  %3048 = vrot.lane.b32.xlu1 %v6476_v53, %s7255_s17 }
 0xda4   : > { %3018 = vrot.lane.b32.xlu0 %v2978_v0, %s7254_s18  ;;  %3160 = vrot.lane.b32.xlu1 %v6476_v53, %s7256_s26 }
 0xda8   : > { %3050 = vrot.lane.b32.xlu0 %v2978_v0, %s7255_s17  ;;  %3192 = vrot.lane.b32.xlu1 %v6476_v53, %s7257_s28 }
 0xdac   : > { %3162 = vrot.lane.b32.xlu0 %v2978_v0, %s7256_s26  ;;  %3078 = vrot.lane.b32.xlu1 %v2977_v8, %s7227_s19 }
 0xdb0   : > { %3194 = vrot.lane.b32.xlu0 %v2978_v0, %s7257_s28  ;;  %3126 = vrot.lane.b32.xlu1 %v2977_v8, %s7228_s16 }
 0xdb4   : > { %3226 = vrot.lane.b32.xlu0 %v2978_v0, %s7313_s27  ;;  %3082 = vrot.lane.b32.xlu1 %v2978_v0, %s7227_s19 }
 0xdb8   : > { %3262 = vperm.xlu0 %4407, %v4210_v22   ;;  %3130 = vrot.lane.b32.xlu1 %v2978_v0, %s7228_s16 }
 0xdbc   : > { %3407 = vperm.xlu0 %4407, %v4217_v51   ;;  %3224 = vrot.lane.b32.xlu1 %v6476_v53, %s7313_s27 }
 0xdc0   : > { %3257 = vperm.xlu1 %4409, %v4209_v12   ;;  %4411 = vset.pattern.permute.xlu0 %v7341_v36 }
 0xdc4   : > { %3303 = vperm.xlu1 %4409, %v4212_v10  }
 0xdc8   : > { %3402 = vperm.xlu1 %4409, %v4216_v37  }
 0xdcc   : > { %3538 = vperm.xlu1 %4409, %v6553_v62  }
 0xdd0   : > { %4410 = vset.pattern.permute.xlu1 %v7341_v36 }
 0xdd1   : > { %3567 = vperm.xlu1 %4410, %v6553_v62  }
 0xdd5   : > { %4412 = vset.pattern.permute.xlu1 %v7343_v1 }
 0xdd6   : > { %3599 = vperm.xlu1 %4412, %v6553_v62  }
 0xdee   : > { %v3077_v9 = vpop.permute.xlu0 %3076  ;;  %v2983_v14 = vpop.permute.xlu1 %2982 }
 0xdf2   : > { %v3081_v16 = vpop.permute.xlu0 %3080  ;;  %v3013_v54 = vpop.permute.xlu1 %3012 }
 0xdf3   : > { %v3084_v3 = vsel %vm857_vm6, %v3077_v9, %v3081_v16  ;;  %v3086_v30 = vsel %vm857_vm6, %v3081_v16, %v3077_v9 }
 0xdf6   : > { %v3129_v2 = vpop.permute.xlu0 %3128  ;;  %v3045_v24 = vpop.permute.xlu1 %3044 }
 0xdfa   : > { %v2985_v58 = vpop.permute.xlu0 %2984  ;;  %v3125_v46 = vpop.permute.xlu1 %3124 }
 0xdfe   : > { %v3015_v8 = vpop.permute.xlu0 %3014  ;;  %v3157_v0 = vpop.permute.xlu1 %3156 }
 0xe02   : > { %v3047_v22 = vpop.permute.xlu0 %3046  ;;  %v6580_v51 = vpop.permute.xlu1 %3188 }
 0xe06   : > { %v6582_v12 = vpop.permute.xlu0 %3158  ;;  %v6584_v36 = vpop.permute.xlu1 %3220 }
 0xe07   : > { %7346 = vst [vmem:[#allocation14_spill] sm:$0xff] %v6584_v36 }
 0xe0a   : > { %v6586_v10 = vpop.permute.xlu0 %3190  ;;  %v2987_v37 = vpop.permute.xlu1 %2986 }
 0xe0b   : > { %v2990_v1 = vsel %vm727_vm2, %v2983_v14, %v2987_v37  ;;  %v2992_v6 = vsel %vm727_vm2, %v2987_v37, %v2983_v14 }
 0xe0c   : > { %v3004_v43 = vmul.f32 %v6519_v38, %v2992_v6  ;;  %v3005_v14 = vmul.f32 %v6519_v38, %v2990_v1 }
 0xe0e   : > { %v6592_v61 = vpop.permute.xlu0 %3222  ;;  %v3017_v11 = vpop.permute.xlu1 %3016  ;;  %v3008_v6 = vmul.f32 %v3004_v43, %v5163_v29  ;;  %v3009_v38 = vmul.f32 %v3005_v14, %v5169_v31  ;;  %v3132_v43 = vsel %vm917_vm7, %v3125_v46, %v3129_v2 }
 0xe0f   : > { %v3020_v26 = vsel %vm769_vm3, %v3013_v54, %v3017_v11  ;;  %v3022_v52 = vsel %vm769_vm3, %v3017_v11, %v3013_v54  ;;  %v3096_v11 = vmul.f32 %v6468_v25, %v3086_v30 }
 0xe10   : > { %v3032_v5 = vmul.f32 %v3026_v41, %v3022_v52  ;;  %v3033_v62 = vmul.f32 %v3026_v41, %v3020_v26  ;;  %v3097_v41 = vmul.f32 %v6468_v25, %v3084_v3  ;;  %v3134_v25 = vsel %vm917_vm7, %v3129_v2, %v3125_v46 }
 0xe11   : > { %v3100_v30 = vmul.f32 %v3096_v11, %v5240_v39  ;;  %v3144_v2 = vmul.f32 %v6558_v59, %v3132_v43 }
 0xe12   : > { %v2989_v37 = vpop.permute.xlu0 %2988  ;;  %v3049_v28 = vpop.permute.xlu1 %3048  ;;  %v3036_v44 = vmul.f32 %v3032_v5, %v5171_v13  ;;  %v3037_v36 = vmul.f32 %v3033_v62, %v5183_v60  ;;  %v3101_v3 = vmul.f32 %v3097_v41, %v5242_v57  ;;  %v3116_v41 = vmul.f32 %v6555_v50, %v6470_v33 }
 0xe13   : > { %v3052_v52 = vsel %vm813_vm4, %v3045_v24, %v3049_v28  ;;  %v3054_v26 = vsel %vm813_vm4, %v3049_v28, %v3045_v24  ;;  %v2991_v46 = vsel %vm727_vm2, %v2985_v58, %v2989_v37 }
 0xe14   : > { %v3064_v9 = vmul.f32 %v6532_v47, %v3054_v26  ;;  %v3065_v5 = vmul.f32 %v6532_v47, %v3052_v52  ;;  %v3040_v54 = vadd.f32 %v3036_v44, %v3008_v6  ;;  %v3041_v1 = vadd.f32 %v3037_v36, %v3009_v38 }
 0xe15   : > { %v3117_v6 = vmul.f32 %v6555_v50, %v6476_v53  ;;  %v2993_v38 = vsel %vm727_vm2, %v2989_v37, %v2985_v58 }
 0xe16   : > { %v3019_v16 = vpop.permute.xlu0 %3018  ;;  %v3161_v62 = vpop.permute.xlu1 %3160  ;;  %v3068_v4 = vmul.f32 %v3064_v9, %v5211_v7  ;;  %v3069_v28 = vmul.f32 %v3065_v5, %v5213_v15  ;;  %v3006_v37 = vmul.f32 %v6578_v55, %v2993_v38 }
 0xe17   : > { %v3021_v26 = vsel %vm769_vm3, %v3015_v8, %v3019_v16  ;;  %v3023_v11 = vsel %vm769_vm3, %v3019_v16, %v3015_v8  ;;  %v3164_v50 = vsel %vm961_vm5, %v3157_v0, %v3161_v62 }
 0xe18   : > { %v3072_v24 = vadd.f32 %v3068_v4, %v3040_v54  ;;  %v3073_v47 = vadd.f32 %v3069_v28, %v3041_v1  ;;  %v3145_v4 = vmul.f32 %v6558_v59, %v3134_v25  ;;  %v3034_v33 = vmul.f32 %v6466_v63, %v3023_v11 }
 0xe19   : > { %v3035_v53 = vmul.f32 %v6466_v63, %v3021_v26  ;;  %v3166_v59 = vsel %vm961_vm5, %v3161_v62, %v3157_v0  ;;  %v3007_v1 = vmul.f32 %v6578_v55, %v2991_v46  ;;  %v3148_v63 = vmul.f32 %v3144_v2, %v5245_v18 }
 0xe1a   : > { %v3051_v14 = vpop.permute.xlu0 %3050  ;;  %v3193_v52 = vpop.permute.xlu1 %3192  ;;  %v3104_v44 = vadd.f32 %v3100_v30, %v3072_v24  ;;  %v3105_v36 = vadd.f32 %v3101_v3, %v3073_v47  ;;  %v3149_v30 = vmul.f32 %v3145_v4, %v5247_v19  ;;  %v3176_v3 = vmul.f32 %v6565_v56, %v3164_v50 }
 0xe1b   : > { %v3053_v9 = vsel %vm813_vm4, %v3047_v22, %v3051_v14  ;;  %v3055_v8 = vsel %vm813_vm4, %v3051_v14, %v3047_v22  ;;  %v3177_v0 = vmul.f32 %v6565_v56, %v3166_v59  ;;  %v3038_v62 = vmul.f32 %v3034_v33, %v5171_v13 }
 0xe1c   : > { %v3121_v54 = vadd.f32 %v3117_v6, %v3105_v36  ;;  %v3120_v58 = vadd.f32 %v3116_v41, %v3104_v44  ;;  %v3066_v22 = vmul.f32 %v6539_v49, %v3055_v8  ;;  %v3067_v28 = vmul.f32 %v6539_v49, %v3053_v9 }
 0xe1d   : > { %v3039_v43 = vmul.f32 %v3035_v53, %v5183_v60  ;;  %v3196_v55 = vsel %vm1005_vm8, %v6580_v51, %v3193_v52  ;;  %v3198_v49 = vsel %vm1005_vm8, %v3193_v52, %v6580_v51  ;;  %v3010_v44 = vmul.f32 %v3006_v37, %v5163_v29 }
 0xe1e   : > { %v3163_v5 = vpop.permute.xlu0 %3162  ;;  %v3079_v16 = vpop.permute.xlu1 %3078  ;;  %v3153_v47 = vadd.f32 %v3149_v30, %v3121_v54  ;;  %v3152_v14 = vadd.f32 %v3148_v63, %v3120_v58  ;;  %v3011_v56 = vmul.f32 %v3007_v1, %v5169_v31  ;;  %v3070_v36 = vmul.f32 %v3066_v22, %v5211_v7 }
 0xe1f   : > { %v3071_v26 = vmul.f32 %v3067_v28, %v5213_v15  ;;  %v3180_v11 = vmul.f32 %v3176_v3, %v5202_v20  ;;  %v3181_v41 = vmul.f32 %v3177_v0, %v5209_v21  ;;  %v3208_v6 = vmul.f32 %v6572_v40, %v3196_v55 }
 0xe20   : > { %v3209_v51 = vmul.f32 %v6572_v40, %v3198_v49  ;;  %v3042_v52 = vadd.f32 %v3038_v62, %v3010_v44  ;;  %v3043_v2 = vadd.f32 %v3039_v43, %v3011_v56  ;;  %v3165_v4 = vsel %vm961_vm5, %v6582_v12, %v3163_v5 }
 0xe21   : > { %v3167_v46 = vsel %vm961_vm5, %v3163_v5, %v6582_v12  ;;  %v3184_v9 = vadd.f32 %v3180_v11, %v3152_v14  ;;  %v3185_v8 = vadd.f32 %v3181_v41, %v3153_v47  ;;  %v3212_v37 = vmul.f32 %v3208_v6, %v7325_v42  ;;  %v7348_v41 = vld [vmem:[#allocation14_spill] sm:$0xff] }
 0xe22   : > { %v3195_v25 = vpop.permute.xlu0 %3194  ;;  %v3127_v24 = vpop.permute.xlu1 %3126  ;;  %v3074_v40 = vadd.f32 %v3070_v36, %v3042_v52  ;;  %v3075_v50 = vadd.f32 %v3071_v26, %v3043_v2  ;;  %v3213_v12 = vmul.f32 %v3209_v51, %v7326_v27  ;;  %v3178_v5 = vmul.f32 %v6568_v34, %v3165_v4  ;;  %v7347_v26 = vld [vmem:[#allocation18_spill] sm:$0xff] }
 0xe23   : > { %v3179_v1 = vmul.f32 %v6568_v34, %v3167_v46  ;;  %v3197_v22 = vsel %vm1005_vm8, %v6586_v10, %v3195_v25 }
 0xe24   : > { %v3182_v49 = vmul.f32 %v3178_v5, %v5202_v20  ;;  %v3210_v47 = vmul.f32 %v6570_v48, %v3197_v22 }
 0xe26   : > { %v3083_v38 = vpop.permute.xlu1 %3082  ;;  %v3227_v59 = vpop.permute.xlu0 %3226  ;;  %v3214_v4 = vmul.f32 %v3210_v47, %v7325_v42 }
 0xe27   : > { %v3085_v33 = vsel %vm857_vm6, %v3079_v16, %v3083_v38  ;;  %v3087_v53 = vsel %vm857_vm6, %v3083_v38, %v3079_v16  ;;  %v3199_v16 = vsel %vm1005_vm8, %v3195_v25, %v6586_v10  ;;  %v3229_v30 = vsel %vm1049_vm9, %v6592_v61, %v3227_v59 }
 0xe28   : > { %v3098_v54 = vmul.f32 %v6548_v23, %v3087_v53  ;;  %v3099_v58 = vmul.f32 %v6548_v23, %v3085_v33  ;;  %v3231_v34 = vsel %vm1049_vm9, %v3227_v59, %v6592_v61  ;;  %v3183_v25 = vmul.f32 %v3179_v1, %v5209_v21  ;;  %v7350_v53 = vld [vmem:[#allocation16_spill] sm:$0xff] }
 0xe29   : > { %v3211_v61 = vmul.f32 %v6570_v48, %v3199_v16  ;;  %v3242_v11 = vmul.f32 %v7347_v26, %v3229_v30  ;;  %v3217_v38 = vadd.f32 %v3213_v12, %v3185_v8  ;;  %v3216_v33 = vadd.f32 %v3212_v37, %v3184_v9 }
 0xe2a   : > { %v3102_v28 = vmul.f32 %v3098_v54, %v5240_v39  ;;  %v3103_v23 = vmul.f32 %v3099_v58, %v5242_v57  ;;  %v3131_v63 = vpop.permute.xlu1 %3130 }
 0xe2b   : > { %v3133_v3 = vsel %vm917_vm7, %v3127_v24, %v3131_v63  ;;  %v3135_v0 = vsel %vm917_vm7, %v3131_v63, %v3127_v24  ;;  %v3215_v46 = vmul.f32 %v3211_v61, %v7326_v27  ;;  %v3246_v5 = vmul.f32 %v3242_v11, %v7350_v53 }
 0xe2c   : > { %v3106_v10 = vadd.f32 %v3102_v28, %v3074_v40  ;;  %v3107_v62 = vadd.f32 %v3103_v23, %v3075_v50  ;;  %v3146_v43 = vmul.f32 %v6563_v45, %v3133_v3  ;;  %v3147_v55 = vmul.f32 %v6563_v45, %v3135_v0  ;;  %v7351_v50 = vld [vmem:[#allocation17_spill] sm:$0xff] }
 0xe2d   : > { %v3243_v45 = vmul.f32 %v7347_v26, %v3231_v34 }
 0xe2e   : > { %v3122_v14 = vadd.f32 %v6478_v32, %v3106_v10  ;;  %v3123_v44 = vadd.f32 %v6484_v17, %v3107_v62  ;;  %v3150_v24 = vmul.f32 %v3146_v43, %v5245_v18  ;;  %v3151_v56 = vmul.f32 %v3147_v55, %v5247_v19  ;;  %v3225_v36 = vpop.permute.xlu1 %3224  ;;  %v7349_v17 = vld [vmem:[#allocation22_spill] sm:$0xff] }
 0xe2f   : > { %v3228_v6 = vsel %vm1049_vm9, %v7348_v41, %v3225_v36  ;;  %v3230_v48 = vsel %vm1049_vm9, %v3225_v36, %v7348_v41  ;;  %v3247_v1 = vmul.f32 %v3243_v45, %v7351_v50 }
 0xe30   : > { %v3154_v32 = vadd.f32 %v3150_v24, %v3122_v14  ;;  %v3155_v51 = vadd.f32 %v3151_v56, %v3123_v44  ;;  %v3240_v52 = vmul.f32 %v7349_v17, %v3228_v6  ;;  %v3241_v2 = vmul.f32 %v7349_v17, %v3230_v48 }
 0xe32   : > { %v3244_v40 = vmul.f32 %v3240_v52, %v7350_v53  ;;  %v3245_v59 = vmul.f32 %v3241_v2, %v7351_v50  ;;  %v3186_v54 = vadd.f32 %v3182_v49, %v3154_v32  ;;  %v3187_v58 = vadd.f32 %v3183_v25, %v3155_v51 }
 0xe34   : > { %v3218_v22 = vadd.f32 %v3214_v4, %v3186_v54  ;;  %v3219_v16 = vadd.f32 %v3215_v46, %v3187_v58  ;;  %v3249_v28 = vadd.f32 %v3245_v59, %v3217_v38  ;;  %v3248_v23 = vadd.f32 %v3244_v40, %v3216_v33  ;;  %v4211_v46 = vld [vmem:[%s7082_s8 + $0x20] sm:$0xff]  ;;  %v4221_v33 = vld [vmem:[%s7080_s6 + $0x58] sm:$0xff] }
 0xe35   : > { %v7352_v38 = vmov 0.0   ;;  %3603 = vperm.xlu1 %4412, %v4221_v33   ;;  %3571 = vperm.xlu0 %4411, %v4221_v33   ;;  %v7353_v40 = vmov 3   ;;  %v7354_v59 = vld [vmem:[#allocation12_spill] sm:$0xff]  ;;  %v7355_v54 = vmov 4   ;;  %v7356_v58 = vmov 5  }
 0xe36   : > { %v3250_v63 = vadd.f32 %v3246_v5, %v3218_v22  ;;  %v3251_v30 = vadd.f32 %v3247_v1, %v3219_v16  ;;  %v7357_v5 = vmov 6   ;;  %v7358_v1 = vmov 7  }
 0xe37   : > { %v3263_v34 = vpop.permute.xlu0 %3262  ;;  %v7359_v22 = vmov 8   ;;  %v7360_v16 = vmov 0  }
 0xe38   : > { %v3267_v3 = vadd.f32 %v3263_v34, %v3250_v63  ;;  %v3268_v8 = vadd.f32 %v3263_v34, %v3251_v30 }
 0xe39   : > { %4414 = vset.pattern.permute.xlu1 %v7353_v40  ;;  %4413 = vset.pattern.permute.xlu0 %v7353_v40 }
 0xe3a   : > { %v3271_v9 = vsub.f32 0.0, %v3267_v3  ;;  %v3272_v37 = vsub.f32 0.0, %v3268_v8  ;;  %3635 = vperm.xlu1 %4414, %v4221_v33   ;;  %3631 = vperm.xlu0 %4413, %v7354_v59  }
 0xe3c   : > { %v3277_v12 = vmul.f32 1.442695, %v3271_v9  ;;  %v3279_v0 = vmul.f32 1.442695, %v3272_v37 }
 0xe3e   : > { %4626 = vpow2.f32 %v3277_v12  ;;  %4415 = vset.pattern.permute.xlu1 %v7355_v54  ;;  %4416 = vset.pattern.permute.xlu0 %v7355_v54 }
 0xe3f   : > { %v3258_v10 = vpop.permute.xlu1 %3257  ;;  %4628 = vpow2.f32 %v3279_v0  ;;  %3651 = vperm.xlu1 %4415, %v7354_v59   ;;  %3655 = vperm.xlu0 %4416, %v4221_v33  }
 0xe40   : > { %v3265_v62 = vadd.f32 %v3258_v10, %v3248_v23  ;;  %v3266_v43 = vadd.f32 %v3258_v10, %v3249_v28 }
 0xe42   : > { %v3269_v55 = vsub.f32 0.0, %v3265_v62  ;;  %v3270_v49 = vsub.f32 0.0, %v3266_v43 }
 0xe43   : > { %4417 = vset.pattern.permute.xlu1 %v7356_v58  ;;  %4418 = vset.pattern.permute.xlu0 %v7357_v5  ;;  %v3304_v28 = vpop.permute.xlu1 %3303 }
 0xe44   : > { %v3273_v25 = vmul.f32 1.442695, %v3269_v55  ;;  %v3275_v47 = vmul.f32 1.442695, %v3270_v49  ;;  %3679 = vperm.xlu1 %4417, %v7354_v59   ;;  %3711 = vperm.xlu0 %4418, %v7354_v59  }
 0xe46   : > { %4630 = vpow2.f32 %v3273_v25 }
 0xe47   : > { %4632 = vpow2.f32 %v3275_v47  ;;  %v4214_v47 = vld [vmem:[%s7078_s4 + $0x50] sm:$0xff] }
 0xe48   : > { %v4627_v61 = vpop.eup %4626  ;;  %3683 = vperm.xlu1 %4417, %v4221_v33   ;;  %4421 = vset.pattern.permute.xlu0 %v7358_v1 }
 0xe49   : > { %v4629_v14 = vpop.eup %4628  ;;  %v3283_v44 = vadd.f32 1.0, %v4627_v61  ;;  %3747 = vperm.xlu0 %4421, %v4221_v33   ;;  %v4215_v61 = vld [vmem:[%s7078_s4 + $0x58] sm:$0xff] }
 0xe4a   : > { %v3284_v24 = vadd.f32 1.0, %v4629_v14  ;;  %v3403_v14 = vpop.permute.xlu1 %3402 }
 0xe4b   : > { %4634 = vrcp.f32 %v3283_v44 }
 0xe4c   : > { %4636 = vrcp.f32 %v3284_v24  ;;  %4419 = vset.pattern.permute.xlu1 %v7357_v5 }
 0xe4d   : > { %3715 = vperm.xlu1 %4419, %v4221_v33   ;;  %4422 = vset.pattern.permute.xlu0 %v7359_v22 }
 0xe4e   : > { %3775 = vperm.xlu0 %4422, %v7354_v59  }
 0xe50   : > { %v4631_v56 = vpop.eup %4630 }
 0xe51   : > { %v4633_v36 = vpop.eup %4632  ;;  %v3281_v26 = vadd.f32 1.0, %v4631_v56  ;;  %4420 = vset.pattern.permute.xlu1 %v7358_v1 }
 0xe52   : > { %v3282_v11 = vadd.f32 1.0, %v4633_v36  ;;  %3743 = vperm.xlu1 %4420, %v7354_v59   ;;  %4423 = vset.pattern.permute.xlu0 %v7360_v16  ;;  %v6768_v36 = vpop.permute.xlu1 %3538 }
 0xe53   : > { %4638 = vrcp.f32 %v3281_v26  ;;  %3543 = vperm.xlu0 %4423, %v4221_v33  }
 0xe54   : > { %4640 = vrcp.f32 %v3282_v11 }
 0xe55   : > { %v4635_v45 = vpop.eup %4634 }
 0xe56   : > { %v4637_v41 = vpop.eup %4636  ;;  %v3295_v32 = vmul.f32 %v4635_v45, %v3267_v3  ;;  %4424 = vset.pattern.permute.xlu1 %v7359_v22  ;;  %v3408_v45 = vpop.permute.xlu0 %3407 }
 0xe57   : > { %v3296_v17 = vmul.f32 %v4637_v41, %v3268_v8  ;;  %3779 = vperm.xlu1 %4424, %v4221_v33  }
 0xe5b   : > { %4425 = vset.pattern.permute.xlu1 %v7360_v16 }
 0xe5d   : > { %v4639_v6 = vpop.eup %4638 }
 0xe5e   : > { %v4641_v48 = vpop.eup %4640  ;;  %v3293_v51 = vmul.f32 %v4639_v6, %v3265_v62 }
 0xe5f   : > { %v3294_v52 = vmul.f32 %v4641_v48, %v3266_v43 }
 0xe60   : > { %v4258_v2 = vpack.c.bf16 %v3295_v32, %v3293_v51 }
 0xe61   : > { %v4256_v4 = vpack.c.bf16 %v3296_v17, %v3294_v52 }
 0xe63   : > { %4257 = vmatprep.subr.bf16.mxu1 %v4256_v4 }
 0xe64   : > { %4259 = vmatpush1.bf16.msra.mxu1 %v4258_v2  ;;  %v6770_v2 = vpop.permute.xlu1 %3567 }
 0xe67   : > { %4213 = vmatmul.mubr.msk.f32.vlgmr.msra.gmra.mrb[18].mxu1 %vm437_vm0, %v4211_v46 }
 0xe68   : > { %3480 = vmatprep.mubr.f32.mxu1 %v7352_v38  ;;  %v6772_v59 = vpop.permute.xlu1 %3599 }
 0xeb4   : > { %v6774_v1 = vpop.permute.xlu1 %3603 }
 0xf3a   : > { %v3375_v23 = vpop.f32.mrb[18].mxu1 }
 0xf3b   : > { %v3376_v63 = vadd.f32 %v3375_v23, %v3304_v28  ;;  %v3377_v30 = vpop.f32.mrb[19].mxu1 }
 0xf3c   : > { %v3378_v34 = vadd.f32 %v3377_v30, %v3304_v28 }
 0xf3d   : > { %v3380_v3 = vsub.f32 0.0, %v3376_v63 }
 0xf3e   : > { %v3381_v8 = vsub.f32 0.0, %v3378_v34 }
 0xf3f   : > { %v3382_v9 = vmul.f32 1.442695, %v3380_v3 }
 0xf40   : > { %v3384_v37 = vmul.f32 1.442695, %v3381_v8 }
 0xf41   : > { %4642 = vpow2.f32 %v3382_v9 }
 0xf42   : > { %4644 = vpow2.f32 %v3384_v37 }
 0xf4b   : > { %v4643_v12 = vpop.eup %4642 }
 0xf4c   : > { %v4645_v0 = vpop.eup %4644  ;;  %v3386_v10 = vadd.f32 1.0, %v4643_v12 }
 0xf4d   : > { %v3387_v62 = vadd.f32 1.0, %v4645_v0 }
 0xf4e   : > { %4646 = vrcp.f32 %v3386_v10 }
 0xf4f   : > { %4648 = vrcp.f32 %v3387_v62 }
 0xf58   : > { %v4647_v43 = vpop.eup %4646 }
 0xf59   : > { %v4649_v55 = vpop.eup %4648  ;;  %v3392_v25 = vmul.f32 %v4647_v43, %v3376_v63  ;;  %v6776_v63 = vpop.permute.xlu0 %3571 }
 0xf5a   : > { %v3393_v49 = vmul.f32 %v4649_v55, %v3378_v34  ;;  %v6778_v34 = vpop.permute.xlu1 %3635 }
 0xf5c   : > { %3416 = vmatprep.subr.mxu1 %v3393_v49 }
 0xf5d   : > { %3417 = vmatpush1.msra.mxu1 %v3392_v25  ;;  %v6780_v3 = vpop.permute.xlu0 %3631 }
 0xf5e   : > { %4218 = vmatmul.mubr.msk.f32.vlgmr.msra.gmra.mrb[20].mxu1 %vm603_vm1, %v4214_v47  ;;  %v3652_v9 = vpop.permute.xlu1 %3651 }
 0xf5f   : > { %3486 = vmatprep.mubr.f32.mxu1 %v7352_v38 }
 0xf61   : > { %v3656_v55 = vpop.permute.xlu0 %3655 }
 0xf62   : > { %4219 = vmatmul.mubr.msk.f32.gmra.mrb[22].mxu1 %vm603_vm1, %v4215_v61 }
0x1031   : > { %v3482_v44 = vpop.f32.mrb[20].mxu1 }
0x1032   : > { %v3483_v24 = vadd.f32 %v3482_v44, %v3403_v14  ;;  %v3484_v56 = vpop.f32.mrb[21].mxu1  ;;  %v4223_v44 = vld [vmem:[%s7081_s7 + $0x58] sm:$0xff] }
0x1033   : > { %v3485_v26 = vadd.f32 %v3484_v56, %v3403_v14  ;;  %v4222_v56 = vld [vmem:[%s7081_s7 + $0x50] sm:$0xff] }
0x1034   : > { %v3493_v11 = vsub.f32 0.0, %v3483_v24 }
0x1035   : > { %v3494_v41 = vsub.f32 0.0, %v3485_v26  ;;  %v3488_v6 = vpop.f32.mrb[22].mxu1 }
0x1036   : > { %v3497_v48 = vmul.f32 1.442695, %v3493_v11  ;;  %v3489_v32 = vadd.f32 %v3488_v6, %v3408_v45  ;;  %v3490_v51 = vpop.f32.mrb[23].mxu1  ;;  %v3938_v11 = vld [vmem:[%s7085_s11] sm:$0xff] }
0x1037   : > { %v3499_v17 = vmul.f32 1.442695, %v3494_v41  ;;  %v3491_v52 = vadd.f32 %v3490_v51, %v3408_v45  ;;  %v6837_v45 = vpop.permute.xlu1 %3679  ;;  %v6839_v41 = vpop.permute.xlu0 %3711 }
0x1038   : > { %4650 = vpow2.f32 %v3497_v48  ;;  %v3495_v4 = vsub.f32 0.0, %v3489_v32 }
0x1039   : > { %4652 = vpow2.f32 %v3499_v17  ;;  %v3496_v46 = vsub.f32 0.0, %v3491_v52 }
0x103a   : > { %v3501_v33 = vmul.f32 1.442695, %v3495_v4 }
0x103b   : > { %v3503_v40 = vmul.f32 1.442695, %v3496_v46  ;;  %v6841_v6 = vpop.permute.xlu1 %3683  ;;  %v6843_v48 = vpop.permute.xlu0 %3747 }
0x103c   : > { %4654 = vpow2.f32 %v3501_v33 }
0x103d   : > { %4656 = vpow2.f32 %v3503_v40 }
0x103f   : > { %v6847_v51 = vpop.permute.xlu0 %3775 }
0x1040   : > { %7361 = vst [vmem:[#allocation15_spill] sm:$0xff] %v6847_v51 }
0x1042   : > { %v4651_v54 = vpop.eup %4650 }
0x1043   : > { %v4653_v58 = vpop.eup %4652  ;;  %v3505_v5 = vadd.f32 1.0, %v4651_v54 }
0x1044   : > { %v3506_v22 = vadd.f32 1.0, %v4653_v58 }
0x1045   : > { %4658 = vrcp.f32 %v3505_v5 }
0x1046   : > { %v4655_v16 = vpop.eup %4654  ;;  %4660 = vrcp.f32 %v3506_v22 }
0x1047   : > { %v4657_v28 = vpop.eup %4656  ;;  %v3507_v23 = vadd.f32 1.0, %v4655_v16 }
0x1048   : > { %v3508_v30 = vadd.f32 1.0, %v4657_v28 }
0x1049   : > { %4662 = vrcp.f32 %v3507_v23 }
0x104a   : > { %4664 = vrcp.f32 %v3508_v30 }
0x104f   : > { %v4659_v8 = vpop.eup %4658 }
0x1050   : > { %v4661_v37 = vpop.eup %4660  ;;  %v3517_v12 = vmul.f32 %v4659_v8, %v3483_v24  ;;  %v3939_v24 = vld [vmem:[%s7085_s11 + $0x8] sm:$0xff] }
0x1051   : > { %v3518_v0 = vmul.f32 %v4661_v37, %v3485_v26  ;;  %v4225_v26 = vld [vmem:[%s7083_s9 + $0x28] sm:$0xff] }
0x1052   : > { %v6782_v10 = vmul.f32 %v3652_v9, %v3517_v12  ;;  %3618 = vrot.lane.b32.xlu0 %v3517_v12, %s7227_s19  ;;  %3524 = vrot.lane.b32.xlu1 %v3517_v12, %s7253_s29 }
0x1053   : > { %v4663_v62 = vpop.eup %4662  ;;  %v6786_v43 = vmul.f32 %v3652_v9, %v3518_v0 }
0x1054   : > { %v4665_v49 = vpop.eup %4664  ;;  %v3519_v25 = vmul.f32 %v4663_v62, %v3489_v32  ;;  %v6845_v32 = vpop.permute.xlu1 %3715 }
0x1055   : > { %v3520_v47 = vmul.f32 %v4665_v49, %v3491_v52  ;;  %v6851_v52 = vpop.permute.xlu0 %3543 }
0x1056   : > { %v6788_v61 = vmul.f32 %v3656_v55, %v3519_v25  ;;  %3622 = vrot.lane.b32.xlu0 %v3518_v0, %s7227_s19  ;;  %3554 = vrot.lane.b32.xlu1 %v3517_v12, %s7254_s18 }
0x1057   : > { %v6792_v14 = vmul.f32 %v3656_v55, %v3520_v47 }
0x1058   : > { %v6849_v17 = vpop.permute.xlu1 %3743 }
0x105a   : > { %3670 = vrot.lane.b32.xlu0 %v3518_v0, %s7228_s16  ;;  %3586 = vrot.lane.b32.xlu1 %v3517_v12, %s7255_s17 }
0x105c   : > { %v6853_v4 = vpop.permute.xlu1 %3779 }
0x105e   : > { %3526 = vrot.lane.b32.xlu0 %v3519_v25, %s7253_s29  ;;  %3666 = vrot.lane.b32.xlu1 %v3517_v12, %s7228_s16 }
0x1062   : > { %3556 = vrot.lane.b32.xlu0 %v3519_v25, %s7254_s18  ;;  %3698 = vrot.lane.b32.xlu1 %v3517_v12, %s7256_s26 }
0x1066   : > { %3588 = vrot.lane.b32.xlu0 %v3519_v25, %s7255_s17  ;;  %3730 = vrot.lane.b32.xlu1 %v3517_v12, %s7257_s28 }
0x106a   : > { %3700 = vrot.lane.b32.xlu0 %v3519_v25, %s7256_s26  ;;  %3762 = vrot.lane.b32.xlu1 %v3517_v12, %s7313_s27 }
0x106e   : > { %3732 = vrot.lane.b32.xlu0 %v3519_v25, %s7257_s28  ;;  %3528 = vrot.lane.b32.xlu1 %v3518_v0, %s7253_s29 }
0x1072   : > { %3764 = vrot.lane.b32.xlu0 %v3519_v25, %s7313_s27  ;;  %3558 = vrot.lane.b32.xlu1 %v3518_v0, %s7254_s18 }
0x1076   : > { %3530 = vrot.lane.b32.xlu0 %v3520_v47, %s7253_s29  ;;  %3590 = vrot.lane.b32.xlu1 %v3518_v0, %s7255_s17 }
0x107a   : > { %3560 = vrot.lane.b32.xlu0 %v3520_v47, %s7254_s18  ;;  %3702 = vrot.lane.b32.xlu1 %v3518_v0, %s7256_s26 }
0x107e   : > { %3592 = vrot.lane.b32.xlu0 %v3520_v47, %s7255_s17  ;;  %3734 = vrot.lane.b32.xlu1 %v3518_v0, %s7257_s28  ;;  %s404_s17 = sand.u32 1, %s4760_s22  }
0x107f   : > { %s4146_s1 = sshll.u32 %s404_s17, 5 }
0x1082   : > { %3704 = vrot.lane.b32.xlu0 %v3520_v47, %s7256_s26  ;;  %3620 = vrot.lane.b32.xlu1 %v3519_v25, %s7227_s19  ;;  %s406_s26 = scalar_lea.vmem [#allocation2], %s4146_s1 }
0x1086   : > { %3736 = vrot.lane.b32.xlu0 %v3520_v47, %s7257_s28  ;;  %3668 = vrot.lane.b32.xlu1 %v3519_v25, %s7228_s16  ;;  %s4080_s28 = sshll.u32 %s406_s26, 4  ;;  %s7025_s28 = int_to_ptr.vmem [resolvable:$true] %s4080_s28 }
0x108a   : > { %3768 = vrot.lane.b32.xlu0 %v3520_v47, %s7313_s27  ;;  %3624 = vrot.lane.b32.xlu1 %v3520_v47, %s7227_s19  ;;  %s4235_s19 = sshll.u32 %s4876_s25, 9  ;;  %s4706_s25 = scalar_lea.vmem %s7025_s28, 512 }
0x108b   : > { %s7030_s20 = scalar_lea.hbm %s7086_s12, %s4235_s19  ;;  %p4707_p11 = scmp.ne.s32.totalorder %s7025_s28, %s4706_s25 }
0x108d   : > { %p4708_p12 = pnand %p4707_p11, %p4893_p5 }
0x108e   : > { %3804 = vperm.xlu0 %4423, %v4223_v44   ;;  %3672 = vrot.lane.b32.xlu1 %v3520_v47, %s7228_s16  ;;  %s7032_s16 = scalar_lea.sflag [#allocation3], %s404_s17 }
0x108f   : > { %p4709_p13 = pneg %p4708_p12 }
0x1092   : > { %3947 = vperm.xlu0 %4423, %v3939_v24   ;;  %3766 = vrot.lane.b32.xlu1 %v3518_v0, %s7313_s27  ;;  %s4788_s27 = smov [#allocation2]  }
0x1093   : > { %s4710_s0 = sshll.u32 %s4788_s27, 4  ;;  %s4711_s0 = int_to_ptr.vmem [resolvable:$false] %s4710_s0 }
0x1094   : > { %s4712_s2 = scalar_lea.vmem %s4711_s0, 1024  ;;  %p4713_p0 = scmp.lt.s32.totalorder %s7025_s28, %s4711_s0 }
0x1095   : > { %p4714_p1 = scmp.lt.s32.totalorder %s4712_s2, %s4706_s25 }
0x1096   : > { %3799 = vperm.xlu1 %4425, %v4222_v56  }
0x1097   : > { %p4715_p2 = por %p4714_p1, %p4713_p0 }
0x1099   : > { %p4716_p3 = pnand %p4715_p2, %p4709_p13 }
0x109a   : > { %3845 = vperm.xlu1 %4425, %v4225_v26  }
0x109e   : > { %3942 = vperm.xlu1 %4425, %v3938_v11  }
0x10c4   : > { %v3619_v46 = vpop.permute.xlu0 %3618  ;;  %v3525_v33 = vpop.permute.xlu1 %3524 }
0x10c8   : > { %v3623_v40 = vpop.permute.xlu0 %3622  ;;  %v3555_v54 = vpop.permute.xlu1 %3554 }
0x10c9   : > { %v3626_v26 = vsel %vm857_vm6, %v3619_v46, %v3623_v40  ;;  %v3628_v11 = vsel %vm857_vm6, %v3623_v40, %v3619_v46 }
0x10ca   : > { %v3639_v46 = vmul.f32 %v6780_v3, %v3626_v26 }
0x10cc   : > { %v3671_v58 = vpop.permute.xlu0 %3670  ;;  %v3587_v5 = vpop.permute.xlu1 %3586 }
0x10d0   : > { %v3527_v22 = vpop.permute.xlu0 %3526  ;;  %v3667_v16 = vpop.permute.xlu1 %3666 }
0x10d1   : > { %v3674_v26 = vsel %vm917_vm7, %v3667_v16, %v3671_v58 }
0x10d4   : > { %v3557_v28 = vpop.permute.xlu0 %3556  ;;  %v3699_v23 = vpop.permute.xlu1 %3698 }
0x10d8   : > { %v3589_v30 = vpop.permute.xlu0 %3588  ;;  %v6855_v8 = vpop.permute.xlu1 %3730 }
0x10dc   : > { %v6857_v9 = vpop.permute.xlu0 %3700  ;;  %v6859_v37 = vpop.permute.xlu1 %3762 }
0x10dd   : > { %7362 = vst [vmem:[#allocation21_spill] sm:$0xff] %v6859_v37 }
0x10e0   : > { %v6861_v12 = vpop.permute.xlu0 %3732  ;;  %v3529_v0 = vpop.permute.xlu1 %3528 }
0x10e1   : > { %v3532_v62 = vsel %vm727_vm2, %v3525_v33, %v3529_v0  ;;  %v3534_v55 = vsel %vm727_vm2, %v3529_v0, %v3525_v33 }
0x10e2   : > { %v3546_v33 = vmul.f32 %v6768_v36, %v3534_v55  ;;  %v3547_v0 = vmul.f32 %v6768_v36, %v3532_v62 }
0x10e4   : > { %v6867_v49 = vpop.permute.xlu0 %3764  ;;  %v3559_v25 = vpop.permute.xlu1 %3558  ;;  %v3550_v40 = vmul.f32 %v3546_v33, %v5163_v29  ;;  %v3551_v36 = vmul.f32 %v3547_v0, %v5169_v31 }
0x10e5   : > { %v3562_v47 = vsel %vm769_vm3, %v3555_v54, %v3559_v25  ;;  %v3564_v44 = vsel %vm769_vm3, %v3559_v25, %v3555_v54 }
0x10e6   : > { %v3574_v24 = vmul.f32 %v6770_v2, %v3564_v44  ;;  %v3575_v56 = vmul.f32 %v6770_v2, %v3562_v47  ;;  %v3638_v47 = vmul.f32 %v6780_v3, %v3628_v11  ;;  %v3643_v3 = vmul.f32 %v3639_v46, %v5242_v57 }
0x10e7   : > { %v3676_v11 = vsel %vm917_vm7, %v3671_v58, %v3667_v16  ;;  %v3686_v46 = vmul.f32 %v6837_v45, %v3674_v26 }
0x10e8   : > { %v3531_v38 = vpop.permute.xlu0 %3530  ;;  %v3591_v50 = vpop.permute.xlu1 %3590  ;;  %v3578_v53 = vmul.f32 %v3574_v24, %v5171_v13  ;;  %v3579_v54 = vmul.f32 %v3575_v56, %v5183_v60 }
0x10e9   : > { %v3594_v25 = vsel %vm813_vm4, %v3587_v5, %v3591_v50  ;;  %v3596_v2 = vsel %vm813_vm4, %v3591_v50, %v3587_v5  ;;  %v3642_v5 = vmul.f32 %v3638_v47, %v5240_v39 }
0x10ea   : > { %v3606_v62 = vmul.f32 %v6772_v59, %v3596_v2  ;;  %v3607_v55 = vmul.f32 %v6772_v59, %v3594_v25  ;;  %v3582_v56 = vadd.f32 %v3578_v53, %v3550_v40  ;;  %v3583_v51 = vadd.f32 %v3579_v54, %v3551_v36 }
0x10eb   : > { %v3687_v40 = vmul.f32 %v6837_v45, %v3676_v11  ;;  %v3533_v36 = vsel %vm727_vm2, %v3527_v22, %v3531_v38 }
0x10ec   : > { %v3561_v44 = vpop.permute.xlu0 %3560  ;;  %v3703_v24 = vpop.permute.xlu1 %3702  ;;  %v3610_v37 = vmul.f32 %v3606_v62, %v5211_v7  ;;  %v3611_v50 = vmul.f32 %v3607_v55, %v5213_v15 }
0x10ed   : > { %v3563_v2 = vsel %vm769_vm3, %v3557_v28, %v3561_v44  ;;  %v3565_v47 = vsel %vm769_vm3, %v3561_v44, %v3557_v28  ;;  %v3706_v62 = vsel %vm961_vm5, %v3699_v23, %v3703_v24  ;;  %v3708_v45 = vsel %vm961_vm5, %v3703_v24, %v3699_v23 }
0x10ee   : > { %v3614_v33 = vadd.f32 %v3610_v37, %v3582_v56  ;;  %v3615_v59 = vadd.f32 %v3611_v50, %v3583_v51  ;;  %v3535_v51 = vsel %vm727_vm2, %v3531_v38, %v3527_v22  ;;  %v3576_v37 = vmul.f32 %v6776_v63, %v3565_v47 }
0x10ef   : > { %v3577_v28 = vmul.f32 %v6776_v63, %v3563_v2  ;;  %v3548_v56 = vmul.f32 %v6851_v52, %v3535_v51  ;;  %v3718_v23 = vmul.f32 %v6839_v41, %v3706_v62  ;;  %v3719_v24 = vmul.f32 %v6839_v41, %v3708_v45 }
0x10f0   : > { %v3593_v0 = vpop.permute.xlu0 %3592  ;;  %v3735_v25 = vpop.permute.xlu1 %3734  ;;  %v3646_v53 = vadd.f32 %v3642_v5, %v3614_v33  ;;  %v3647_v54 = vadd.f32 %v3643_v3, %v3615_v59  ;;  %v3690_v5 = vmul.f32 %v3686_v46, %v5245_v18  ;;  %v3691_v3 = vmul.f32 %v3687_v40, %v5247_v19 }
0x10f1   : > { %v3595_v58 = vsel %vm813_vm4, %v3589_v30, %v3593_v0  ;;  %v3597_v16 = vsel %vm813_vm4, %v3593_v0, %v3589_v30  ;;  %v3549_v30 = vmul.f32 %v6851_v52, %v3533_v36  ;;  %v3738_v52 = vsel %vm1005_vm8, %v6855_v8, %v3735_v25 }
0x10f2   : > { %v3663_v38 = vadd.f32 %v6786_v43, %v3647_v54  ;;  %v3662_v22 = vadd.f32 %v6782_v10, %v3646_v53  ;;  %v3608_v50 = vmul.f32 %v6774_v1, %v3597_v16  ;;  %v3609_v63 = vmul.f32 %v6774_v1, %v3595_v58 }
0x10f3   : > { %v3580_v43 = vmul.f32 %v3576_v37, %v5171_v13  ;;  %v3581_v10 = vmul.f32 %v3577_v28, %v5183_v60  ;;  %v3740_v1 = vsel %vm1005_vm8, %v3735_v25, %v6855_v8  ;;  %v3552_v0 = vmul.f32 %v3548_v56, %v5163_v29 }
0x10f4   : > { %v3705_v55 = vpop.permute.xlu0 %3704  ;;  %v3621_v44 = vpop.permute.xlu1 %3620  ;;  %v3695_v33 = vadd.f32 %v3691_v3, %v3663_v38  ;;  %v3694_v59 = vadd.f32 %v3690_v5, %v3662_v22  ;;  %v3553_v41 = vmul.f32 %v3549_v30, %v5169_v31  ;;  %v3612_v13 = vmul.f32 %v3608_v50, %v5211_v7 }
0x10f5   : > { %v3613_v60 = vmul.f32 %v3609_v63, %v5213_v15  ;;  %v3722_v53 = vmul.f32 %v3718_v23, %v5202_v20  ;;  %v3723_v54 = vmul.f32 %v3719_v24, %v5209_v21  ;;  %v3750_v2 = vmul.f32 %v6849_v17, %v3738_v52 }
0x10f6   : > { %v3751_v8 = vmul.f32 %v6849_v17, %v3740_v1  ;;  %v3584_v25 = vadd.f32 %v3580_v43, %v3552_v0  ;;  %v3585_v47 = vadd.f32 %v3581_v10, %v3553_v41  ;;  %v3707_v29 = vsel %vm961_vm5, %v6857_v9, %v3705_v55  ;;  %v7365_v41 = vld [vmem:[#allocation16_spill] sm:$0xff] }
0x10f7   : > { %v3709_v31 = vsel %vm961_vm5, %v3705_v55, %v6857_v9  ;;  %v3726_v15 = vadd.f32 %v3722_v53, %v3694_v59  ;;  %v3727_v46 = vadd.f32 %v3723_v54, %v3695_v33  ;;  %v3754_v28 = vmul.f32 %v3750_v2, %v7325_v42 }
0x10f8   : > { %v3737_v26 = vpop.permute.xlu0 %3736  ;;  %v3669_v11 = vpop.permute.xlu1 %3668  ;;  %v3616_v17 = vadd.f32 %v3612_v13, %v3584_v25  ;;  %v3617_v51 = vadd.f32 %v3613_v60, %v3585_v47  ;;  %v3755_v9 = vmul.f32 %v3751_v8, %v7326_v27  ;;  %v3720_v62 = vmul.f32 %v6845_v32, %v3707_v29  ;;  %v7366_v60 = vld [vmem:[#allocation17_spill] sm:$0xff] }
0x10f9   : > { %v3721_v45 = vmul.f32 %v6845_v32, %v3709_v31  ;;  %v3739_v55 = vsel %vm1005_vm8, %v6861_v12, %v3737_v26 }
0x10fa   : > { %v3724_v5 = vmul.f32 %v3720_v62, %v5202_v20  ;;  %v3752_v23 = vmul.f32 %v6843_v48, %v3739_v55  ;;  %v7363_v20 = vld [vmem:[#allocation21_spill] sm:$0xff]  ;;  %v3759_v0 = vadd.f32 %v3755_v9, %v3727_v46 }
0x10fb   : > { %v3725_v3 = vmul.f32 %v3721_v45, %v5209_v21 }
0x10fc   : > { %v3625_v7 = vpop.permute.xlu1 %3624  ;;  %v3769_v58 = vpop.permute.xlu0 %3768 }
0x10fd   : > { %v3627_v40 = vsel %vm857_vm6, %v3621_v44, %v3625_v7  ;;  %v3629_v36 = vsel %vm857_vm6, %v3625_v7, %v3621_v44  ;;  %v3741_v44 = vsel %vm1005_vm8, %v3737_v26, %v6861_v12  ;;  %v3771_v56 = vsel %vm1049_vm9, %v6867_v49, %v3769_v58 }
0x10fe   : > { %v3640_v16 = vmul.f32 %v6778_v34, %v3629_v36  ;;  %v3641_v37 = vmul.f32 %v6778_v34, %v3627_v40  ;;  %v3773_v32 = vsel %vm1049_vm9, %v3769_v58, %v6867_v49  ;;  %v3753_v49 = vmul.f32 %v6843_v48, %v3741_v44 }
0x10ff   : > { %v3784_v26 = vmul.f32 %v6853_v4, %v3771_v56 }
0x1100   : > { %v3644_v38 = vmul.f32 %v3640_v16, %v5240_v39  ;;  %v3645_v34 = vmul.f32 %v3641_v37, %v5242_v57  ;;  %v3673_v22 = vpop.permute.xlu1 %3672  ;;  %v3757_v59 = vmul.f32 %v3753_v49, %v7326_v27 }
0x1101   : > { %v3675_v30 = vsel %vm917_vm7, %v3669_v11, %v3673_v22  ;;  %v3677_v50 = vsel %vm917_vm7, %v3673_v22, %v3669_v11  ;;  %v3788_v35 = vmul.f32 %v3784_v26, %v7365_v41  ;;  %v7369_v26 = vld [vmem:[#allocation9_spill] sm:$0xff] }
0x1102   : > { %v3648_v12 = vadd.f32 %v3644_v38, %v3616_v17  ;;  %v3649_v63 = vadd.f32 %v3645_v34, %v3617_v51  ;;  %v3688_v39 = vmul.f32 %v6841_v6, %v3675_v30  ;;  %v3689_v57 = vmul.f32 %v6841_v6, %v3677_v50 }
0x1103   : > { %v3785_v6 = vmul.f32 %v6853_v4, %v3773_v32  ;;  %v3758_v4 = vadd.f32 %v3754_v28, %v3726_v15 }
0x1104   : > { %v3664_v24 = vadd.f32 %v6788_v61, %v3648_v12  ;;  %v3665_v43 = vadd.f32 %v6792_v14, %v3649_v63  ;;  %v3692_v10 = vmul.f32 %v3688_v39, %v5245_v18  ;;  %v3693_v52 = vmul.f32 %v3689_v57, %v5247_v19  ;;  %v3767_v1 = vpop.permute.xlu1 %3766  ;;  %v7364_v14 = vld [vmem:[#allocation15_spill] sm:$0xff] }
0x1105   : > { %v3770_v21 = vsel %vm1049_vm9, %v7363_v20, %v3767_v1  ;;  %v3772_v48 = vsel %vm1049_vm9, %v3767_v1, %v7363_v20  ;;  %v3756_v19 = vmul.f32 %v3752_v23, %v7325_v42  ;;  %v3789_v8 = vmul.f32 %v3785_v6, %v7366_v60  ;;  %v4224_v1 = vld [vmem:[%s7082_s8 + $0x28] sm:$0xff]  ;;  %v7370_v6 = vld [vmem:[#allocation19_spill] sm:$0xff] }
0x1106   : > { %v3696_v61 = vadd.f32 %v3692_v10, %v3664_v24  ;;  %v3697_v11 = vadd.f32 %v3693_v52, %v3665_v43  ;;  %v3782_v33 = vmul.f32 %v7364_v14, %v3770_v21  ;;  %v3783_v18 = vmul.f32 %v7364_v14, %v3772_v48  ;;  %v7367_v43 = vld [vmem:[#allocation8_spill] sm:$0xff] }
0x1107   : > { %v7368_v10 = vld [vmem:[#allocation20_spill] sm:$0xff]  ;;  %v4266_v20 = vpack.c.bf16 %v7370_v6, %v7369_v26  ;;  %v7371_v21 = vmov 0.0  }
0x1108   : > { %v3786_v13 = vmul.f32 %v3782_v33, %v7365_v41  ;;  %v3787_v53 = vmul.f32 %v3783_v18, %v7366_v60  ;;  %v3728_v54 = vadd.f32 %v3724_v5, %v3696_v61  ;;  %v3729_v2 = vadd.f32 %v3725_v3, %v3697_v11 }
0x1109   : > { %v4264_v52 = vpack.c.bf16 %v7368_v10, %v7367_v43 }
0x110a   : > { %v3760_v25 = vadd.f32 %v3756_v19, %v3728_v54  ;;  %v3761_v47 = vadd.f32 %v3757_v59, %v3729_v2  ;;  %v3791_v29 = vadd.f32 %v3787_v53, %v3759_v0  ;;  %v3790_v31 = vadd.f32 %v3786_v13, %v3758_v4 }
0x110c   : > { %v3792_v7 = vadd.f32 %v3788_v35, %v3760_v25  ;;  %v3793_v42 = vadd.f32 %v3789_v8, %v3761_v47  ;;  %v3936_v8 = vld [vmem:[%s7084_s10] sm:$0xff]  ;;  %v3937_v25 = vld [vmem:[%s7084_s10 + $0x8] sm:$0xff] }
0x110d   : > { %v3805_v40 = vpop.permute.xlu0 %3804 }
0x110e   : > { %v3809_v27 = vadd.f32 %v3805_v40, %v3792_v7  ;;  %v3810_v46 = vadd.f32 %v3805_v40, %v3793_v42 }
0x1110   : > { %v3813_v15 = vsub.f32 0.0, %v3809_v27  ;;  %v3814_v36 = vsub.f32 0.0, %v3810_v46 }
0x1112   : > { %v3819_v17 = vmul.f32 1.442695, %v3813_v15  ;;  %v3821_v51 = vmul.f32 1.442695, %v3814_v36 }
0x1114   : > { %4666 = vpow2.f32 %v3819_v17 }
0x1115   : > { %v3800_v58 = vpop.permute.xlu1 %3799  ;;  %4668 = vpow2.f32 %v3821_v51 }
0x1116   : > { %v3807_v16 = vadd.f32 %v3800_v58, %v3790_v31  ;;  %v3808_v37 = vadd.f32 %v3800_v58, %v3791_v29 }
0x1118   : > { %v3811_v28 = vsub.f32 0.0, %v3807_v16  ;;  %v3812_v9 = vsub.f32 0.0, %v3808_v37 }
0x1119   : > { %v3846_v48 = vpop.permute.xlu1 %3845 }
0x111a   : > { %v3815_v62 = vmul.f32 1.442695, %v3811_v28  ;;  %v3817_v45 = vmul.f32 1.442695, %v3812_v9 }
0x111c   : > { %4670 = vpow2.f32 %v3815_v62 }
0x111d   : > { %4672 = vpow2.f32 %v3817_v45  ;;  %v3943_v47 = vpop.permute.xlu1 %3942 }
0x111e   : > { %v4667_v55 = vpop.eup %4666 }
0x111f   : > { %v4669_v44 = vpop.eup %4668  ;;  %v3825_v38 = vadd.f32 1.0, %v4667_v55 }
0x1120   : > { %v3826_v34 = vadd.f32 1.0, %v4669_v44 }
0x1121   : > { %4674 = vrcp.f32 %v3825_v38 }
0x1122   : > { %4676 = vrcp.f32 %v3826_v34 }
0x1126   : > { %v4671_v22 = vpop.eup %4670 }
0x1127   : > { %v4673_v56 = vpop.eup %4672  ;;  %v3823_v32 = vadd.f32 1.0, %v4671_v22 }
0x1128   : > { %v3824_v30 = vadd.f32 1.0, %v4673_v56 }
0x1129   : > { %4678 = vrcp.f32 %v3823_v32 }
0x112a   : > { %4680 = vrcp.f32 %v3824_v30 }
0x112b   : > { %v4675_v50 = vpop.eup %4674 }
0x112c   : > { %v4677_v12 = vpop.eup %4676  ;;  %v3837_v57 = vmul.f32 %v4675_v50, %v3809_v27  ;;  %v3948_v27 = vpop.permute.xlu0 %3947 }
0x112d   : > { %v3838_v3 = vmul.f32 %v4677_v12, %v3810_v46 }
0x1133   : > { %v4679_v63 = vpop.eup %4678 }
0x1134   : > { %v4681_v39 = vpop.eup %4680  ;;  %v3835_v5 = vmul.f32 %v4679_v63, %v3807_v16 }
0x1135   : > { %v3836_v23 = vmul.f32 %v4681_v39, %v3808_v37 }
0x1136   : > { %v4262_v49 = vpack.c.bf16 %v3837_v57, %v3835_v5 }
0x1137   : > { %v4260_v24 = vpack.c.bf16 %v3838_v3, %v3836_v23 }
0x1139   : > { %4261 = vmatprep.subr.bf16.mxu0 %v4260_v24 }
0x113a   : > { %4263 = vmatpush1.bf16.msra.mxu0 %v4262_v49 }
0x113b   : > { %4265 = vmatprep.subr.bf16.mxu0 %v4264_v52 }
0x113d   : > { %4226 = vmatmul.mubr.msk.f32.vlgmr.msra.gmra.mrb[16].mxu0 %vm437_vm0, %v4224_v1 }
0x113e   : > { %4267 = vmatpush1.bf16.msra.mxu0 %v4266_v20  ;;  %4021 = vmatprep.mubr.f32.mxu0 %v7371_v21 }
0x1210   : > { %v3917_v61 = vpop.f32.mrb[16].mxu0 }
0x1211   : > { %v3918_v11 = vadd.f32 %v3917_v61, %v3846_v48  ;;  %v3919_v14 = vpop.f32.mrb[17].mxu0 }
0x1212   : > { %v3920_v33 = vadd.f32 %v3919_v14, %v3846_v48 }
0x1213   : > { %v3922_v18 = vsub.f32 0.0, %v3918_v11 }
0x1214   : > { %v3923_v19 = vsub.f32 0.0, %v3920_v33 }
0x1215   : > { %v3924_v59 = vmul.f32 1.442695, %v3922_v18 }
0x1216   : > { %v3926_v0 = vmul.f32 1.442695, %v3923_v19 }
0x1217   : > { %4682 = vpow2.f32 %v3924_v59 }
0x1218   : > { %4684 = vpow2.f32 %v3926_v0 }
0x1221   : > { %v4683_v4 = vpop.eup %4682 }
0x1222   : > { %v4685_v41 = vpop.eup %4684  ;;  %v3928_v13 = vadd.f32 1.0, %v4683_v4 }
0x1223   : > { %v3929_v60 = vadd.f32 1.0, %v4685_v41 }
0x1224   : > { %4686 = vrcp.f32 %v3928_v13 }
0x1225   : > { %4688 = vrcp.f32 %v3929_v60 }
0x122e   : > { %v4687_v53 = vpop.eup %4686 }
0x122f   : > { %v4689_v54 = vpop.eup %4688  ;;  %v3934_v35 = vmul.f32 %v4687_v53, %v3918_v11 }
0x1230   : > { %v3935_v2 = vmul.f32 %v4689_v54, %v3920_v33 }
0x1232   : > { %3961 = vmatprep.subr.mxu0 %v3935_v2 }
0x1233   : > { %3962 = vmatpush1.msra.mxu0 %v3934_v35 }
0x1234   : > { %4227 = vmatmul.mubr.msk.f32.vlgmr.msra.gmra.mrb[18].mxu0 %vm3950_vm10, %v3936_v8 }
0x1235   : > { %4027 = vmatprep.mubr.f32.mxu0 %v7371_v21 }
0x1238   : > { %4228 = vmatmul.mubr.msk.f32.gmra.mrb[20].mxu0 %vm3950_vm10, %v3937_v25 }
0x1307   : > { %v4023_v29 = vpop.f32.mrb[18].mxu0 }
0x1308   : > { %v4024_v31 = vadd.f32 %v4023_v29, %v3943_v47  ;;  %v4025_v7 = vpop.f32.mrb[19].mxu0 }
0x1309   : > { %v4026_v42 = vadd.f32 %v4025_v7, %v3943_v47 }
0x130a   : > { %v4034_v40 = vsub.f32 0.0, %v4024_v31 }
0x130b   : > { %v4035_v46 = vsub.f32 0.0, %v4026_v42  ;;  %v4029_v15 = vpop.f32.mrb[20].mxu0 }
0x130c   : > { %v4038_v36 = vmul.f32 1.442695, %v4034_v40  ;;  %v4030_v17 = vadd.f32 %v4029_v15, %v3948_v27  ;;  %v4031_v51 = vpop.f32.mrb[21].mxu0 }
0x130d   : > { %v4040_v58 = vmul.f32 1.442695, %v4035_v46  ;;  %v4032_v16 = vadd.f32 %v4031_v51, %v3948_v27 }
0x130e   : > { %4690 = vpow2.f32 %v4038_v36  ;;  %v4036_v37 = vsub.f32 0.0, %v4030_v17 }
0x130f   : > { %4692 = vpow2.f32 %v4040_v58  ;;  %v4037_v28 = vsub.f32 0.0, %v4032_v16 }
0x1310   : > { %v4042_v9 = vmul.f32 1.442695, %v4036_v37 }
0x1311   : > { %v4044_v62 = vmul.f32 1.442695, %v4037_v28 }
0x1312   : > { %4694 = vpow2.f32 %v4042_v9 }
0x1313   : > { %4696 = vpow2.f32 %v4044_v62 }
0x1318   : > { %v4691_v45 = vpop.eup %4690 }
0x1319   : > { %v4693_v55 = vpop.eup %4692  ;;  %v4046_v44 = vadd.f32 1.0, %v4691_v45 }
0x131a   : > { %v4047_v38 = vadd.f32 1.0, %v4693_v55 }
0x131b   : > { %4698 = vrcp.f32 %v4046_v44 }
0x131c   : > { %v4695_v34 = vpop.eup %4694  ;;  %4700 = vrcp.f32 %v4047_v38 }
0x131d   : > { %v4697_v22 = vpop.eup %4696  ;;  %v4048_v56 = vadd.f32 1.0, %v4695_v34 }
0x131e   : > { %v4049_v32 = vadd.f32 1.0, %v4697_v22 }
0x131f   : > { %4702 = vrcp.f32 %v4048_v56 }
0x1320   : > { %4704 = vrcp.f32 %v4049_v32 }
0x1325   : > { %v4699_v30 = vpop.eup %4698 }
0x1326   : > { %v4701_v50 = vpop.eup %4700  ;;  %v4058_v12 = vmul.f32 %v4699_v30, %v4024_v31 }
0x1327   : > { %v4059_v63 = vmul.f32 %v4701_v50, %v4026_v42 }
0x1328   : > { %4062 = vst [vmem:[%s406_s26] sm:$0xff] %v4058_v12 }
0x1329   : > { %v4703_v39 = vpop.eup %4702  ;;  %4063 = vst [vmem:[%s406_s26 + $0x8] sm:$0xff] %v4059_v63 }
0x132a   : > { %v4705_v57 = vpop.eup %4704  ;;  %v4060_v5 = vmul.f32 %v4703_v39, %v4030_v17 }
0x132b   : > { %v4061_v3 = vmul.f32 %v4705_v57, %v4032_v16 }
0x132c   : > { %4064 = vst [vmem:[%s406_s26 + $0x10] sm:$0xff] %v4060_v5 }
0x132d   : > { %4065 = vst [vmem:[%s406_s26 + $0x18] sm:$0xff] %v4061_v3 }
0x132e   : > { %4719 = shalt.err (!%p4716_p3)
}
0x132f   : > { %s4720_s29 = scalar_lea.hbm %s7030_s20, 512  ;;  %s4724_s1 = scalar_lea.hbm %s7086_s12, 1024 }
0x1330   : > { %p4721_p4 = scmp.ne.s32.totalorder %s7030_s20, %s4720_s29  ;;  %p4725_p9 = scmp.lt.u32.totalorder %s7030_s20, %s7086_s12 }
0x1331   : > { %p4726_p10 = scmp.lt.u32.totalorder %s4724_s1, %s4720_s29  ;;  %p4728_p12 = scmp.lt.u32.totalorder %s4720_s29, %s7030_s20 }
0x1332   : > { %p4722_p7 = pnand %p4721_p4, %p4893_p5 }
0x1333   : > { %p4727_p11 = por %p4726_p10, %p4725_p9 }
0x1334   : > { %p4723_p8 = pneg %p4722_p7 }
0x1335   : > { %p4729_p13 = por %p4728_p12, %p4727_p11 }
0x1337   : > { %p4730_p0 = pnand %p4729_p13, %p4723_p8 }
0x1339   : > { %4733 = shalt.err (!%p4730_p0)
}
0x133a   : > { %s4789_s30 = smov 256  }
0x133b   : > { %4268 = dma.vmem_to_hbm [thread:$0]  (%p4893_p5), %s7025_s28, 512, %s7030_s20, %s7032_s16, %s4789_s30, %s4789_s30, %s7254_s18  }
0x133c PF: > { %p4274_p1 = scmp.ge.s32.totalorder %s4768_s24, 2  ;;  %s4095_s23 = sand.u32 1, %s4756_s21  }
0x133d   : > { %s4096_s25 = scalar_lea.sflag [#allocation3], %s4095_s23 }
0x133e   : > { %p4271_p2 = pnand %p4274_p1, %p4897_p6 }
0x1340   : > { %4751 = dma.done.wait (!%p4271_p2), %s4096_s25, 512  }
0x1341   : > { %4753 = vsyncadd (!%p4271_p2), %s4096_s25, 4294966784  ;;  %s7372_s24 = sld [smem:[#allocation6_spill]]  ;;  %s7373_s27 = sld [smem:[#allocation5_spill]] }
0x1342   : > { %s7374_s23 = sld [smem:[#allocation7_spill]]  ;;  %s7375_s21 = smov %s4760_s22 }
0x1347   : > { %p22_p3 = scmp.ge.s32.totalorder %s7372_s24, 4   ;;  %s7376_s22 = smov %s7373_s27 }
0x1349   :  { %24 = sbr.rel (!%p22_p3) target bundleno = 7 (0x7), region = 140 }
0x1350   :  { %4101 = vsyncpa [#allocation3], 1 }
0x1351   :  { %4103 = vsyncpa [#allocation3 + $0x1], 1 }

</bundles_post_ra>
